<compile_context>
chip_gen: v5e
topology: v5e:2x2
jax: 0.10.0
libtpu: 0.0.40
codegen_flags: <defaults>
</compile_context>

<pallas_src>
import functools

import jax
import jax.numpy as jnp
from jax.experimental import pallas as pl
from jax.experimental.pallas import tpu as pltpu


# ---------------------------------------------------------------------------
# helpers
# ---------------------------------------------------------------------------
def _pick_tile(n, target, mult=1):
    """Largest tile <= target that divides n and is a multiple of `mult`
    (falls back to the full extent -> single block)."""
    if n <= target:
        return n
    t = target - (target % mult) if mult > 1 else target
    while t >= mult:
        if n % t == 0:
            return t
        t -= mult
    return n


# ---------------------------------------------------------------------------
# Pallas kernels
# ---------------------------------------------------------------------------
def _matmul_bias_act_kernel(x_ref, w_ref, b_ref, o_ref, *, relu: bool):
    """o = act(x @ w + b); x:(tm,K) bf16, w:(K,N) bf16, b:(1,N) f32, acc in f32."""
    y = jnp.dot(x_ref[...], w_ref[...], preferred_element_type=jnp.float32)
    y = y + b_ref[...]
    if relu:
        y = jnp.maximum(y, 0.0)
    o_ref[...] = y.astype(o_ref.dtype)


def _maxpool2x2_kernel(x_ref, o_ref):
    """x:(tr, 2, PW, 2C) = (rows, vertical-pair, pooled-col, horizontal-pair*C).
    Vertical max over dim 1, horizontal max over the two C-wide lane groups."""
    v = x_ref[...]
    vm = jnp.maximum(v[:, 0], v[:, 1])          # (tr, PW, 2C)
    C = o_ref.shape[-1]
    o_ref[...] = jnp.maximum(vm[..., :C], vm[..., C:])


def _mlp_head_kernel(x_ref, w1_ref, b1_ref, w2_ref, b2_ref, o_ref):
    """Fused fc1(ReLU) + fc2; both weight blocks resident in VMEM."""
    h = jnp.dot(x_ref[...], w1_ref[...], preferred_element_type=jnp.float32)
    h = jnp.maximum(h + b1_ref[...], 0.0)
    y = jnp.dot(h.astype(w2_ref.dtype), w2_ref[...],
                preferred_element_type=jnp.float32)
    o_ref[...] = (y + b2_ref[...]).astype(o_ref.dtype)


# ---------------------------------------------------------------------------
# Pallas wrappers
# ---------------------------------------------------------------------------
def conv_linear_pallas(x, w, b, *, relu, out_dtype, tm_target=256):
    """act(x @ w + b), M-tiled over rows, weights/bias resident per step."""
    M, K = x.shape
    K2, N = w.shape
    assert K == K2
    tm = _pick_tile(M, tm_target, mult=8)
    kernel = functools.partial(_matmul_bias_act_kernel, relu=relu)
    return pl.pallas_call(
        kernel,
        out_shape=jax.ShapeDtypeStruct((M, N), out_dtype),
        grid=(M // tm,),
        in_specs=[
            pl.BlockSpec((tm, K), lambda i: (i, 0)),
            pl.BlockSpec((K, N), lambda i: (0, 0)),
            pl.BlockSpec((1, N), lambda i: (0, 0)),
        ],
        out_specs=pl.BlockSpec((tm, N), lambda i: (i, 0)),
        compiler_params=pltpu.CompilerParams(dimension_semantics=("parallel",)),
    )(x, w, b)


def maxpool2x2_pallas(y_flat, B, OH, OW, C, tr_target=128):
    """2x2/stride-2 max-pool of an NHWC conv output given flattened as
    (B*OH*OW, C).  Single pass over the activation; the 2x2 structure is
    exposed by a free reshape, not by XLA strided slices."""
    PH, PW = OH // 2, OW // 2
    a = y_flat.reshape(B * PH, 2, PW, 2 * C)     # contiguous -> free reshape
    rows = B * PH
    tr = _pick_tile(rows, tr_target)
    out = pl.pallas_call(
        _maxpool2x2_kernel,
        out_shape=jax.ShapeDtypeStruct((rows, PW, C), y_flat.dtype),
        grid=(rows // tr,),
        in_specs=[pl.BlockSpec((tr, 2, PW, 2 * C), lambda i: (i, 0, 0, 0))],
        out_specs=pl.BlockSpec((tr, PW, C), lambda i: (i, 0, 0)),
        compiler_params=pltpu.CompilerParams(dimension_semantics=("parallel",)),
    )(a)
    return out.reshape(B, PH, PW, C)


def mlp_head_pallas(x, w1, b1, w2, b2, tb_target=256):
    B, K = x.shape
    H = w1.shape[1]
    N = w2.shape[1]
    tb = _pick_tile(B, tb_target, mult=8)
    return pl.pallas_call(
        _mlp_head_kernel,
        out_shape=jax.ShapeDtypeStruct((B, N), jnp.float32),
        grid=(B // tb,),
        in_specs=[
            pl.BlockSpec((tb, K), lambda i: (i, 0)),
            pl.BlockSpec((K, H), lambda i: (0, 0)),
            pl.BlockSpec((1, H), lambda i: (0, 0)),
            pl.BlockSpec((H, N), lambda i: (0, 0)),
            pl.BlockSpec((1, N), lambda i: (0, 0)),
        ],
        out_specs=pl.BlockSpec((tb, N), lambda i: (i, 0)),
        compiler_params=pltpu.CompilerParams(dimension_semantics=("parallel",)),
    )(x, w1, b1, w2, b2)


# ---------------------------------------------------------------------------
# Glue: NHWC im2col (layout plumbing; the hot matmul stays in Pallas)
# TODO(synk): the im2col patch gather itself is data rearrangement with no
# clean single-Pallas-op equivalent; it is left to XLA (NHWC order).
# ---------------------------------------------------------------------------
def im2col_nhwc(x, k):
    """x:(B,H,W,C) -> patches:(B*OH*OW, k*k*C), flatten order (kh, kw, c)."""
    B, H, W, C = x.shape
    OH, OW = H - k + 1, W - k + 1
    slabs = [x[:, i:i + OH, j:j + OW, :] for i in range(k) for j in range(k)]
    p = jnp.concatenate(slabs, axis=-1)          # (B, OH, OW, k*k*C)
    return p.reshape(B * OH * OW, k * k * C)


# ---------------------------------------------------------------------------
# Model
# ---------------------------------------------------------------------------
def init_params(key):
    ks = jax.random.split(key, 8)
    scale = 0.05
    return {
        # PyTorch layouts: conv OIHW, fc stored as (in, out) with the 800-dim
        # in NCHW flatten order (c, h, w) -- matches torch .view(B, -1).
        "conv1_w": scale * jax.random.normal(ks[0], (32, 1, 5, 5), jnp.float32),
        "conv1_b": scale * jax.random.normal(ks[1], (32,), jnp.float32),
        "conv2_w": scale * jax.random.normal(ks[2], (32, 32, 5, 5), jnp.float32),
        "conv2_b": scale * jax.random.normal(ks[3], (32,), jnp.float32),
        "fc1_w": scale * jax.random.normal(ks[4], (800, 256), jnp.float32),
        "fc1_b": scale * jax.random.normal(ks[5], (256,), jnp.float32),
        "fc2_w": scale * jax.random.normal(ks[6], (256, 10), jnp.float32),
        "fc2_b": scale * jax.random.normal(ks[7], (10,), jnp.float32),
    }


def prepare_pallas_params(params):
    """One-time (outside jit) weight re-layout for the NHWC / bf16 Pallas path."""
    # conv weights -> (kh, kw, cin) x cout matmul matrices (NHWC patch order)
    w1 = params["conv1_w"].transpose(2, 3, 1, 0).reshape(25, 32)
    w1 = jnp.pad(w1, ((0, 7), (0, 0)))                       # K: 25 -> 32
    w2 = params["conv2_w"].transpose(2, 3, 1, 0).reshape(800, 32)
    # fc1: reorder the 800-dim from NCHW flatten (c,h,w) to NHWC flatten (h,w,c)
    fc1 = params["fc1_w"].reshape(32, 5, 5, 256).transpose(1, 2, 0, 3).reshape(800, 256)
    return {
        "w1": w1.astype(jnp.bfloat16),
        "b1": params["conv1_b"].astype(jnp.float32).reshape(1, 32),
        "w2": w2.astype(jnp.bfloat16),
        "b2": params["conv2_b"].astype(jnp.float32).reshape(1, 32),
        "fc1_w": fc1.astype(jnp.bfloat16),
        "fc1_b": params["fc1_b"].astype(jnp.float32).reshape(1, 256),
        "fc2_w": params["fc2_w"].astype(jnp.bfloat16),
        "fc2_b": params["fc2_b"].astype(jnp.float32).reshape(1, 10),
    }


def cnn1_forward(x, pp):
    """x: (B, 1, 32, 32) NCHW f32 (PyTorch interface); returns (B, 10) f32."""
    B = x.shape[0]
    x = x.transpose(0, 2, 3, 1)                               # NHWC (free for C=1)

    # conv1 + ReLU (im2col matmul) -> (B*28*28, 32) bf16 == NHWC (B,28,28,32)
    p = im2col_nhwc(x, 5)                                     # (B*784, 25)
    p = jnp.pad(p, ((0, 0), (0, 7))).astype(jnp.bfloat16)     # (B*784, 32)
    y = conv_linear_pallas(p, pp["w1"], pp["b1"], relu=True,
                           out_dtype=jnp.bfloat16)
    y = maxpool2x2_pallas(y, B, 28, 28, 32)                   # (B,14,14,32)

    # conv2 + ReLU -> (B*10*10, 32) bf16 == NHWC (B,10,10,32)
    p = im2col_nhwc(y, 5)                                     # (B*100, 800) bf16
    y = conv_linear_pallas(p, pp["w2"], pp["b2"], relu=True,
                           out_dtype=jnp.bfloat16)
    y = maxpool2x2_pallas(y, B, 10, 10, 32)                   # (B,5,5,32)

    # fused fc1(ReLU)+fc2 head on the NHWC flatten
    y = y.reshape(B, 800)                                     # (h, w, c) order
    return mlp_head_pallas(y, pp["fc1_w"], pp["fc1_b"],
                           pp["fc2_w"], pp["fc2_b"])          # (B, 10) f32


# ---------------------------------------------------------------------------
# Pure-JAX f32 reference (torch semantics) for correctness check
# ---------------------------------------------------------------------------
def cnn1_reference(x, params):
    def conv(x, w, b):
        y = jax.lax.conv_general_dilated(
            x, w, window_strides=(1, 1), padding="VALID",
            dimension_numbers=("NCHW", "OIHW", "NCHW"))
        return y + b.reshape(1, -1, 1, 1)

    def pool(x):
        B, C, H, W = x.shape
        return x.reshape(B, C, H // 2, 2, W // 2, 2).max(axis=(3, 5))

    y = pool(jax.nn.relu(conv(x, params["conv1_w"], params["conv1_b"])))
    y = pool(jax.nn.relu(conv(y, params["conv2_w"], params["conv2_b"])))
    y = y.reshape(y.shape[0], -1)
    y = jax.nn.relu(y @ params["fc1_w"] + params["fc1_b"])
    return y @ params["fc2_w"] + params["fc2_b"]


if __name__ == "__main__":
    key = jax.random.PRNGKey(0)
    kx, kp = jax.random.split(key)
    # fc1 expects 800 = 32*5*5 features -> spatial input is 32x32: (B, 1, 32, 32)
    x = jax.random.normal(kx, (2, 1, 32, 32), jnp.float32)
    params = init_params(kp)
    pp = prepare_pallas_params(params)

    out = jax.jit(cnn1_forward)(x, pp)
    out = jax.block_until_ready(out)
    assert out.shape == (2, 10), out.shape

    ref = jax.block_until_ready(cnn1_reference(x, params))
    # bf16 MXU operands vs f32 reference -> loosened tolerance (per review).
    ok = jnp.allclose(out, ref, rtol=5e-2, atol=5e-2)
    assert bool(ok), float(jnp.max(jnp.abs(out - ref)))

    print("KERNEL_OK")
</pallas_src>

<mosaic_0001>
module attributes {stable_mosaic.version = 11 : i64} {
  func.func @_matmul_bias_act_kernel(%arg0: i32, %arg1: memref<224x32xbf16, #tpu.memory_space<vmem>>, %arg2: memref<32x32xbf16, #tpu.memory_space<vmem>>, %arg3: memref<1x32xf32, #tpu.memory_space<vmem>>, %arg4: memref<224x32xbf16, #tpu.memory_space<vmem>>) attributes {dimension_semantics = [#tpu.dimension_semantics<parallel>], iteration_bounds = array<i64: 7>, scalar_prefetch = 0 : i64, scratch_operands = 0 : i64, tpu.core_type = #tpu.core_type<tc>, window_params = [{transform_indices = @transform_0, window_bounds = array<i64: 224, 32>}, {pipeline_mode = #tpu.pipeline_mode<synchronous>, transform_indices = @transform_1, window_bounds = array<i64: 32, 32>}, {pipeline_mode = #tpu.pipeline_mode<synchronous>, transform_indices = @transform_2, window_bounds = array<i64: 1, 32>}, {transform_indices = @transform_3, window_bounds = array<i64: 224, 32>}]} {
    %c0 = arith.constant 0 : index
    %c0_0 = arith.constant 0 : index
    %0 = vector.load %arg1[%c0, %c0_0] : memref<224x32xbf16, #tpu.memory_space<vmem>>, vector<224x32xbf16>
    %c0_1 = arith.constant 0 : index
    %c0_2 = arith.constant 0 : index
    %1 = vector.load %arg2[%c0_1, %c0_2] : memref<32x32xbf16, #tpu.memory_space<vmem>>, vector<32x32xbf16>
    %cst = arith.constant dense<0.000000e+00> : vector<224x32xf32>
    %2 = tpu.matmul %0, %1, %cst {dimension_numbers = #tpu.dot_dimension_numbers<[1], [0], [0], [1], [0, 0, 1, 1], [], []>} : vector<224x32xbf16>, vector<32x32xbf16>, vector<224x32xf32> -> vector<224x32xf32>
    %c0_3 = arith.constant 0 : index
    %c0_4 = arith.constant 0 : index
    %3 = vector.load %arg3[%c0_3, %c0_4] : memref<1x32xf32, #tpu.memory_space<vmem>>, vector<1x32xf32>
    %4 = vector.broadcast %3 : vector<1x32xf32> to vector<224x32xf32>
    %5 = arith.addf %2, %4 : vector<224x32xf32>
    %cst_5 = arith.constant 0.000000e+00 : f32
    %6 = vector.broadcast %cst_5 : f32 to vector<224x32xf32>
    %7 = arith.maximumf %5, %6 : vector<224x32xf32>
    %8 = arith.truncf %7 : vector<224x32xf32> to vector<224x32xbf16>
    %c0_6 = arith.constant 0 : index
    %c0_7 = arith.constant 0 : index
    %9 = vector.load %arg4[%c0_6, %c0_7] : memref<224x32xbf16, #tpu.memory_space<vmem>>, vector<224x32xbf16>
    tpu.vector_store %arg4[%c0_6, %c0_7], %8 {strides = array<i32>} : memref<224x32xbf16, #tpu.memory_space<vmem>>, vector<224x32xbf16>,
    return
  }
  func.func @transform_0(%arg0: i32) -> (i32, i32) {
    %c0_i32 = arith.constant 0 : i32
    %c0_i32_0 = arith.constant 0 : i32
    return %arg0, %c0_i32 : i32, i32
  }
  func.func @transform_1(%arg0: i32) -> (i32, i32) {
    %c0_i32 = arith.constant 0 : i32
    %c0_i32_0 = arith.constant 0 : i32
    %c0_i32_1 = arith.constant 0 : i32
    return %c0_i32, %c0_i32_0 : i32, i32
  }
  func.func @transform_2(%arg0: i32) -> (i32, i32) {
    %c0_i32 = arith.constant 0 : i32
    %c0_i32_0 = arith.constant 0 : i32
    %c0_i32_1 = arith.constant 0 : i32
    return %c0_i32, %c0_i32_0 : i32, i32
  }
  func.func @transform_3(%arg0: i32) -> (i32, i32) {
    %c0_i32 = arith.constant 0 : i32
    %c0_i32_0 = arith.constant 0 : i32
    return %arg0, %c0_i32 : i32, i32
  }
}

module attributes {stable_mosaic.version = 11 : i64} {
  func.func @_maxpool2x2_kernel(%arg0: i32, %arg1: memref<28x2x14x64xbf16, #tpu.memory_space<vmem>>, %arg2: memref<28x14x32xbf16, #tpu.memory_space<vmem>>) attributes {dimension_semantics = [#tpu.dimension_semantics<parallel>], iteration_bounds = array<i64: 1>, scalar_prefetch = 0 : i64, scratch_operands = 0 : i64, tpu.core_type = #tpu.core_type<tc>, window_params = [{transform_indices = @transform_0, window_bounds = array<i64: 28, 2, 14, 64>}, {transform_indices = @transform_1, window_bounds = array<i64: 28, 14, 32>}]} {
    %c0 = arith.constant 0 : index
    %c0_0 = arith.constant 0 : index
    %c0_1 = arith.constant 0 : index
    %c0_2 = arith.constant 0 : index
    %0 = vector.load %arg1[%c0, %c0_0, %c0_1, %c0_2] : memref<28x2x14x64xbf16, #tpu.memory_space<vmem>>, vector<28x2x14x64xbf16>
    %1 = vector.extract_strided_slice %0 {offsets = [0, 0, 0, 0], sizes = [28, 1, 14, 64], strides = [1, 1, 1, 1]} : vector<28x2x14x64xbf16> to vector<28x1x14x64xbf16>
    %2 = vector.shape_cast %1 : vector<28x1x14x64xbf16> to vector<28x14x64xbf16>
    %3 = vector.extract_strided_slice %0 {offsets = [0, 1, 0, 0], sizes = [28, 1, 14, 64], strides = [1, 1, 1, 1]} : vector<28x2x14x64xbf16> to vector<28x1x14x64xbf16>
    %4 = vector.shape_cast %3 : vector<28x1x14x64xbf16> to vector<28x14x64xbf16>
    %5 = arith.maximumf %2, %4 : vector<28x14x64xbf16>
    %6 = vector.extract_strided_slice %5 {offsets = [0, 0, 0], sizes = [28, 14, 32], strides = [1, 1, 1]} : vector<28x14x64xbf16> to vector<28x14x32xbf16>
    %7 = vector.extract_strided_slice %5 {offsets = [0, 0, 32], sizes = [28, 14, 32], strides = [1, 1, 1]} : vector<28x14x64xbf16> to vector<28x14x32xbf16>
    %8 = arith.maximumf %6, %7 : vector<28x14x32xbf16>
    %c0_3 = arith.constant 0 : index
    %c0_4 = arith.constant 0 : index
    %c0_5 = arith.constant 0 : index
    %9 = vector.load %arg2[%c0_3, %c0_4, %c0_5] : memref<28x14x32xbf16, #tpu.memory_space<vmem>>, vector<28x14x32xbf16>
    tpu.vector_store %arg2[%c0_3, %c0_4, %c0_5], %8 {strides = array<i32>} : memref<28x14x32xbf16, #tpu.memory_space<vmem>>, vector<28x14x32xbf16>,
    return
  }
  func.func @transform_0(%arg0: i32) -> (i32, i32, i32, i32) {
    %c0_i32 = arith.constant 0 : i32
    %c0_i32_0 = arith.constant 0 : i32
    %c0_i32_1 = arith.constant 0 : i32
    %c0_i32_2 = arith.constant 0 : i32
    return %arg0, %c0_i32, %c0_i32_0, %c0_i32_1 : i32, i32, i32, i32
  }
  func.func @transform_1(%arg0: i32) -> (i32, i32, i32) {
    %c0_i32 = arith.constant 0 : i32
    %c0_i32_0 = arith.constant 0 : i32
    %c0_i32_1 = arith.constant 0 : i32
    return %arg0, %c0_i32, %c0_i32_0 : i32, i32, i32
  }
}

module attributes {stable_mosaic.version = 11 : i64} {
  func.func @_matmul_bias_act_kernel(%arg0: i32, %arg1: memref<200x800xbf16, #tpu.memory_space<vmem>>, %arg2: memref<800x32xbf16, #tpu.memory_space<vmem>>, %arg3: memref<1x32xf32, #tpu.memory_space<vmem>>, %arg4: memref<200x32xbf16, #tpu.memory_space<vmem>>) attributes {dimension_semantics = [#tpu.dimension_semantics<parallel>], iteration_bounds = array<i64: 1>, scalar_prefetch = 0 : i64, scratch_operands = 0 : i64, tpu.core_type = #tpu.core_type<tc>, window_params = [{transform_indices = @transform_0, window_bounds = array<i64: 200, 800>}, {pipeline_mode = #tpu.pipeline_mode<synchronous>, transform_indices = @transform_1, window_bounds = array<i64: 800, 32>}, {pipeline_mode = #tpu.pipeline_mode<synchronous>, transform_indices = @transform_2, window_bounds = array<i64: 1, 32>}, {transform_indices = @transform_3, window_bounds = array<i64: 200, 32>}]} {
    %c0 = arith.constant 0 : index
    %c0_0 = arith.constant 0 : index
    %0 = vector.load %arg1[%c0, %c0_0] : memref<200x800xbf16, #tpu.memory_space<vmem>>, vector<200x800xbf16>
    %c0_1 = arith.constant 0 : index
    %c0_2 = arith.constant 0 : index
    %1 = vector.load %arg2[%c0_1, %c0_2] : memref<800x32xbf16, #tpu.memory_space<vmem>>, vector<800x32xbf16>
    %cst = arith.constant dense<0.000000e+00> : vector<200x32xf32>
    %2 = tpu.matmul %0, %1, %cst {dimension_numbers = #tpu.dot_dimension_numbers<[1], [0], [0], [1], [0, 0, 1, 1], [], []>} : vector<200x800xbf16>, vector<800x32xbf16>, vector<200x32xf32> -> vector<200x32xf32>
    %c0_3 = arith.constant 0 : index
    %c0_4 = arith.constant 0 : index
    %3 = vector.load %arg3[%c0_3, %c0_4] : memref<1x32xf32, #tpu.memory_space<vmem>>, vector<1x32xf32>
    %4 = vector.broadcast %3 : vector<1x32xf32> to vector<200x32xf32>
    %5 = arith.addf %2, %4 : vector<200x32xf32>
    %cst_5 = arith.constant 0.000000e+00 : f32
    %6 = vector.broadcast %cst_5 : f32 to vector<200x32xf32>
    %7 = arith.maximumf %5, %6 : vector<200x32xf32>
    %8 = arith.truncf %7 : vector<200x32xf32> to vector<200x32xbf16>
    %c0_6 = arith.constant 0 : index
    %c0_7 = arith.constant 0 : index
    %9 = vector.load %arg4[%c0_6, %c0_7] : memref<200x32xbf16, #tpu.memory_space<vmem>>, vector<200x32xbf16>
    tpu.vector_store %arg4[%c0_6, %c0_7], %8 {strides = array<i32>} : memref<200x32xbf16, #tpu.memory_space<vmem>>, vector<200x32xbf16>,
    return
  }
  func.func @transform_0(%arg0: i32) -> (i32, i32) {
    %c0_i32 = arith.constant 0 : i32
    %c0_i32_0 = arith.constant 0 : i32
    return %arg0, %c0_i32 : i32, i32
  }
  func.func @transform_1(%arg0: i32) -> (i32, i32) {
    %c0_i32 = arith.constant 0 : i32
    %c0_i32_0 = arith.constant 0 : i32
    %c0_i32_1 = arith.constant 0 : i32
    return %c0_i32, %c0_i32_0 : i32, i32
  }
  func.func @transform_2(%arg0: i32) -> (i32, i32) {
    %c0_i32 = arith.constant 0 : i32
    %c0_i32_0 = arith.constant 0 : i32
    %c0_i32_1 = arith.constant 0 : i32
    return %c0_i32, %c0_i32_0 : i32, i32
  }
  func.func @transform_3(%arg0: i32) -> (i32, i32) {
    %c0_i32 = arith.constant 0 : i32
    %c0_i32_0 = arith.constant 0 : i32
    return %arg0, %c0_i32 : i32, i32
  }
}

module attributes {stable_mosaic.version = 11 : i64} {
  func.func @_maxpool2x2_kernel(%arg0: i32, %arg1: memref<10x2x5x64xbf16, #tpu.memory_space<vmem>>, %arg2: memref<10x5x32xbf16, #tpu.memory_space<vmem>>) attributes {dimension_semantics = [#tpu.dimension_semantics<parallel>], iteration_bounds = array<i64: 1>, scalar_prefetch = 0 : i64, scratch_operands = 0 : i64, tpu.core_type = #tpu.core_type<tc>, window_params = [{transform_indices = @transform_0, window_bounds = array<i64: 10, 2, 5, 64>}, {transform_indices = @transform_1, window_bounds = array<i64: 10, 5, 32>}]} {
    %c0 = arith.constant 0 : index
    %c0_0 = arith.constant 0 : index
    %c0_1 = arith.constant 0 : index
    %c0_2 = arith.constant 0 : index
    %0 = vector.load %arg1[%c0, %c0_0, %c0_1, %c0_2] : memref<10x2x5x64xbf16, #tpu.memory_space<vmem>>, vector<10x2x5x64xbf16>
    %1 = vector.extract_strided_slice %0 {offsets = [0, 0, 0, 0], sizes = [10, 1, 5, 64], strides = [1, 1, 1, 1]} : vector<10x2x5x64xbf16> to vector<10x1x5x64xbf16>
    %2 = vector.shape_cast %1 : vector<10x1x5x64xbf16> to vector<10x5x64xbf16>
    %3 = vector.extract_strided_slice %0 {offsets = [0, 1, 0, 0], sizes = [10, 1, 5, 64], strides = [1, 1, 1, 1]} : vector<10x2x5x64xbf16> to vector<10x1x5x64xbf16>
    %4 = vector.shape_cast %3 : vector<10x1x5x64xbf16> to vector<10x5x64xbf16>
    %5 = arith.maximumf %2, %4 : vector<10x5x64xbf16>
    %6 = vector.extract_strided_slice %5 {offsets = [0, 0, 0], sizes = [10, 5, 32], strides = [1, 1, 1]} : vector<10x5x64xbf16> to vector<10x5x32xbf16>
    %7 = vector.extract_strided_slice %5 {offsets = [0, 0, 32], sizes = [10, 5, 32], strides = [1, 1, 1]} : vector<10x5x64xbf16> to vector<10x5x32xbf16>
    %8 = arith.maximumf %6, %7 : vector<10x5x32xbf16>
    %c0_3 = arith.constant 0 : index
    %c0_4 = arith.constant 0 : index
    %c0_5 = arith.constant 0 : index
    %9 = vector.load %arg2[%c0_3, %c0_4, %c0_5] : memref<10x5x32xbf16, #tpu.memory_space<vmem>>, vector<10x5x32xbf16>
    tpu.vector_store %arg2[%c0_3, %c0_4, %c0_5], %8 {strides = array<i32>} : memref<10x5x32xbf16, #tpu.memory_space<vmem>>, vector<10x5x32xbf16>,
    return
  }
  func.func @transform_0(%arg0: i32) -> (i32, i32, i32, i32) {
    %c0_i32 = arith.constant 0 : i32
    %c0_i32_0 = arith.constant 0 : i32
    %c0_i32_1 = arith.constant 0 : i32
    %c0_i32_2 = arith.constant 0 : i32
    return %arg0, %c0_i32, %c0_i32_0, %c0_i32_1 : i32, i32, i32, i32
  }
  func.func @transform_1(%arg0: i32) -> (i32, i32, i32) {
    %c0_i32 = arith.constant 0 : i32
    %c0_i32_0 = arith.constant 0 : i32
    %c0_i32_1 = arith.constant 0 : i32
    return %arg0, %c0_i32, %c0_i32_0 : i32, i32, i32
  }
}

module attributes {stable_mosaic.version = 11 : i64} {
  func.func @_mlp_head_kernel(%arg0: i32, %arg1: memref<2x800xbf16, #tpu.memory_space<vmem>>, %arg2: memref<800x256xbf16, #tpu.memory_space<vmem>>, %arg3: memref<1x256xf32, #tpu.memory_space<vmem>>, %arg4: memref<256x10xbf16, #tpu.memory_space<vmem>>, %arg5: memref<1x10xf32, #tpu.memory_space<vmem>>, %arg6: memref<2x10xf32, #tpu.memory_space<vmem>>) attributes {dimension_semantics = [#tpu.dimension_semantics<parallel>], iteration_bounds = array<i64: 1>, scalar_prefetch = 0 : i64, scratch_operands = 0 : i64, tpu.core_type = #tpu.core_type<tc>, window_params = [{transform_indices = @transform_0, window_bounds = array<i64: 2, 800>}, {pipeline_mode = #tpu.pipeline_mode<synchronous>, transform_indices = @transform_1, window_bounds = array<i64: 800, 256>}, {pipeline_mode = #tpu.pipeline_mode<synchronous>, transform_indices = @transform_2, window_bounds = array<i64: 1, 256>}, {pipeline_mode = #tpu.pipeline_mode<synchronous>, transform_indices = @transform_3, window_bounds = array<i64: 256, 10>}, {pipeline_mode = #tpu.pipeline_mode<synchronous>, transform_indices = @transform_4, window_bounds = array<i64: 1, 10>}, {transform_indices = @transform_5, window_bounds = array<i64: 2, 10>}]} {
    %c0 = arith.constant 0 : index
    %c0_0 = arith.constant 0 : index
    %0 = vector.load %arg1[%c0, %c0_0] : memref<2x800xbf16, #tpu.memory_space<vmem>>, vector<2x800xbf16>
    %c0_1 = arith.constant 0 : index
    %c0_2 = arith.constant 0 : index
    %1 = vector.load %arg2[%c0_1, %c0_2] : memref<800x256xbf16, #tpu.memory_space<vmem>>, vector<800x256xbf16>
    %cst = arith.constant dense<0.000000e+00> : vector<2x256xf32>
    %2 = tpu.matmul %0, %1, %cst {dimension_numbers = #tpu.dot_dimension_numbers<[1], [0], [0], [1], [0, 0, 1, 1], [], []>} : vector<2x800xbf16>, vector<800x256xbf16>, vector<2x256xf32> -> vector<2x256xf32>
    %c0_3 = arith.constant 0 : index
    %c0_4 = arith.constant 0 : index
    %3 = vector.load %arg3[%c0_3, %c0_4] : memref<1x256xf32, #tpu.memory_space<vmem>>, vector<1x256xf32>
    %4 = vector.broadcast %3 : vector<1x256xf32> to vector<2x256xf32>
    %5 = arith.addf %2, %4 : vector<2x256xf32>
    %cst_5 = arith.constant 0.000000e+00 : f32
    %6 = vector.broadcast %cst_5 : f32 to vector<2x256xf32>
    %7 = arith.maximumf %5, %6 : vector<2x256xf32>
    %8 = arith.truncf %7 : vector<2x256xf32> to vector<2x256xbf16>
    %c0_6 = arith.constant 0 : index
    %c0_7 = arith.constant 0 : index
    %9 = vector.load %arg4[%c0_6, %c0_7] : memref<256x10xbf16, #tpu.memory_space<vmem>>, vector<256x10xbf16>
    %cst_8 = arith.constant dense<0.000000e+00> : vector<2x10xf32>
    %10 = tpu.matmul %8, %9, %cst_8 {dimension_numbers = #tpu.dot_dimension_numbers<[1], [0], [0], [1], [0, 0, 1, 1], [], []>} : vector<2x256xbf16>, vector<256x10xbf16>, vector<2x10xf32> -> vector<2x10xf32>
    %c0_9 = arith.constant 0 : index
    %c0_10 = arith.constant 0 : index
    %11 = vector.load %arg5[%c0_9, %c0_10] : memref<1x10xf32, #tpu.memory_space<vmem>>, vector<1x10xf32>
    %12 = vector.broadcast %11 : vector<1x10xf32> to vector<2x10xf32>
    %13 = arith.addf %10, %12 : vector<2x10xf32>
    %c0_11 = arith.constant 0 : index
    %c0_12 = arith.constant 0 : index
    %14 = vector.load %arg6[%c0_11, %c0_12] : memref<2x10xf32, #tpu.memory_space<vmem>>, vector<2x10xf32>
    tpu.vector_store %arg6[%c0_11, %c0_12], %13 {strides = array<i32>} : memref<2x10xf32, #tpu.memory_space<vmem>>, vector<2x10xf32>,
    return
  }
  func.func @transform_0(%arg0: i32) -> (i32, i32) {
    %c0_i32 = arith.constant 0 : i32
    %c0_i32_0 = arith.constant 0 : i32
    return %arg0, %c0_i32 : i32, i32
  }
  func.func @transform_1(%arg0: i32) -> (i32, i32) {
    %c0_i32 = arith.constant 0 : i32
    %c0_i32_0 = arith.constant 0 : i32
    %c0_i32_1 = arith.constant 0 : i32
    return %c0_i32, %c0_i32_0 : i32, i32
  }
  func.func @transform_2(%arg0: i32) -> (i32, i32) {
    %c0_i32 = arith.constant 0 : i32
    %c0_i32_0 = arith.constant 0 : i32
    %c0_i32_1 = arith.constant 0 : i32
    return %c0_i32, %c0_i32_0 : i32, i32
  }
  func.func @transform_3(%arg0: i32) -> (i32, i32) {
    %c0_i32 = arith.constant 0 : i32
    %c0_i32_0 = arith.constant 0 : i32
    %c0_i32_1 = arith.constant 0 : i32
    return %c0_i32, %c0_i32_0 : i32, i32
  }
  func.func @transform_4(%arg0: i32) -> (i32, i32) {
    %c0_i32 = arith.constant 0 : i32
    %c0_i32_0 = arith.constant 0 : i32
    %c0_i32_1 = arith.constant 0 : i32
    return %c0_i32, %c0_i32_0 : i32, i32
  }
  func.func @transform_5(%arg0: i32) -> (i32, i32) {
    %c0_i32 = arith.constant 0 : i32
    %c0_i32_0 = arith.constant 0 : i32
    return %arg0, %c0_i32 : i32, i32
  }
}

</mosaic_0001>

<bundles_post_ra>
// kernel: cnn1_forward.5
= control target key start
LH: loop header
LB: loop body
LE: loop exit
PB: predicated region body
PF: predicated region fallthrough
CT: control target
= control target key end

     0   :  { %s702_s12 = smov 0   ;;  %s837_s0 = inlined_call_operand.vmem [shape: bf16[1568,32], index: 0, kind: input, shape index: {}]   ;;  %s838_s1 = inlined_call_operand.vmem [shape: bf16[32,32], index: 1, kind: input, shape index: {}]   ;;  %s839_s2 = inlined_call_operand.vmem [shape: f32[1,32], index: 2, kind: input, shape index: {}]   ;;  %s840_s3 = inlined_call_operand.vmem [shape: bf16[1568,32], index: 3, kind: output, shape index: {}]  }
   0x1 LB: > { %s556_s13 = sadd.s32 4294967295, %s680_s12   ;;  %p560_p0 = scmp.ge.s32.totalorder %s680_s12, 1  ;;  %s680_s12 = sphi %s702_s12, %s13_s12  }
   0x2   : > { %p138_p1 = scmp.lt.s32.totalorder %s680_s12, 8 }
   0x4   : > { %p139_p2 = pnand %p560_p0, %p138_p1 }
   0x5   : > { %s162_s16 = smul.u32 (!%p139_p2), 28, %s556_s13 }
   0x6   : > { %142 = sbr.rel (%p139_p2) target bundleno = 215 (0xd7), region = 32 }
   0x7   : > { %p163_p3 = scmp.lt.s32.totalorder (!%p139_p2), %s162_s16, 195 }
   0xb   : > { %v658_v0 = vld [vmem:[%s838_s1 + $0x8] sm:$0xff]  ;;  %v657_v1 = vld [vmem:[%s838_s1] sm:$0xff]  ;;  %s842_s16 = smov (!%p163_p3, %s162_s16), 195  ;;  %vm293_vm0 = vcmask 261120   ;;  %vm471_vm1 = vcmask 257024  }
   0xc   : > { %342 = vmatpush.bf16.msra.mxu0 %v658_v0  ;;  %659 = vmatpush.bf16.msra.mxu1 %v658_v0  ;;  %s561_s19 = sshll.u32 %s842_s16, 2  ;;  %v741_v16 = vld [vmem:[%s839_s2] ss:$0 sm:$0xff] }
   0xd   : > { %660 = vmatpush.bf16.msra.mxu2 %v658_v0  ;;  %661 = vmatpush.bf16.msra.mxu3 %v658_v0  ;;  %s166_s22 = scalar_lea.vmem %s837_s0, %s561_s19  ;;  %s750_s27 = scalar_lea.vmem %s840_s3, %s561_s19 }
   0xe   : > { %v643_v2 = vld [vmem:[%s166_s22] sm:$0xff]  ;;  %v644_v6 = vld [vmem:[%s166_s22 + $0x8] sm:$0xff]  ;;  %v645_v10 = vld [vmem:[%s166_s22 + $0x10] sm:$0xff] }
   0xf   : > { %v647_v3 = vld [vmem:[%s166_s22 + $0x20] sm:$0xff]  ;;  %v648_v7 = vld [vmem:[%s166_s22 + $0x28] sm:$0xff]  ;;  %v649_v11 = vld [vmem:[%s166_s22 + $0x30] sm:$0xff] }
  0x10   : > { %343 = vmatpush.bf16.msra.mxu0 %v657_v1  ;;  %662 = vmatpush.bf16.msra.mxu1 %v657_v1  ;;  %v651_v4 = vld [vmem:[%s166_s22 + $0x40] sm:$0xff]  ;;  %v652_v8 = vld [vmem:[%s166_s22 + $0x48] sm:$0xff]  ;;  %v653_v12 = vld [vmem:[%s166_s22 + $0x50] sm:$0xff] }
  0x11   : > { %663 = vmatpush.bf16.msra.mxu2 %v657_v1  ;;  %664 = vmatpush.bf16.msra.mxu3 %v657_v1  ;;  %v655_v5 = vld [vmem:[%s166_s22 + $0x60] sm:$0xff]  ;;  %v656_v9 = vld [vmem:[%s166_s22 + $0x68] sm:$0xff]  ;;  %v646_v13 = vld [vmem:[%s166_s22 + $0x18] sm:$0xff] }
  0x12   : > { %v650_v14 = vld [vmem:[%s166_s22 + $0x38] sm:$0xff] }
  0x13   : > { %627 = vmatmul.msk.bf16.vlgmr.msra.gmra.mxu0 %vm293_vm0, %v643_v2  ;;  %631 = vmatmul.msk.bf16.vlgmr.msra.gmra.mxu1 %vm293_vm0, %v647_v3  ;;  %v654_v15 = vld [vmem:[%s166_s22 + $0x58] sm:$0xff] }
  0x14   : > { %635 = vmatmul.msk.bf16.vlgmr.msra.gmra.mxu2 %vm293_vm0, %v651_v4  ;;  %639 = vmatmul.msk.bf16.vlgmr.msra.gmra.mxu3 %vm293_vm0, %v655_v5 }
  0x23   : > { %628 = vmatmul.msk.bf16.gmra.mxu0 %vm293_vm0, %v644_v6  ;;  %632 = vmatmul.msk.bf16.gmra.mxu1 %vm293_vm0, %v648_v7 }
  0x24   : > { %636 = vmatmul.msk.bf16.gmra.mxu2 %vm293_vm0, %v652_v8  ;;  %640 = vmatmul.msk.bf16.gmra.mxu3 %vm293_vm0, %v656_v9 }
  0x33   : > { %629 = vmatmul.msk.bf16.gmra.mxu0 %vm293_vm0, %v645_v10  ;;  %633 = vmatmul.msk.bf16.gmra.mxu1 %vm293_vm0, %v649_v11 }
  0x34   : > { %637 = vmatmul.msk.bf16.gmra.mxu2 %vm293_vm0, %v653_v12 }
  0x43   : > { %630 = vmatmul.msk.bf16.gmra.mxu0 %vm293_vm0, %v646_v13  ;;  %634 = vmatmul.msk.bf16.gmra.mxu1 %vm293_vm0, %v650_v14 }
  0x44   : > { %638 = vmatmul.msk.bf16.gmra.mxu2 %vm293_vm0, %v654_v15 }
  0x90   : > { %v345_v17 = vpop.f32.mrf.mxu0  ;;  %v365_v18 = vpop.f32.mrf.mxu1 }
  0x91   : > { %v346_v19 = vadd.f32 %v741_v16, %v345_v17  ;;  %v366_v20 = vadd.f32 %v741_v16, %v365_v18 }
  0x93   : > { %v415_v21 = vmax.f32 %v346_v19, 0.0  ;;  %v423_v22 = vmax.f32 %v366_v20, 0.0 }
  0x95   : > { %v443_v23 = vpack.c.bf16 %v415_v21, %v415_v21  ;;  %v451_v24 = vpack.c.bf16 %v423_v22, %v423_v22 }
  0x97   : > { %472 = vst.msk [vmem:[%s750_s27] sm:$0xf] %vm471_vm1, %v443_v23  ;;  %v385_v25 = vpop.f32.mrf.mxu2  ;;  %v405_v31 = vpop.f32.mrf.mxu3 }
  0x98   : > { %480 = vst.msk [vmem:[%s750_s27 + $0x20] sm:$0xf] %vm471_vm1, %v451_v24  ;;  %v386_v26 = vadd.f32 %v741_v16, %v385_v25  ;;  %v347_v27 = vpop.f32.mrf.mxu0  ;;  %v367_v28 = vpop.f32.mrf.mxu1  ;;  %v406_v33 = vadd.f32 %v741_v16, %v405_v31 }
  0x99   : > { %v348_v29 = vadd.f32 %v741_v16, %v347_v27  ;;  %v368_v30 = vadd.f32 %v741_v16, %v367_v28 }
  0x9a   : > { %v431_v32 = vmax.f32 %v386_v26, 0.0  ;;  %v439_v37 = vmax.f32 %v406_v33, 0.0 }
  0x9b   : > { %v416_v34 = vmax.f32 %v348_v29, 0.0  ;;  %v424_v35 = vmax.f32 %v368_v30, 0.0 }
  0x9c   : > { %v459_v36 = vpack.c.bf16 %v431_v32, %v431_v32  ;;  %v467_v40 = vpack.c.bf16 %v439_v37, %v439_v37 }
  0x9d   : > { %v444_v38 = vpack.c.bf16 %v416_v34, %v416_v34  ;;  %v452_v39 = vpack.c.bf16 %v424_v35, %v424_v35 }
  0x9e   : > { %488 = vst.msk [vmem:[%s750_s27 + $0x40] sm:$0xf] %vm471_vm1, %v459_v36 }
  0x9f   : > { %473 = vst.msk [vmem:[%s750_s27 + $0x4] sm:$0xf] %vm471_vm1, %v444_v38  ;;  %v387_v41 = vpop.f32.mrf.mxu2  ;;  %v407_v47 = vpop.f32.mrf.mxu3 }
  0xa0   : > { %481 = vst.msk [vmem:[%s750_s27 + $0x24] sm:$0xf] %vm471_vm1, %v452_v39  ;;  %v388_v42 = vadd.f32 %v741_v16, %v387_v41  ;;  %v350_v43 = vpop.f32.mrf.mxu0  ;;  %v370_v44 = vpop.f32.mrf.mxu1  ;;  %v408_v49 = vadd.f32 %v741_v16, %v407_v47 }
  0xa1   : > { %v351_v45 = vadd.f32 %v741_v16, %v350_v43  ;;  %v371_v46 = vadd.f32 %v741_v16, %v370_v44  ;;  %496 = vst.msk [vmem:[%s750_s27 + $0x60] sm:$0xf] %vm471_vm1, %v467_v40 }
  0xa2   : > { %v432_v48 = vmax.f32 %v388_v42, 0.0  ;;  %v440_v53 = vmax.f32 %v408_v49, 0.0 }
  0xa3   : > { %v417_v50 = vmax.f32 %v351_v45, 0.0  ;;  %v425_v51 = vmax.f32 %v371_v46, 0.0 }
  0xa4   : > { %v460_v52 = vpack.c.bf16 %v432_v48, %v432_v48  ;;  %v468_v56 = vpack.c.bf16 %v440_v53, %v440_v53 }
  0xa5   : > { %v445_v54 = vpack.c.bf16 %v417_v50, %v417_v50  ;;  %v453_v55 = vpack.c.bf16 %v425_v51, %v425_v51 }
  0xa6   : > { %489 = vst.msk [vmem:[%s750_s27 + $0x44] sm:$0xf] %vm471_vm1, %v460_v52 }
  0xa7   : > { %474 = vst.msk [vmem:[%s750_s27 + $0x8] sm:$0xf] %vm471_vm1, %v445_v54  ;;  %v390_v57 = vpop.f32.mrf.mxu2  ;;  %v410_v63 = vpop.f32.mrf.mxu3 }
  0xa8   : > { %482 = vst.msk [vmem:[%s750_s27 + $0x28] sm:$0xf] %vm471_vm1, %v453_v55  ;;  %v391_v58 = vadd.f32 %v741_v16, %v390_v57  ;;  %v352_v59 = vpop.f32.mrf.mxu0  ;;  %v372_v60 = vpop.f32.mrf.mxu1  ;;  %v411_v1 = vadd.f32 %v741_v16, %v410_v63 }
  0xa9   : > { %v353_v61 = vadd.f32 %v741_v16, %v352_v59  ;;  %v373_v62 = vadd.f32 %v741_v16, %v372_v60  ;;  %497 = vst.msk [vmem:[%s750_s27 + $0x64] sm:$0xf] %vm471_vm1, %v468_v56 }
  0xaa   : > { %v433_v0 = vmax.f32 %v391_v58, 0.0  ;;  %v441_v5 = vmax.f32 %v411_v1, 0.0 }
  0xab   : > { %v418_v2 = vmax.f32 %v353_v61, 0.0  ;;  %v426_v3 = vmax.f32 %v373_v62, 0.0 }
  0xac   : > { %v461_v4 = vpack.c.bf16 %v433_v0, %v433_v0  ;;  %v469_v8 = vpack.c.bf16 %v441_v5, %v441_v5 }
  0xad   : > { %v446_v6 = vpack.c.bf16 %v418_v2, %v418_v2  ;;  %v454_v7 = vpack.c.bf16 %v426_v3, %v426_v3 }
  0xae   : > { %490 = vst.msk [vmem:[%s750_s27 + $0x48] sm:$0xf] %vm471_vm1, %v461_v4 }
  0xaf   : > { %475 = vst.msk [vmem:[%s750_s27 + $0xc] sm:$0xf] %vm471_vm1, %v446_v6  ;;  %v392_v9 = vpop.f32.mrf.mxu2  ;;  %v412_v15 = vpop.f32.mrf.mxu3 }
  0xb0   : > { %483 = vst.msk [vmem:[%s750_s27 + $0x2c] sm:$0xf] %vm471_vm1, %v454_v7  ;;  %v393_v10 = vadd.f32 %v741_v16, %v392_v9  ;;  %v355_v11 = vpop.f32.mrf.mxu0  ;;  %v375_v12 = vpop.f32.mrf.mxu1  ;;  %v413_v18 = vadd.f32 %v741_v16, %v412_v15 }
  0xb1   : > { %v356_v13 = vadd.f32 %v741_v16, %v355_v11  ;;  %v376_v14 = vadd.f32 %v741_v16, %v375_v12  ;;  %498 = vst.msk [vmem:[%s750_s27 + $0x68] sm:$0xf] %vm471_vm1, %v469_v8 }
  0xb2   : > { %v434_v17 = vmax.f32 %v393_v10, 0.0  ;;  %v442_v22 = vmax.f32 %v413_v18, 0.0 }
  0xb3   : > { %v419_v19 = vmax.f32 %v356_v13, 0.0  ;;  %v427_v20 = vmax.f32 %v376_v14, 0.0 }
  0xb4   : > { %v462_v21 = vpack.c.bf16 %v434_v17, %v434_v17  ;;  %v470_v25 = vpack.c.bf16 %v442_v22, %v442_v22 }
  0xb5   : > { %v447_v23 = vpack.c.bf16 %v419_v19, %v419_v19  ;;  %v455_v24 = vpack.c.bf16 %v427_v20, %v427_v20 }
  0xb6   : > { %491 = vst.msk [vmem:[%s750_s27 + $0x4c] sm:$0xf] %vm471_vm1, %v462_v21 }
  0xb7   : > { %476 = vst.msk [vmem:[%s750_s27 + $0x10] sm:$0xf] %vm471_vm1, %v447_v23  ;;  %v395_v26 = vpop.f32.mrf.mxu2 }
  0xb8   : > { %484 = vst.msk [vmem:[%s750_s27 + $0x30] sm:$0xf] %vm471_vm1, %v455_v24  ;;  %v396_v27 = vadd.f32 %v741_v16, %v395_v26  ;;  %v357_v28 = vpop.f32.mrf.mxu0  ;;  %v377_v29 = vpop.f32.mrf.mxu1 }
  0xb9   : > { %v358_v30 = vadd.f32 %v741_v16, %v357_v28  ;;  %v378_v31 = vadd.f32 %v741_v16, %v377_v29  ;;  %499 = vst.msk [vmem:[%s750_s27 + $0x6c] sm:$0xf] %vm471_vm1, %v470_v25 }
  0xba   : > { %v435_v32 = vmax.f32 %v396_v27, 0.0 }
  0xbb   : > { %v420_v33 = vmax.f32 %v358_v30, 0.0  ;;  %v428_v34 = vmax.f32 %v378_v31, 0.0 }
  0xbc   : > { %v463_v35 = vpack.c.bf16 %v435_v32, %v435_v32 }
  0xbd   : > { %v448_v36 = vpack.c.bf16 %v420_v33, %v420_v33  ;;  %v456_v37 = vpack.c.bf16 %v428_v34, %v428_v34 }
  0xbe   : > { %492 = vst.msk [vmem:[%s750_s27 + $0x50] sm:$0xf] %vm471_vm1, %v463_v35 }
  0xbf   : > { %477 = vst.msk [vmem:[%s750_s27 + $0x14] sm:$0xf] %vm471_vm1, %v448_v36  ;;  %v397_v38 = vpop.f32.mrf.mxu2 }
  0xc0   : > { %485 = vst.msk [vmem:[%s750_s27 + $0x34] sm:$0xf] %vm471_vm1, %v456_v37  ;;  %v398_v39 = vadd.f32 %v741_v16, %v397_v38  ;;  %v360_v40 = vpop.f32.mrf.mxu0  ;;  %v380_v41 = vpop.f32.mrf.mxu1 }
  0xc1   : > { %v361_v42 = vadd.f32 %v741_v16, %v360_v40  ;;  %v381_v43 = vadd.f32 %v741_v16, %v380_v41 }
  0xc2   : > { %v436_v44 = vmax.f32 %v398_v39, 0.0 }
  0xc3   : > { %v421_v45 = vmax.f32 %v361_v42, 0.0  ;;  %v429_v46 = vmax.f32 %v381_v43, 0.0 }
  0xc4   : > { %v464_v47 = vpack.c.bf16 %v436_v44, %v436_v44 }
  0xc5   : > { %v449_v48 = vpack.c.bf16 %v421_v45, %v421_v45  ;;  %v457_v49 = vpack.c.bf16 %v429_v46, %v429_v46 }
  0xc6   : > { %493 = vst.msk [vmem:[%s750_s27 + $0x54] sm:$0xf] %vm471_vm1, %v464_v47 }
  0xc7   : > { %478 = vst.msk [vmem:[%s750_s27 + $0x18] sm:$0xf] %vm471_vm1, %v449_v48  ;;  %v400_v50 = vpop.f32.mrf.mxu2 }
  0xc8   : > { %486 = vst.msk [vmem:[%s750_s27 + $0x38] sm:$0xf] %vm471_vm1, %v457_v49  ;;  %v401_v51 = vadd.f32 %v741_v16, %v400_v50  ;;  %v362_v52 = vpop.f32.mrf.mxu0  ;;  %v382_v53 = vpop.f32.mrf.mxu1 }
  0xc9   : > { %v363_v54 = vadd.f32 %v741_v16, %v362_v52  ;;  %v383_v55 = vadd.f32 %v741_v16, %v382_v53 }
  0xca   : > { %v437_v56 = vmax.f32 %v401_v51, 0.0 }
  0xcb   : > { %v422_v57 = vmax.f32 %v363_v54, 0.0  ;;  %v430_v58 = vmax.f32 %v383_v55, 0.0 }
  0xcc   : > { %v465_v59 = vpack.c.bf16 %v437_v56, %v437_v56 }
  0xcd   : > { %v450_v60 = vpack.c.bf16 %v422_v57, %v422_v57  ;;  %v458_v61 = vpack.c.bf16 %v430_v58, %v430_v58 }
  0xce   : > { %494 = vst.msk [vmem:[%s750_s27 + $0x58] sm:$0xf] %vm471_vm1, %v465_v59 }
  0xcf   : > { %479 = vst.msk [vmem:[%s750_s27 + $0x1c] sm:$0xf] %vm471_vm1, %v450_v60  ;;  %v402_v62 = vpop.f32.mrf.mxu2 }
  0xd0   : > { %487 = vst.msk [vmem:[%s750_s27 + $0x3c] sm:$0xf] %vm471_vm1, %v458_v61  ;;  %v403_v63 = vadd.f32 %v741_v16, %v402_v62 }
  0xd2   : > { %v438_v0 = vmax.f32 %v403_v63, 0.0 }
  0xd4   : > { %v466_v1 = vpack.c.bf16 %v438_v0, %v438_v0 }
  0xd6   : > { %495 = vst.msk [vmem:[%s750_s27 + $0x5c] sm:$0xf] %vm471_vm1, %v466_v1 }
  0xd7 PF: > { %s13_s12 = sadd.s32 1, %s680_s12  }
  0xd8   : > { %p10_p4 = scmp.ge.s32.totalorder %s13_s12, 9  }
  0xda   :  { %12 = sbr.rel (!%p10_p4) target bundleno = 1 (0x1), region = 62 }

// kernel: cnn1_forward.6
= control target key start
LH: loop header
LB: loop body
LE: loop exit
PB: predicated region body
PF: predicated region fallthrough
CT: control target
= control target key end

     0   :  { %s939_s27 = smov 96   ;;  %vm738_vm0 = vcmask 256000   ;;  %vm736_vm1 = vcmask 257024   ;;  %s1762_s0 = inlined_call_operand.vmem [shape: bf16[28,2,14,64], index: 0, kind: input, shape index: {}]   ;;  %s1763_s1 = inlined_call_operand.vmem [shape: bf16[28,14,32], index: 1, kind: output, shape index: {}]  }
   0x1   :  { %v8_v0 = vld [vmem:[%s1762_s0] sm:$0xf]  ;;  %v9_v1 = vld [vmem:[%s1762_s0 + $0x4] sm:$0x7]  ;;  %v10_v2 = vld [vmem:[%s1762_s0 + $0x8] sm:$0xf] }
   0x2   :  { %v11_v3 = vld [vmem:[%s1762_s0 + $0xc] sm:$0x7]  ;;  %v120_v4 = vunpack.c.l.bf16 %v8_v0  ;;  %v121_v5 = vunpack.c.l.bf16 %v9_v1  ;;  %v176_v6 = vunpack.c.l.bf16 %v10_v2  ;;  %v16_v7 = vld [vmem:[%s1762_s0 + $0x20] sm:$0xf]  ;;  %v17_v8 = vld [vmem:[%s1762_s0 + $0x24] sm:$0x7] }
   0x3   :  { %v177_v9 = vunpack.c.l.bf16 %v11_v3  ;;  %v18_v10 = vld [vmem:[%s1762_s0 + $0x28] sm:$0xf]  ;;  %v19_v11 = vld [vmem:[%s1762_s0 + $0x2c] sm:$0x7]  ;;  %v124_v12 = vunpack.c.l.bf16 %v16_v7  ;;  %v125_v13 = vunpack.c.l.bf16 %v17_v8  ;;  %v12_v14 = vld [vmem:[%s1762_s0 + $0x10] sm:$0xf] }
   0x4   :  { %v977_v15 = vmax.f32 %v120_v4, %v176_v6  ;;  %v180_v16 = vunpack.c.l.bf16 %v18_v10  ;;  %v181_v17 = vunpack.c.l.bf16 %v19_v11  ;;  %v13_v18 = vld [vmem:[%s1762_s0 + $0x14] sm:$0x7]  ;;  %v14_v19 = vld [vmem:[%s1762_s0 + $0x18] sm:$0xf]  ;;  %v15_v20 = vld [vmem:[%s1762_s0 + $0x1c] sm:$0x7]  ;;  %v122_v21 = vunpack.c.l.bf16 %v12_v14 }
   0x5   :  { %v988_v22 = vmax.f32 %v121_v5, %v177_v9  ;;  %v123_v23 = vunpack.c.l.bf16 %v13_v18  ;;  %v178_v24 = vunpack.c.l.bf16 %v14_v19  ;;  %v179_v25 = vunpack.c.l.bf16 %v15_v20  ;;  %v20_v26 = vld [vmem:[%s1762_s0 + $0x30] sm:$0xf]  ;;  %v21_v27 = vld [vmem:[%s1762_s0 + $0x34] sm:$0x7]  ;;  %v22_v28 = vld [vmem:[%s1762_s0 + $0x38] sm:$0xf] }
   0x6   :  { %v999_v29 = vmax.f32 %v124_v12, %v180_v16  ;;  %v1001_v30 = vmax.f32 %v125_v13, %v181_v17  ;;  %v23_v31 = vld [vmem:[%s1762_s0 + $0x3c] sm:$0x7]  ;;  %v126_v32 = vunpack.c.l.bf16 %v20_v26  ;;  %v127_v35 = vunpack.c.l.bf16 %v21_v27  ;;  %v32_v36 = vld [vmem:[%s1762_s0 + $0x60] sm:$0xf]  ;;  %v33_v39 = vld [vmem:[%s1762_s0 + $0x64] sm:$0x7] }
   0x7   :  { %v1006_v33 = vmax.f32 %v122_v21, %v178_v24  ;;  %v1008_v34 = vmax.f32 %v123_v23, %v179_v25  ;;  %v182_v37 = vunpack.c.l.bf16 %v22_v28  ;;  %v183_v38 = vunpack.c.l.bf16 %v23_v31  ;;  %v34_v40 = vld [vmem:[%s1762_s0 + $0x68] sm:$0xf]  ;;  %v35_v42 = vld [vmem:[%s1762_s0 + $0x6c] sm:$0x7]  ;;  %v36_v44 = vld [vmem:[%s1762_s0 + $0x70] sm:$0xf] }
   0x8   :  { %v132_v43 = vunpack.c.l.bf16 %v32_v36  ;;  %v799_v45 = vpack.i.bf16 %v988_v22, %v977_v15  ;;  %v37_v47 = vld [vmem:[%s1762_s0 + $0x74] sm:$0x7]  ;;  %v38_v48 = vld [vmem:[%s1762_s0 + $0x78] sm:$0xf]  ;;  %v809_v49 = vpack.i.bf16 %v1001_v30, %v999_v29  ;;  %v133_v50 = vunpack.c.l.bf16 %v33_v39  ;;  %v39_v52 = vld [vmem:[%s1762_s0 + $0x7c] sm:$0x7] }
   0x9   :  { %v1019_v41 = vmax.f32 %v126_v32, %v182_v37  ;;  %v1029_v46 = vmax.f32 %v127_v35, %v183_v38  ;;  %v188_v51 = vunpack.c.l.bf16 %v34_v40  ;;  %v44_v53 = vld [vmem:[%s1762_s0 + $0x90] sm:$0xf]  ;;  %v804_v54 = vpack.i.bf16 %v1008_v34, %v1006_v33  ;;  %v45_v57 = vld [vmem:[%s1762_s0 + $0x94] sm:$0x7]  ;;  %v46_v58 = vld [vmem:[%s1762_s0 + $0x98] sm:$0xf] }
   0xa   :  { %800 = vrot.lane.b32.xlu0 %v799_v45, %s939_s27  ;;  %v189_v55 = vunpack.c.l.bf16 %v35_v42  ;;  %v134_v56 = vunpack.c.l.bf16 %v36_v44  ;;  %810 = vrot.lane.b32.xlu1 %v809_v49, %s939_s27  ;;  %v135_v60 = vunpack.c.l.bf16 %v37_v47  ;;  %v190_v61 = vunpack.c.l.bf16 %v38_v48  ;;  %v47_v62 = vld [vmem:[%s1762_s0 + $0x9c] sm:$0x7]  ;;  %v24_v2 = vld [vmem:[%s1762_s0 + $0x40] sm:$0xf] }
   0xb   :  { %v1055_v59 = vmax.f32 %v132_v43, %v188_v51  ;;  %v191_v0 = vunpack.c.l.bf16 %v39_v52  ;;  %v138_v1 = vunpack.c.l.bf16 %v44_v53  ;;  %v139_v4 = vunpack.c.l.bf16 %v45_v57  ;;  %v25_v6 = vld [vmem:[%s1762_s0 + $0x44] sm:$0x7]  ;;  %v26_v10 = vld [vmem:[%s1762_s0 + $0x48] sm:$0xf]  ;;  %v27_v11 = vld [vmem:[%s1762_s0 + $0x4c] sm:$0x7] }
   0xc   :  { %v1060_v63 = vmax.f32 %v133_v50, %v189_v55  ;;  %v1065_v3 = vmax.f32 %v134_v56, %v190_v61  ;;  %v194_v5 = vunpack.c.l.bf16 %v46_v58  ;;  %v814_v7 = vpack.i.bf16 %v1029_v46, %v1019_v41  ;;  %v48_v14 = vld [vmem:[%s1762_s0 + $0xa0] sm:$0xf]  ;;  %v49_v18 = vld [vmem:[%s1762_s0 + $0xa4] sm:$0x7]  ;;  %v50_v21 = vld [vmem:[%s1762_s0 + $0xa8] sm:$0xf] }
   0xd   :  { %v1072_v8 = vmax.f32 %v135_v60, %v191_v0  ;;  %v195_v9 = vunpack.c.l.bf16 %v47_v62  ;;  %v128_v13 = vunpack.c.l.bf16 %v24_v2  ;;  %v129_v17 = vunpack.c.l.bf16 %v25_v6  ;;  %v51_v23 = vld [vmem:[%s1762_s0 + $0xac] sm:$0x7]  ;;  %v56_v25 = vld [vmem:[%s1762_s0 + $0xc0] sm:$0xf]  ;;  %v57_v26 = vld [vmem:[%s1762_s0 + $0xc4] sm:$0x7] }
   0xe   :  { %v1080_v12 = vmax.f32 %v138_v1, %v194_v5  ;;  %v184_v19 = vunpack.c.l.bf16 %v26_v10  ;;  %v185_v20 = vunpack.c.l.bf16 %v27_v11  ;;  %v140_v24 = vunpack.c.l.bf16 %v48_v14  ;;  %v58_v35 = vld [vmem:[%s1762_s0 + $0xc8] sm:$0xf]  ;;  %v59_v39 = vld [vmem:[%s1762_s0 + $0xcc] sm:$0x7]  ;;  %v28_v40 = vld [vmem:[%s1762_s0 + $0x50] sm:$0xf] }
   0xf   :  { %v1085_v16 = vmax.f32 %v139_v4, %v195_v9  ;;  %v829_v27 = vpack.i.bf16 %v1060_v63, %v1055_v59  ;;  %v141_v32 = vunpack.c.l.bf16 %v49_v18  ;;  %v834_v36 = vpack.i.bf16 %v1072_v8, %v1065_v3  ;;  %v29_v44 = vld [vmem:[%s1762_s0 + $0x54] sm:$0x7]  ;;  %v30_v49 = vld [vmem:[%s1762_s0 + $0x58] sm:$0xf]  ;;  %v31_v50 = vld [vmem:[%s1762_s0 + $0x5c] sm:$0x7] }
  0x10   :  { %v1106_v28 = vmax.f32 %v128_v13, %v184_v19  ;;  %v1108_v31 = vmax.f32 %v129_v17, %v185_v20  ;;  %v196_v37 = vunpack.c.l.bf16 %v50_v21  ;;  %v197_v38 = vunpack.c.l.bf16 %v51_v23  ;;  %v60_v53 = vld [vmem:[%s1762_s0 + $0xd0] sm:$0xf]  ;;  %v61_v56 = vld [vmem:[%s1762_s0 + $0xd4] sm:$0x7]  ;;  %v62_v62 = vld [vmem:[%s1762_s0 + $0xd8] sm:$0xf] }
  0x11   :  { %v144_v42 = vunpack.c.l.bf16 %v56_v25  ;;  %v145_v43 = vunpack.c.l.bf16 %v57_v26  ;;  %v200_v48 = vunpack.c.l.bf16 %v58_v35  ;;  %v201_v51 = vunpack.c.l.bf16 %v59_v39  ;;  %v63_v0 = vld [vmem:[%s1762_s0 + $0xdc] sm:$0x7]  ;;  %v68_v2 = vld [vmem:[%s1762_s0 + $0xf0] sm:$0xf]  ;;  %v70_v9 = vld [vmem:[%s1762_s0 + $0xf8] sm:$0xf] }
  0x12   :  { %805 = vrot.lane.b32.xlu0 %v804_v54, %s939_s27  ;;  %815 = vrot.lane.b32.xlu1 %v814_v7, %s939_s27  ;;  %v1124_v45 = vmax.f32 %v140_v24, %v196_v37  ;;  %v1126_v47 = vmax.f32 %v141_v32, %v197_v38  ;;  %v130_v52 = vunpack.c.l.bf16 %v28_v40  ;;  %v131_v55 = vunpack.c.l.bf16 %v29_v44  ;;  %v69_v7 = vld [vmem:[%s1762_s0 + $0xf4] sm:$0x7]  ;;  %v71_v17 = vld [vmem:[%s1762_s0 + $0xfc] sm:$0x7] }
  0x13   :  { %v1137_v54 = vmax.f32 %v144_v42, %v200_v48  ;;  %v819_v57 = vpack.i.bf16 %v1108_v31, %v1106_v28  ;;  %v1144_v58 = vmax.f32 %v145_v43, %v201_v51  ;;  %v186_v60 = vunpack.c.l.bf16 %v30_v49  ;;  %v40_v19 = vld [vmem:[%s1762_s0 + $0x80] sm:$0xf]  ;;  %v41_v25 = vld [vmem:[%s1762_s0 + $0x84] sm:$0x7]  ;;  %v42_v26 = vld [vmem:[%s1762_s0 + $0x88] sm:$0xf] }
  0x14   :  { %v187_v61 = vunpack.c.l.bf16 %v31_v50  ;;  %v146_v1 = vunpack.c.l.bf16 %v60_v53  ;;  %v147_v6 = vunpack.c.l.bf16 %v61_v56  ;;  %v844_v10 = vpack.i.bf16 %v1085_v16, %v1080_v12  ;;  %v43_v32 = vld [vmem:[%s1762_s0 + $0x8c] sm:$0x7]  ;;  %v72_v37 = vld [vmem:[%s1762_s0 + $0x100] sm:$0xf]  ;;  %v73_v38 = vld [vmem:[%s1762_s0 + $0x104] sm:$0x7] }
  0x15   :  { %820 = vrot.lane.b32.xlu2 %v819_v57, %s939_s27  ;;  %v1158_v4 = vmax.f32 %v130_v52, %v186_v60  ;;  %v849_v11 = vpack.i.bf16 %v1126_v47, %v1124_v45  ;;  %v202_v13 = vunpack.c.l.bf16 %v62_v62  ;;  %v203_v14 = vunpack.c.l.bf16 %v63_v0  ;;  %v74_v44 = vld [vmem:[%s1762_s0 + $0x108] sm:$0xf]  ;;  %v75_v49 = vld [vmem:[%s1762_s0 + $0x10c] sm:$0x7]  ;;  %v80_v50 = vld [vmem:[%s1762_s0 + $0x120] sm:$0xf] }
  0x16   :  { %v1160_v5 = vmax.f32 %v131_v55, %v187_v61  ;;  %v150_v18 = vunpack.c.l.bf16 %v68_v2  ;;  %v151_v23 = vunpack.c.l.bf16 %v69_v7  ;;  %v206_v24 = vunpack.c.l.bf16 %v70_v9  ;;  %v81_v55 = vld [vmem:[%s1762_s0 + $0x124] sm:$0x7]  ;;  %v82_v56 = vld [vmem:[%s1762_s0 + $0x128] sm:$0xf]  ;;  %v83_v0 = vld [vmem:[%s1762_s0 + $0x12c] sm:$0x7] }
  0x17   :  { %v1178_v20 = vmax.f32 %v146_v1, %v202_v13  ;;  %v1180_v21 = vmax.f32 %v147_v6, %v203_v14  ;;  %v137_v42 = vunpack.c.l.bf16 %v41_v25  ;;  %v192_v43 = vunpack.c.l.bf16 %v42_v26  ;;  %v52_v6 = vld [vmem:[%s1762_s0 + $0xb0] sm:$0xf]  ;;  %v54_v13 = vld [vmem:[%s1762_s0 + $0xb8] sm:$0xf] }
  0x18   :  { %v1191_v35 = vmax.f32 %v150_v18, %v206_v24  ;;  %v824_v39 = vpack.i.bf16 %v1160_v5, %v1158_v4  ;;  %v193_v48 = vunpack.c.l.bf16 %v43_v32  ;;  %v152_v52 = vunpack.c.l.bf16 %v72_v37  ;;  %v55_v18 = vld [vmem:[%s1762_s0 + $0xbc] sm:$0x7]  ;;  %v84_v24 = vld [vmem:[%s1762_s0 + $0x130] sm:$0xf]  ;;  %v85_v32 = vld [vmem:[%s1762_s0 + $0x134] sm:$0x7] }
  0x19   :  { %v153_v53 = vunpack.c.l.bf16 %v73_v38  ;;  %v859_v57 = vpack.i.bf16 %v1144_v58, %v1137_v54  ;;  %v864_v60 = vpack.i.bf16 %v1180_v21, %v1178_v20  ;;  %v208_v62 = vunpack.c.l.bf16 %v74_v44  ;;  %v92_v44 = vld [vmem:[%s1762_s0 + $0x150] sm:$0xf] }
  0x1a   :  { %830 = vrot.lane.b32.xlu0 %v829_v27, %s939_s27  ;;  %835 = vrot.lane.b32.xlu1 %v834_v36, %s939_s27  ;;  %v207_v27 = vunpack.c.l.bf16 %v71_v17  ;;  %v136_v36 = vunpack.c.l.bf16 %v40_v19  ;;  %v1227_v61 = vmax.f32 %v137_v42, %v193_v48  ;;  %v209_v1 = vunpack.c.l.bf16 %v75_v49  ;;  %v93_v48 = vld [vmem:[%s1762_s0 + $0x154] sm:$0x7] }
  0x1b   :  { %v156_v2 = vunpack.c.l.bf16 %v80_v50  ;;  %v1235_v7 = vmax.f32 %v152_v52, %v208_v62  ;;  %v157_v9 = vunpack.c.l.bf16 %v81_v55  ;;  %v213_v17 = vunpack.c.l.bf16 %v83_v0  ;;  %v94_v55 = vld [vmem:[%s1762_s0 + $0x158] sm:$0xf]  ;;  %v64_v62 = vld [vmem:[%s1762_s0 + $0xe0] sm:$0xf] }
  0x1c   :  { %v1201_v40 = vmax.f32 %v151_v23, %v207_v27  ;;  %v1215_v51 = vmax.f32 %v136_v36, %v192_v43  ;;  %v1243_v14 = vmax.f32 %v153_v53, %v209_v1  ;;  %v142_v23 = vunpack.c.l.bf16 %v52_v6  ;;  %v86_v36 = vld [vmem:[%s1762_s0 + $0x138] sm:$0xf]  ;;  %v65_v6 = vld [vmem:[%s1762_s0 + $0xe4] sm:$0x7] }
  0x1d   :  { %825 = vrot.lane.b32.xlu2 %v824_v39, %s939_s27  ;;  %v1253_v25 = vmax.f32 %v157_v9, %v213_v17  ;;  %v198_v27 = vunpack.c.l.bf16 %v54_v13  ;;  %v199_v38 = vunpack.c.l.bf16 %v55_v18  ;;  %v87_v39 = vld [vmem:[%s1762_s0 + $0x13c] sm:$0x7]  ;;  %v158_v43 = vunpack.c.l.bf16 %v84_v24  ;;  %v66_v9 = vld [vmem:[%s1762_s0 + $0xe8] sm:$0xf]  ;;  %v67_v13 = vld [vmem:[%s1762_s0 + $0xec] sm:$0x7] }
  0x1e   :  { %v839_v37 = vpack.i.bf16 %v1227_v61, %v1215_v51  ;;  %v874_v49 = vpack.i.bf16 %v1201_v40, %v1191_v35  ;;  %v159_v52 = vunpack.c.l.bf16 %v85_v32  ;;  %v214_v53 = vunpack.c.l.bf16 %v86_v36  ;;  %v97_v32 = vld [vmem:[%s1762_s0 + $0x164] sm:$0x7]  ;;  %v98_v36 = vld [vmem:[%s1762_s0 + $0x168] sm:$0xf] }
  0x1f   :  { %v1268_v42 = vmax.f32 %v142_v23, %v198_v27  ;;  %v162_v1 = vunpack.c.l.bf16 %v92_v44  ;;  %v148_v18 = vunpack.c.l.bf16 %v64_v62  ;;  %v96_v23 = vld [vmem:[%s1762_s0 + $0x160] sm:$0xf]  ;;  %v204_v27 = vunpack.c.l.bf16 %v66_v9 }
  0x20   :  { %v1292_v0 = vmax.f32 %v158_v43, %v214_v53  ;;  %v99_v43 = vld [vmem:[%s1762_s0 + $0x16c] sm:$0x7]  ;;  %v165_v53 = vunpack.c.l.bf16 %v97_v32  ;;  %v79_v32 = vld [vmem:[%s1762_s0 + $0x11c] sm:$0x7] }
  0x21   :  { %v1325_v44 = vmax.f32 %v148_v18, %v204_v27 }
  0x22   :  { %845 = vrot.lane.b32.xlu0 %v844_v10, %s939_s27  ;;  %850 = vrot.lane.b32.xlu1 %v849_v11, %s939_s27  ;;  %v212_v10 = vunpack.c.l.bf16 %v82_v56  ;;  %v53_v11 = vld [vmem:[%s1762_s0 + $0xb4] sm:$0x7]  ;;  %v879_v56 = vpack.i.bf16 %v1243_v14, %v1235_v7 }
  0x23   :  { %v143_v26 = vunpack.c.l.bf16 %v53_v11  ;;  %v218_v11 = vunpack.c.l.bf16 %v94_v55  ;;  %v220_v55 = vunpack.c.l.bf16 %v98_v36  ;;  %v108_v36 = vld [vmem:[%s1762_s0 + $0x190] sm:$0xf] }
  0x24   :  { %v1248_v19 = vmax.f32 %v156_v2, %v212_v10  ;;  %v163_v2 = vunpack.c.l.bf16 %v93_v48  ;;  %v164_v48 = vunpack.c.l.bf16 %v96_v23 }
  0x25   :  { %840 = vrot.lane.b32.xlu2 %v839_v37, %s939_s27  ;;  %v1279_v50 = vmax.f32 %v143_v26, %v199_v38  ;;  %v1308_v24 = vmax.f32 %v162_v1, %v218_v11  ;;  %v149_v26 = vunpack.c.l.bf16 %v65_v6  ;;  %v221_v1 = vunpack.c.l.bf16 %v99_v43  ;;  %v76_v11 = vld [vmem:[%s1762_s0 + $0x110] sm:$0xf] }
  0x26   :  { %v1346_v6 = vmax.f32 %v164_v48, %v220_v55  ;;  %v109_v48 = vld [vmem:[%s1762_s0 + $0x194] sm:$0x7] }
  0x27   :  { %1772 = vst [vmem:[#allocation2_spill] sm:$0xff] %v1308_v24  ;;  %v854_v37 = vpack.i.bf16 %v1279_v50, %v1268_v42 }
  0x28   :  { %1774 = vst [vmem:[#allocation4_spill] sm:$0xff] %v1346_v6 }
  0x2a   :  { %860 = vrot.lane.b32.xlu0 %v859_v57, %s939_s27  ;;  %865 = vrot.lane.b32.xlu1 %v864_v60, %s939_s27  ;;  %v215_v57 = vunpack.c.l.bf16 %v87_v39  ;;  %v95_v60 = vld [vmem:[%s1762_s0 + $0x15c] sm:$0x7]  ;;  %v205_v39 = vunpack.c.l.bf16 %v67_v13  ;;  %v77_v13 = vld [vmem:[%s1762_s0 + $0x114] sm:$0x7] }
  0x2b   :  { %v219_v17 = vunpack.c.l.bf16 %v95_v60  ;;  %v889_v60 = vpack.i.bf16 %v1253_v25, %v1248_v19  ;;  %v155_v43 = vunpack.c.l.bf16 %v77_v13 }
  0x2c   :  { %v1300_v10 = vmax.f32 %v159_v52, %v215_v57  ;;  %v104_v52 = vld [vmem:[%s1762_s0 + $0x180] sm:$0xf]  ;;  %v105_v57 = vld [vmem:[%s1762_s0 + $0x184] sm:$0x7] }
  0x2d   :  { %v1319_v38 = vmax.f32 %v163_v2, %v219_v17  ;;  %855 = vrot.lane.b32.xlu2 %v854_v37, %s939_s27  ;;  %v107_v2 = vld [vmem:[%s1762_s0 + $0x18c] sm:$0x7]  ;;  %v168_v9 = vunpack.c.l.bf16 %v104_v52  ;;  %v1354_v17 = vmax.f32 %v165_v53, %v221_v1  ;;  %v169_v18 = vunpack.c.l.bf16 %v105_v57  ;;  %v110_v52 = vld [vmem:[%s1762_s0 + $0x198] sm:$0xf] }
  0x2e   :  { %v894_v62 = vpack.i.bf16 %v1300_v10, %v1292_v0  ;;  %v225_v27 = vunpack.c.l.bf16 %v107_v2  ;;  %v211_v1 = vunpack.c.l.bf16 %v79_v32  ;;  %v170_v2 = vunpack.c.l.bf16 %v108_v36  ;;  %v119_v32 = vld [vmem:[%s1762_s0 + $0x1bc] sm:$0x7] }
  0x2f   :  { %1773 = vst [vmem:[#allocation3_spill] sm:$0xff] %v1319_v38  ;;  %v226_v13 = vunpack.c.l.bf16 %v110_v52  ;;  %v909_v36 = vpack.i.bf16 %v1354_v17, %v1346_v6  ;;  %v88_v52 = vld [vmem:[%s1762_s0 + $0x140] sm:$0xf]  ;;  %v231_v6 = vunpack.c.l.bf16 %v119_v32 }
  0x30   :  { %1775 = vst [vmem:[#allocation5_spill] sm:$0xff] %v1354_v17  ;;  %v1376_v55 = vmax.f32 %v169_v18, %v225_v27  ;;  %v117_v18 = vld [vmem:[%s1762_s0 + $0x1b4] sm:$0x7] }
  0x32   :  { %875 = vrot.lane.b32.xlu0 %v874_v49, %s939_s27  ;;  %880 = vrot.lane.b32.xlu1 %v879_v56, %s939_s27  ;;  %v1331_v49 = vmax.f32 %v149_v26, %v205_v39  ;;  %v106_v56 = vld [vmem:[%s1762_s0 + $0x188] sm:$0xf]  ;;  %v78_v26 = vld [vmem:[%s1762_s0 + $0x118] sm:$0xf]  ;;  %v154_v39 = vunpack.c.l.bf16 %v76_v11  ;;  %1777 = vst [vmem:[#allocation7_spill] sm:$0xff] %v1376_v55  ;;  %v171_v11 = vunpack.c.l.bf16 %v109_v48 }
  0x33   :  { %v224_v23 = vunpack.c.l.bf16 %v106_v56  ;;  %v210_v57 = vunpack.c.l.bf16 %v78_v26  ;;  %v111_v56 = vld [vmem:[%s1762_s0 + $0x19c] sm:$0x7]  ;;  %v1396_v26 = vmax.f32 %v155_v43, %v211_v1  ;;  %v90_v1 = vld [vmem:[%s1762_s0 + $0x148] sm:$0xf] }
  0x34   :  { %v869_v53 = vpack.i.bf16 %v1331_v49, %v1325_v44  ;;  %v227_v27 = vunpack.c.l.bf16 %v111_v56  ;;  %v89_v56 = vld [vmem:[%s1762_s0 + $0x144] sm:$0x7]  ;;  %v216_v32 = vunpack.c.l.bf16 %v90_v1  ;;  %v112_v1 = vld [vmem:[%s1762_s0 + $0x1a0] sm:$0xf] }
  0x35   :  { %v1365_v37 = vmax.f32 %v168_v9, %v224_v23  ;;  %v116_v9 = vld [vmem:[%s1762_s0 + $0x1b0] sm:$0xf]  ;;  %v904_v23 = vpack.i.bf16 %v1319_v38, %v1308_v24 }
  0x36   :  { %870 = vrot.lane.b32.xlu2 %v869_v53, %s939_s27  ;;  %v174_v48 = vunpack.c.l.bf16 %v116_v9  ;;  %v1408_v53 = vmax.f32 %v171_v11, %v227_v27  ;;  %v160_v9 = vunpack.c.l.bf16 %v88_v52  ;;  %v100_v11 = vld [vmem:[%s1762_s0 + $0x170] sm:$0xf]  ;;  %v161_v27 = vunpack.c.l.bf16 %v89_v56  ;;  %v102_v52 = vld [vmem:[%s1762_s0 + $0x178] sm:$0xf] }
  0x37   :  { %1776 = vst [vmem:[#allocation6_spill] sm:$0xff] %v1365_v37 }
  0x3a   :  { %890 = vrot.lane.b32.xlu0 %v889_v60, %s939_s27  ;;  %895 = vrot.lane.b32.xlu1 %v894_v62, %s939_s27  ;;  %v1386_v60 = vmax.f32 %v154_v39, %v210_v57  ;;  %v118_v62 = vld [vmem:[%s1762_s0 + $0x1b8] sm:$0xf]  ;;  %v1403_v39 = vmax.f32 %v170_v2, %v226_v13  ;;  %v175_v57 = vunpack.c.l.bf16 %v117_v18  ;;  %v91_v2 = vld [vmem:[%s1762_s0 + $0x14c] sm:$0x7] }
  0x3b   :  { %v230_v43 = vunpack.c.l.bf16 %v118_v62  ;;  %v101_v13 = vld [vmem:[%s1762_s0 + $0x174] sm:$0x7]  ;;  %v217_v24 = vunpack.c.l.bf16 %v91_v2  ;;  %v113_v2 = vld [vmem:[%s1762_s0 + $0x1a4] sm:$0x7] }
  0x3c   :  { %1778 = vst [vmem:[#allocation8_spill] sm:$0xff] %v1403_v39  ;;  %v1428_v62 = vmax.f32 %v175_v57, %v231_v6  ;;  %v884_v17 = vpack.i.bf16 %v1396_v26, %v1386_v60  ;;  %v166_v6 = vunpack.c.l.bf16 %v100_v11  ;;  %v167_v57 = vunpack.c.l.bf16 %v101_v13  ;;  %v114_v11 = vld [vmem:[%s1762_s0 + $0x1a8] sm:$0xf] }
  0x3d   :  { %v1426_v18 = vmax.f32 %v174_v48, %v230_v43  ;;  %v1439_v48 = vmax.f32 %v160_v9, %v216_v32  ;;  %v919_v43 = vpack.i.bf16 %v1376_v55, %v1365_v37  ;;  %v1444_v56 = vmax.f32 %v161_v27, %v217_v24 }
  0x3e   :  { %885 = vrot.lane.b32.xlu2 %v884_v17, %s939_s27  ;;  %v115_v17 = vld [vmem:[%s1762_s0 + $0x1ac] sm:$0x7]  ;;  %v924_v24 = vpack.i.bf16 %v1408_v53, %v1403_v39  ;;  %v172_v32 = vunpack.c.l.bf16 %v112_v1  ;;  %v228_v37 = vunpack.c.l.bf16 %v114_v11 }
  0x3f   :  { %1779 = vst [vmem:[#allocation9_spill] sm:$0xff] %v1426_v18  ;;  %v229_v55 = vunpack.c.l.bf16 %v115_v17 }
  0x40   :  { %v1469_v38 = vmax.f32 %v172_v32, %v228_v37 }
  0x42   :  { %905 = vrot.lane.b32.xlu0 %v904_v23, %s939_s27  ;;  %910 = vrot.lane.b32.xlu1 %v909_v36, %s939_s27  ;;  %v103_v23 = vld [vmem:[%s1762_s0 + $0x17c] sm:$0x7]  ;;  %v222_v36 = vunpack.c.l.bf16 %v102_v52  ;;  %v173_v52 = vunpack.c.l.bf16 %v113_v2 }
  0x43   :  { %v223_v9 = vunpack.c.l.bf16 %v103_v23  ;;  %v899_v23 = vpack.i.bf16 %v1444_v56, %v1439_v48 }
  0x44   :  { %v1460_v13 = vmax.f32 %v166_v6, %v222_v36  ;;  %v1471_v39 = vmax.f32 %v173_v52, %v229_v55  ;;  %v934_v6 = vpack.i.bf16 %v1428_v62, %v1426_v18 }
  0x45   :  { %v1462_v27 = vmax.f32 %v167_v57, %v223_v9 }
  0x46   :  { %900 = vrot.lane.b32.xlu2 %v899_v23, %s939_s27 }
  0x47   :  { %v914_v57 = vpack.i.bf16 %v1462_v27, %v1460_v13 }
  0x4a   :  { %920 = vrot.lane.b32.xlu0 %v919_v43, %s939_s27  ;;  %925 = vrot.lane.b32.xlu1 %v924_v24, %s939_s27  ;;  %v929_v43 = vpack.i.bf16 %v1471_v39, %v1469_v38 }
  0x4e   :  { %915 = vrot.lane.b32.xlu2 %v914_v57, %s939_s27 }
  0x52   :  { %935 = vrot.lane.b32.xlu0 %v934_v6, %s939_s27 }
  0x56   :  { %930 = vrot.lane.b32.xlu2 %v929_v43, %s939_s27 }
  0x6f   :  { %v821_v36 = vpop.permute.xlu2 %820 }
  0x70   :  { %v823_v37 = vunpack.i.h.bf16 %v821_v36  ;;  %v822_v1 = vunpack.i.l.bf16 %v821_v36 }
  0x72   :  { %v633_v55 = vmax.f32 %v1108_v31, %v823_v37  ;;  %v632_v2 = vmax.f32 %v1106_v28, %v822_v1 }
  0x74   :  { %v689_v9 = vpack.c.bf16 %v633_v55, %v633_v55  ;;  %v688_v11 = vpack.c.bf16 %v632_v2, %v632_v2 }
  0x76   :  { %747 = vst.msk [vmem:[%s1763_s1 + $0x24] sm:$0x7] %vm738_vm0, %v689_v9 }
  0x77   :  { %746 = vst.msk [vmem:[%s1763_s1 + $0x20] sm:$0xf] %vm736_vm1, %v688_v11  ;;  %v826_v52 = vpop.permute.xlu2 %825 }
  0x78   :  { %v828_v6 = vunpack.i.h.bf16 %v826_v52  ;;  %v827_v57 = vunpack.i.l.bf16 %v826_v52 }
  0x7a   :  { %v635_v55 = vmax.f32 %v1160_v5, %v828_v6  ;;  %v634_v2 = vmax.f32 %v1158_v4, %v827_v57 }
  0x7c   :  { %v801_v17 = vpop.permute.xlu0 %800  ;;  %v811_v31 = vpop.permute.xlu1 %810 }
  0x7d   :  { %v803_v24 = vunpack.i.h.bf16 %v801_v17  ;;  %v802_v32 = vunpack.i.l.bf16 %v801_v17  ;;  %v813_v28 = vunpack.i.h.bf16 %v811_v31  ;;  %v812_v23 = vunpack.i.l.bf16 %v811_v31 }
  0x7f   :  { %v625_v43 = vmax.f32 %v988_v22, %v803_v24  ;;  %v624_v36 = vmax.f32 %v977_v15, %v802_v32  ;;  %v629_v37 = vmax.f32 %v1001_v30, %v813_v28  ;;  %v628_v1 = vmax.f32 %v999_v29, %v812_v23  ;;  %v841_v31 = vpop.permute.xlu2 %840 }
  0x80   :  { %v691_v22 = vpack.c.bf16 %v635_v55, %v635_v55  ;;  %v690_v29 = vpack.c.bf16 %v634_v2, %v634_v2  ;;  %v843_v23 = vunpack.i.h.bf16 %v841_v31  ;;  %v842_v6 = vunpack.i.l.bf16 %v841_v31 }
  0x81   :  { %v681_v9 = vpack.c.bf16 %v625_v43, %v625_v43  ;;  %v680_v11 = vpack.c.bf16 %v624_v36, %v624_v36  ;;  %v685_v17 = vpack.c.bf16 %v629_v37, %v629_v37  ;;  %v684_v18 = vpack.c.bf16 %v628_v1, %v628_v1 }
  0x82   :  { %749 = vst.msk [vmem:[%s1763_s1 + $0x2c] sm:$0x7] %vm738_vm0, %v691_v22  ;;  %v640_v36 = vmax.f32 %v1215_v51, %v842_v6 }
  0x83   :  { %739 = vst.msk [vmem:[%s1763_s1 + $0x4] sm:$0x7] %vm738_vm0, %v681_v9 }
  0x84   :  { %737 = vst.msk [vmem:[%s1763_s1] sm:$0xf] %vm736_vm1, %v680_v11  ;;  %v806_v15 = vpop.permute.xlu0 %805  ;;  %v816_v5 = vpop.permute.xlu1 %815 }
  0x85   :  { %743 = vst.msk [vmem:[%s1763_s1 + $0x14] sm:$0x7] %vm738_vm0, %v685_v17  ;;  %v808_v30 = vunpack.i.h.bf16 %v806_v15  ;;  %v807_v4 = vunpack.i.l.bf16 %v806_v15  ;;  %v818_v24 = vunpack.i.h.bf16 %v816_v5  ;;  %v817_v32 = vunpack.i.l.bf16 %v816_v5 }
  0x86   :  { %742 = vst.msk [vmem:[%s1763_s1 + $0x10] sm:$0xf] %vm736_vm1, %v684_v18 }
  0x87   :  { %v627_v52 = vmax.f32 %v1008_v34, %v808_v30  ;;  %v626_v28 = vmax.f32 %v1006_v33, %v807_v4  ;;  %748 = vst.msk [vmem:[%s1763_s1 + $0x28] sm:$0xf] %vm736_vm1, %v690_v29  ;;  %v631_v18 = vmax.f32 %v1029_v46, %v818_v24  ;;  %v630_v57 = vmax.f32 %v1019_v41, %v817_v32  ;;  %v856_v17 = vpop.permute.xlu2 %855 }
  0x88   :  { %v641_v33 = vmax.f32 %v1227_v61, %v843_v23  ;;  %v696_v46 = vpack.c.bf16 %v640_v36, %v640_v36  ;;  %v858_v29 = vunpack.i.h.bf16 %v856_v17  ;;  %v857_v30 = vunpack.i.l.bf16 %v856_v17 }
  0x89   :  { %v683_v43 = vpack.c.bf16 %v627_v52, %v627_v52  ;;  %v682_v34 = vpack.c.bf16 %v626_v28, %v626_v28  ;;  %v687_v37 = vpack.c.bf16 %v631_v18, %v631_v18  ;;  %v686_v1 = vpack.c.bf16 %v630_v57, %v630_v57 }
  0x8a   :  { %v697_v55 = vpack.c.bf16 %v641_v33, %v641_v33  ;;  %754 = vst.msk [vmem:[%s1763_s1 + $0x40] sm:$0xf] %vm736_vm1, %v696_v46  ;;  %v646_v32 = vmax.f32 %v1268_v42, %v857_v30 }
  0x8b   :  { %741 = vst.msk [vmem:[%s1763_s1 + $0xc] sm:$0x7] %vm738_vm0, %v683_v43 }
  0x8c   :  { %740 = vst.msk [vmem:[%s1763_s1 + $0x8] sm:$0xf] %vm736_vm1, %v682_v34  ;;  %v831_v41 = vpop.permute.xlu0 %830  ;;  %v836_v2 = vpop.permute.xlu1 %835 }
  0x8d   :  { %745 = vst.msk [vmem:[%s1763_s1 + $0x1c] sm:$0x7] %vm738_vm0, %v687_v37  ;;  %v833_v51 = vunpack.i.h.bf16 %v831_v41  ;;  %v832_v61 = vunpack.i.l.bf16 %v831_v41  ;;  %v838_v9 = vunpack.i.h.bf16 %v836_v2  ;;  %v837_v11 = vunpack.i.l.bf16 %v836_v2 }
  0x8e   :  { %744 = vst.msk [vmem:[%s1763_s1 + $0x18] sm:$0xf] %vm736_vm1, %v686_v1 }
  0x8f   :  { %v637_v22 = vmax.f32 %v1060_v63, %v833_v51  ;;  %v636_v15 = vmax.f32 %v1055_v59, %v832_v61  ;;  %755 = vst.msk [vmem:[%s1763_s1 + $0x44] sm:$0x7] %vm738_vm0, %v697_v55  ;;  %v639_v4 = vmax.f32 %v1072_v8, %v838_v9  ;;  %v638_v5 = vmax.f32 %v1065_v3, %v837_v11 }
  0x90   :  { %v647_v59 = vmax.f32 %v1279_v50, %v858_v29  ;;  %v702_v8 = vpack.c.bf16 %v646_v32, %v646_v32  ;;  %v871_v57 = vpop.permute.xlu2 %870 }
  0x91   :  { %v693_v24 = vpack.c.bf16 %v637_v22, %v637_v22  ;;  %v692_v63 = vpack.c.bf16 %v636_v15, %v636_v15  ;;  %v695_v31 = vpack.c.bf16 %v639_v4, %v639_v4  ;;  %v694_v52 = vpack.c.bf16 %v638_v5, %v638_v5 }
  0x92   :  { %v703_v28 = vpack.c.bf16 %v647_v59, %v647_v59  ;;  %v873_v33 = vunpack.i.h.bf16 %v871_v57  ;;  %v872_v36 = vunpack.i.l.bf16 %v871_v57  ;;  %760 = vst.msk [vmem:[%s1763_s1 + $0x58] sm:$0xf] %vm736_vm1, %v702_v8 }
  0x93   :  { %751 = vst.msk [vmem:[%s1763_s1 + $0x34] sm:$0x7] %vm738_vm0, %v693_v24 }
  0x94   :  { %750 = vst.msk [vmem:[%s1763_s1 + $0x30] sm:$0xf] %vm736_vm1, %v692_v63  ;;  %v846_v3 = vpop.permute.xlu0 %845  ;;  %v851_v23 = vpop.permute.xlu1 %850  ;;  %v652_v41 = vmax.f32 %v1325_v44, %v872_v36 }
  0x95   :  { %753 = vst.msk [vmem:[%s1763_s1 + $0x3c] sm:$0x7] %vm738_vm0, %v695_v31  ;;  %v848_v42 = vunpack.i.h.bf16 %v846_v3  ;;  %v847_v50 = vunpack.i.l.bf16 %v846_v3  ;;  %v853_v6 = vunpack.i.h.bf16 %v851_v23  ;;  %v852_v18 = vunpack.i.l.bf16 %v851_v23 }
  0x96   :  { %752 = vst.msk [vmem:[%s1763_s1 + $0x38] sm:$0xf] %vm736_vm1, %v694_v52 }
  0x97   :  { %v643_v43 = vmax.f32 %v1085_v16, %v848_v42  ;;  %v642_v34 = vmax.f32 %v1080_v12, %v847_v50  ;;  %761 = vst.msk [vmem:[%s1763_s1 + $0x5c] sm:$0x7] %vm738_vm0, %v703_v28  ;;  %v645_v37 = vmax.f32 %v1126_v47, %v853_v6  ;;  %v644_v1 = vmax.f32 %v1124_v45, %v852_v18 }
  0x98   :  { %v653_v12 = vmax.f32 %v1331_v49, %v873_v33  ;;  %v708_v47 = vpack.c.bf16 %v652_v41, %v652_v41  ;;  %v886_v15 = vpop.permute.xlu2 %885 }
  0x99   :  { %v699_v55 = vpack.c.bf16 %v643_v43, %v643_v43  ;;  %v698_v16 = vpack.c.bf16 %v642_v34, %v642_v34  ;;  %v701_v46 = vpack.c.bf16 %v645_v37, %v645_v37  ;;  %v700_v51 = vpack.c.bf16 %v644_v1, %v644_v1 }
  0x9a   :  { %v709_v61 = vpack.c.bf16 %v653_v12, %v653_v12  ;;  %766 = vst.msk [vmem:[%s1763_s1 + $0x70] sm:$0xf] %vm736_vm1, %v708_v47  ;;  %v888_v4 = vunpack.i.h.bf16 %v886_v15  ;;  %v887_v5 = vunpack.i.l.bf16 %v886_v15 }
  0x9b   :  { %757 = vst.msk [vmem:[%s1763_s1 + $0x4c] sm:$0x7] %vm738_vm0, %v699_v55 }
  0x9c   :  { %756 = vst.msk [vmem:[%s1763_s1 + $0x48] sm:$0xf] %vm736_vm1, %v698_v16  ;;  %v861_v45 = vpop.permute.xlu0 %860  ;;  %v866_v2 = vpop.permute.xlu1 %865  ;;  %v659_v59 = vmax.f32 %v1396_v26, %v888_v4  ;;  %v658_v32 = vmax.f32 %v1386_v60, %v887_v5  ;;  %v1781_v4 = vld [vmem:[#allocation2_spill] sm:$0xff] }
  0x9d   :  { %759 = vst.msk [vmem:[%s1763_s1 + $0x54] sm:$0x7] %vm738_vm0, %v701_v46  ;;  %v863_v44 = vunpack.i.h.bf16 %v861_v45  ;;  %v862_v49 = vunpack.i.l.bf16 %v861_v45  ;;  %v868_v9 = vunpack.i.h.bf16 %v866_v2  ;;  %v867_v11 = vunpack.i.l.bf16 %v866_v2 }
  0x9e   :  { %758 = vst.msk [vmem:[%s1763_s1 + $0x50] sm:$0xf] %vm736_vm1, %v700_v51  ;;  %v714_v31 = vpack.c.bf16 %v658_v32, %v658_v32 }
  0x9f   :  { %v649_v17 = vmax.f32 %v1144_v58, %v863_v44  ;;  %v648_v22 = vmax.f32 %v1137_v54, %v862_v49  ;;  %767 = vst.msk [vmem:[%s1763_s1 + $0x74] sm:$0x7] %vm738_vm0, %v709_v61  ;;  %v651_v29 = vmax.f32 %v1180_v21, %v868_v9  ;;  %v650_v30 = vmax.f32 %v1178_v20, %v867_v11 }
  0xa0   :  { %v715_v21 = vpack.c.bf16 %v659_v59, %v659_v59  ;;  %v901_v50 = vpop.permute.xlu2 %900  ;;  %772 = vst.msk [vmem:[%s1763_s1 + $0x88] sm:$0xf] %vm736_vm1, %v714_v31 }
  0xa1   :  { %v705_v58 = vpack.c.bf16 %v649_v17, %v649_v17  ;;  %v704_v24 = vpack.c.bf16 %v648_v22, %v648_v22  ;;  %v707_v54 = vpack.c.bf16 %v651_v29, %v651_v29  ;;  %v706_v63 = vpack.c.bf16 %v650_v30, %v650_v30  ;;  %v1780_v29 = vld [vmem:[#allocation3_spill] sm:$0xff] }
  0xa2   :  { %773 = vst.msk [vmem:[%s1763_s1 + $0x8c] sm:$0x7] %vm738_vm0, %v715_v21  ;;  %v903_v18 = vunpack.i.h.bf16 %v901_v50  ;;  %v902_v57 = vunpack.i.l.bf16 %v901_v50 }
  0xa3   :  { %763 = vst.msk [vmem:[%s1763_s1 + $0x64] sm:$0x7] %vm738_vm0, %v705_v58 }
  0xa4   :  { %762 = vst.msk [vmem:[%s1763_s1 + $0x60] sm:$0xf] %vm736_vm1, %v704_v24  ;;  %v876_v20 = vpop.permute.xlu0 %875  ;;  %v881_v52 = vpop.permute.xlu1 %880  ;;  %v665_v33 = vmax.f32 %v1444_v56, %v903_v18  ;;  %v664_v36 = vmax.f32 %v1439_v48, %v902_v57  ;;  %v1782_v24 = vld [vmem:[#allocation5_spill] sm:$0xff]  ;;  %v1784_v18 = vld [vmem:[#allocation7_spill] sm:$0xff] }
  0xa5   :  { %765 = vst.msk [vmem:[%s1763_s1 + $0x6c] sm:$0x7] %vm738_vm0, %v707_v54  ;;  %v878_v26 = vunpack.i.h.bf16 %v876_v20  ;;  %v877_v60 = vunpack.i.l.bf16 %v876_v20  ;;  %v883_v28 = vunpack.i.h.bf16 %v881_v52  ;;  %v882_v3 = vunpack.i.l.bf16 %v881_v52 }
  0xa6   :  { %764 = vst.msk [vmem:[%s1763_s1 + $0x68] sm:$0xf] %vm736_vm1, %v706_v63  ;;  %v720_v37 = vpack.c.bf16 %v664_v36, %v664_v36  ;;  %v1783_v63 = vld [vmem:[#allocation4_spill] sm:$0xff] }
  0xa7   :  { %v655_v8 = vmax.f32 %v1201_v40, %v878_v26  ;;  %v654_v42 = vmax.f32 %v1191_v35, %v877_v60  ;;  %v657_v23 = vmax.f32 %v1243_v14, %v883_v28  ;;  %v656_v6 = vmax.f32 %v1235_v7, %v882_v3 }
  0xa8   :  { %v721_v14 = vpack.c.bf16 %v665_v33, %v665_v33  ;;  %v916_v46 = vpop.permute.xlu2 %915  ;;  %778 = vst.msk [vmem:[%s1763_s1 + $0xa0] sm:$0xf] %vm736_vm1, %v720_v37 }
  0xa9   :  { %v711_v40 = vpack.c.bf16 %v655_v8, %v655_v8  ;;  %v710_v43 = vpack.c.bf16 %v654_v42, %v654_v42  ;;  %v713_v35 = vpack.c.bf16 %v657_v23, %v657_v23  ;;  %v712_v34 = vpack.c.bf16 %v656_v6, %v656_v6 }
  0xaa   :  { %779 = vst.msk [vmem:[%s1763_s1 + $0xa4] sm:$0x7] %vm738_vm0, %v721_v14  ;;  %v918_v45 = vunpack.i.h.bf16 %v916_v46  ;;  %v917_v47 = vunpack.i.l.bf16 %v916_v46 }
  0xab   :  { %769 = vst.msk [vmem:[%s1763_s1 + $0x7c] sm:$0x7] %vm738_vm0, %v711_v40  ;;  %v1785_v40 = vld [vmem:[#allocation6_spill] sm:$0xff] }
  0xac   :  { %768 = vst.msk [vmem:[%s1763_s1 + $0x78] sm:$0xf] %vm736_vm1, %v710_v43  ;;  %v891_v7 = vpop.permute.xlu0 %890  ;;  %v896_v1 = vpop.permute.xlu1 %895  ;;  %v671_v2 = vmax.f32 %v1462_v27, %v918_v45  ;;  %v670_v9 = vmax.f32 %v1460_v13, %v917_v47 }
  0xad   :  { %771 = vst.msk [vmem:[%s1763_s1 + $0x84] sm:$0x7] %vm738_vm0, %v713_v35  ;;  %v893_v56 = vunpack.i.h.bf16 %v891_v7  ;;  %v892_v48 = vunpack.i.l.bf16 %v891_v7  ;;  %v898_v55 = vunpack.i.h.bf16 %v896_v1  ;;  %v897_v16 = vunpack.i.l.bf16 %v896_v1 }
  0xae   :  { %770 = vst.msk [vmem:[%s1763_s1 + $0x80] sm:$0xf] %vm736_vm1, %v712_v34  ;;  %v726_v11 = vpack.c.bf16 %v670_v9, %v670_v9  ;;  %v1786_v34 = vld [vmem:[#allocation8_spill] sm:$0xff] }
  0xaf   :  { %v661_v12 = vmax.f32 %v1253_v25, %v893_v56  ;;  %v660_v41 = vmax.f32 %v1248_v19, %v892_v48  ;;  %v663_v51 = vmax.f32 %v1300_v10, %v898_v55  ;;  %v662_v61 = vmax.f32 %v1292_v0, %v897_v16  ;;  %v1787_v55 = vld [vmem:[#allocation9_spill] sm:$0xff] }
  0xb0   :  { %v727_v10 = vpack.c.bf16 %v671_v2, %v671_v2  ;;  %v931_v58 = vpop.permute.xlu2 %930  ;;  %784 = vst.msk [vmem:[%s1763_s1 + $0xb8] sm:$0xf] %vm736_vm1, %v726_v11 }
  0xb1   :  { %v717_v25 = vpack.c.bf16 %v661_v12, %v661_v12  ;;  %v716_v44 = vpack.c.bf16 %v660_v41, %v660_v41  ;;  %v719_v19 = vpack.c.bf16 %v663_v51, %v663_v51  ;;  %v718_v49 = vpack.c.bf16 %v662_v61, %v662_v61 }
  0xb2   :  { %785 = vst.msk [vmem:[%s1763_s1 + $0xbc] sm:$0x7] %vm738_vm0, %v727_v10  ;;  %v933_v32 = vunpack.i.h.bf16 %v931_v58  ;;  %v932_v20 = vunpack.i.l.bf16 %v931_v58 }
  0xb3   :  { %775 = vst.msk [vmem:[%s1763_s1 + $0x94] sm:$0x7] %vm738_vm0, %v717_v25 }
  0xb4   :  { %774 = vst.msk [vmem:[%s1763_s1 + $0x90] sm:$0xf] %vm736_vm1, %v716_v44  ;;  %v906_v0 = vpop.permute.xlu0 %905  ;;  %v911_v17 = vpop.permute.xlu1 %910  ;;  %v677_v52 = vmax.f32 %v1471_v39, %v933_v32  ;;  %v676_v28 = vmax.f32 %v1469_v38, %v932_v20 }
  0xb5   :  { %777 = vst.msk [vmem:[%s1763_s1 + $0x9c] sm:$0x7] %vm738_vm0, %v719_v19  ;;  %v908_v27 = vunpack.i.h.bf16 %v906_v0  ;;  %v907_v13 = vunpack.i.l.bf16 %v906_v0  ;;  %v913_v22 = vunpack.i.h.bf16 %v911_v17  ;;  %v912_v15 = vunpack.i.l.bf16 %v911_v17 }
  0xb6   :  { %776 = vst.msk [vmem:[%s1763_s1 + $0x98] sm:$0xf] %vm736_vm1, %v718_v49  ;;  %v733_v8 = vpack.c.bf16 %v677_v52, %v677_v52  ;;  %v732_v42 = vpack.c.bf16 %v676_v28, %v676_v28 }
  0xb7   :  { %v667_v30 = vmax.f32 %v1780_v29, %v908_v27  ;;  %v666_v5 = vmax.f32 %v1781_v4, %v907_v13  ;;  %v669_v54 = vmax.f32 %v1782_v24, %v913_v22  ;;  %v668_v59 = vmax.f32 %v1783_v63, %v912_v15 }
  0xb8   :  { %791 = vst.msk [vmem:[%s1763_s1 + $0xd4] sm:$0x7] %vm738_vm0, %v733_v8 }
  0xb9   :  { %v723_v21 = vpack.c.bf16 %v667_v30, %v667_v30  ;;  %v722_v31 = vpack.c.bf16 %v666_v5, %v666_v5  ;;  %v725_v26 = vpack.c.bf16 %v669_v54, %v669_v54  ;;  %v724_v60 = vpack.c.bf16 %v668_v59, %v668_v59  ;;  %790 = vst.msk [vmem:[%s1763_s1 + $0xd0] sm:$0xf] %vm736_vm1, %v732_v42 }
  0xbb   :  { %781 = vst.msk [vmem:[%s1763_s1 + $0xac] sm:$0x7] %vm738_vm0, %v723_v21 }
  0xbc   :  { %780 = vst.msk [vmem:[%s1763_s1 + $0xa8] sm:$0xf] %vm736_vm1, %v722_v31  ;;  %v921_v3 = vpop.permute.xlu0 %920  ;;  %v926_v50 = vpop.permute.xlu1 %925 }
  0xbd   :  { %783 = vst.msk [vmem:[%s1763_s1 + $0xb4] sm:$0x7] %vm738_vm0, %v725_v26  ;;  %v923_v39 = vunpack.i.h.bf16 %v921_v3  ;;  %v922_v38 = vunpack.i.l.bf16 %v921_v3  ;;  %v928_v23 = vunpack.i.h.bf16 %v926_v50  ;;  %v927_v6 = vunpack.i.l.bf16 %v926_v50 }
  0xbe   :  { %782 = vst.msk [vmem:[%s1763_s1 + $0xb0] sm:$0xf] %vm736_vm1, %v724_v60 }
  0xbf   :  { %v673_v57 = vmax.f32 %v1784_v18, %v923_v39  ;;  %v672_v43 = vmax.f32 %v1785_v40, %v922_v38  ;;  %v675_v35 = vmax.f32 %v1408_v53, %v928_v23  ;;  %v674_v33 = vmax.f32 %v1786_v34, %v927_v6 }
  0xc1   :  { %v729_v36 = vpack.c.bf16 %v673_v57, %v673_v57  ;;  %v728_v7 = vpack.c.bf16 %v672_v43, %v672_v43  ;;  %v731_v14 = vpack.c.bf16 %v675_v35, %v675_v35  ;;  %v730_v37 = vpack.c.bf16 %v674_v33, %v674_v33 }
  0xc3   :  { %787 = vst.msk [vmem:[%s1763_s1 + $0xc4] sm:$0x7] %vm738_vm0, %v729_v36 }
  0xc4   :  { %786 = vst.msk [vmem:[%s1763_s1 + $0xc0] sm:$0xf] %vm736_vm1, %v728_v7  ;;  %v936_v56 = vpop.permute.xlu0 %935 }
  0xc5   :  { %789 = vst.msk [vmem:[%s1763_s1 + $0xcc] sm:$0x7] %vm738_vm0, %v731_v14  ;;  %v938_v53 = vunpack.i.h.bf16 %v936_v56  ;;  %v937_v48 = vunpack.i.l.bf16 %v936_v56 }
  0xc6   :  { %788 = vst.msk [vmem:[%s1763_s1 + $0xc8] sm:$0xf] %vm736_vm1, %v730_v37 }
  0xc7   :  { %v679_v1 = vmax.f32 %v1428_v62, %v938_v53  ;;  %v678_v16 = vmax.f32 %v1787_v55, %v937_v48 }
  0xc9   :  { %v735_v12 = vpack.c.bf16 %v679_v1, %v679_v1  ;;  %v734_v41 = vpack.c.bf16 %v678_v16, %v678_v16 }
  0xcb   :  { %793 = vst.msk [vmem:[%s1763_s1 + $0xdc] sm:$0x7] %vm738_vm0, %v735_v12 }
  0xcc   :  { %792 = vst.msk [vmem:[%s1763_s1 + $0xd8] sm:$0xf] %vm736_vm1, %v734_v41 }

// kernel: cnn1_forward.8
= control target key start
LH: loop header
LB: loop body
LE: loop exit
PB: predicated region body
PF: predicated region fallthrough
CT: control target
= control target key end

     0   :  { %s201_s17 = smov 96   ;;  %vm138_vm0 = vcmask 256000   ;;  %vm139_vm1 = vsmask.f32 2304  ;;  %s380_s0 = inlined_call_operand.vmem [shape: bf16[10,2,5,64], index: 0, kind: input, shape index: {}]   ;;  %s381_s1 = inlined_call_operand.vmem [shape: bf16[10,5,32], index: 1, kind: output, shape index: {}]  }
   0x1   :  { %v16_v0 = vld [vmem:[%s380_s0 + $0x20] sm:$0x7]  ;;  %v17_v1 = vld [vmem:[%s380_s0 + $0x24] sm:$0x7]  ;;  %v18_v2 = vld [vmem:[%s380_s0 + $0x28] sm:$0x7] }
   0x2   :  { %v19_v3 = vld [vmem:[%s380_s0 + $0x2c] sm:$0x7]  ;;  %v32_v4 = vunpack.c.l.bf16 %v16_v0  ;;  %v33_v5 = vunpack.c.l.bf16 %v18_v2  ;;  %v42_v6 = vunpack.c.l.bf16 %v17_v1  ;;  %v8_v7 = vld [vmem:[%s380_s0] sm:$0x7]  ;;  %v9_v8 = vld [vmem:[%s380_s0 + $0x4] sm:$0x7] }
   0x3   :  { %v43_v9 = vunpack.c.l.bf16 %v19_v3  ;;  %v10_v10 = vld [vmem:[%s380_s0 + $0x8] sm:$0x7]  ;;  %v11_v11 = vld [vmem:[%s380_s0 + $0xc] sm:$0x7]  ;;  %v28_v12 = vunpack.c.l.bf16 %v8_v7  ;;  %v38_v13 = vunpack.c.l.bf16 %v9_v8  ;;  %v20_v14 = vld [vmem:[%s380_s0 + $0x30] sm:$0x7] }
   0x4   :  { %v239_v15 = vmax.f32 %v32_v4, %v42_v6  ;;  %v29_v16 = vunpack.c.l.bf16 %v10_v10  ;;  %v39_v17 = vunpack.c.l.bf16 %v11_v11  ;;  %v21_v18 = vld [vmem:[%s380_s0 + $0x34] sm:$0x7]  ;;  %v22_v19 = vld [vmem:[%s380_s0 + $0x38] sm:$0x7]  ;;  %v23_v20 = vld [vmem:[%s380_s0 + $0x3c] sm:$0x7]  ;;  %v34_v21 = vunpack.c.l.bf16 %v20_v14 }
   0x5   :  { %v53_v22 = vmax.f32 %v33_v5, %v43_v9  ;;  %v250_v23 = vmax.f32 %v28_v12, %v38_v13  ;;  %v35_v24 = vunpack.c.l.bf16 %v22_v19  ;;  %v44_v25 = vunpack.c.l.bf16 %v21_v18  ;;  %v12_v26 = vld [vmem:[%s380_s0 + $0x10] sm:$0x7]  ;;  %v13_v27 = vld [vmem:[%s380_s0 + $0x14] sm:$0x7]  ;;  %v14_v28 = vld [vmem:[%s380_s0 + $0x18] sm:$0x7] }
   0x6   :  { %v49_v29 = vmax.f32 %v29_v16, %v39_v17  ;;  %v45_v30 = vunpack.c.l.bf16 %v23_v20  ;;  %v15_v31 = vld [vmem:[%s380_s0 + $0x1c] sm:$0x7]  ;;  %v30_v32 = vunpack.c.l.bf16 %v12_v26  ;;  %v31_v34 = vunpack.c.l.bf16 %v14_v28  ;;  %v24_v35 = vld [vmem:[%s380_s0 + $0x40] sm:$0x7]  ;;  %v26_v38 = vld [vmem:[%s380_s0 + $0x48] sm:$0x7] }
   0x7   :  { %v264_v33 = vmax.f32 %v34_v21, %v44_v25  ;;  %v40_v37 = vunpack.c.l.bf16 %v13_v27  ;;  %v41_v39 = vunpack.c.l.bf16 %v15_v31  ;;  %v25_v40 = vld [vmem:[%s380_s0 + $0x44] sm:$0x7]  ;;  %v27_v42 = vld [vmem:[%s380_s0 + $0x4c] sm:$0x7]  ;;  %v36_v43 = vunpack.c.l.bf16 %v24_v35  ;;  %v165_v60 = vld [vmem:[%s381_s1 + $0x20] sm:$0x7] }
   0x8   :  { %v269_v36 = vmax.f32 %v35_v24, %v45_v30  ;;  %v186_v44 = vpack.i.bf16 %v53_v22, %v239_v15  ;;  %v37_v46 = vunpack.c.l.bf16 %v26_v38  ;;  %v176_v47 = vpack.i.bf16 %v49_v29, %v250_v23  ;;  %v168_v61 = vld [vmem:[%s381_s1 + $0x24] sm:$0x7]  ;;  %vm296_vm2 = vmand %vm138_vm0, %vm139_vm1  ;;  %v153_v11 = vld [vmem:[%s381_s1 + $0x10] sm:$0x7] }
   0x9   :  { %v277_v41 = vmax.f32 %v30_v32, %v40_v37  ;;  %v283_v45 = vmax.f32 %v31_v34, %v41_v39  ;;  %v46_v48 = vunpack.c.l.bf16 %v25_v40  ;;  %v47_v49 = vunpack.c.l.bf16 %v27_v42  ;;  %v156_v12 = vld [vmem:[%s381_s1 + $0x14] sm:$0x7]  ;;  %v141_v18 = vld [vmem:[%s381_s1] sm:$0x7]  ;;  %v159_v34 = vld [vmem:[%s381_s1 + $0x18] sm:$0x7] }
   0xa   :  { %187 = vrot.lane.b32.xlu1 %v186_v44, %s201_s17  ;;  %177 = vrot.lane.b32.xlu0 %v176_v47, %s201_s17  ;;  %v191_v52 = vpack.i.bf16 %v269_v36, %v264_v33  ;;  %v162_v35 = vld [vmem:[%s381_s1 + $0x1c] sm:$0x7] }
   0xb   :  { %v56_v50 = vmax.f32 %v36_v43, %v46_v48  ;;  %v57_v51 = vmax.f32 %v37_v46, %v47_v49  ;;  %v181_v53 = vpack.i.bf16 %v283_v45, %v277_v41 }
   0xd   :  { %v196_v54 = vpack.i.bf16 %v57_v51, %v56_v50 }
   0xf   :  { %197 = vrot.lane.b32.xlu2 %v196_v54, %s201_s17 }
  0x12   :  { %192 = vrot.lane.b32.xlu1 %v191_v52, %s201_s17  ;;  %182 = vrot.lane.b32.xlu0 %v181_v53, %s201_s17 }
  0x69   :  { %v198_v55 = vpop.permute.xlu2 %197 }
  0x6a   :  { %v200_v56 = vunpack.i.h.bf16 %v198_v55  ;;  %v199_v57 = vunpack.i.l.bf16 %v198_v55 }
  0x6c   :  { %v127_v58 = vmax.f32 %v57_v51, %v200_v56  ;;  %v126_v59 = vmax.f32 %v56_v50, %v199_v57 }
  0x6e   :  { %v137_v62 = vpack.c.bf16 %v127_v58, %v127_v58  ;;  %v136_v63 = vpack.c.bf16 %v126_v59, %v126_v59 }
  0x70   :  { %v169_v1 = vsel %vm296_vm2, %v137_v62, %v168_v61  ;;  %v166_v2 = vsel %vm296_vm2, %v136_v63, %v165_v60 }
  0x71   :  { %170 = vst [vmem:[%s381_s1 + $0x24] sm:$0x7] %v169_v1 }
  0x72   :  { %167 = vst [vmem:[%s381_s1 + $0x20] sm:$0x7] %v166_v2 }
  0x7c   :  { %v188_v3 = vpop.permute.xlu1 %187  ;;  %v178_v6 = vpop.permute.xlu0 %177 }
  0x7d   :  { %v190_v4 = vunpack.i.h.bf16 %v188_v3  ;;  %v189_v5 = vunpack.i.l.bf16 %v188_v3  ;;  %v180_v7 = vunpack.i.h.bf16 %v178_v6  ;;  %v179_v8 = vunpack.i.l.bf16 %v178_v6 }
  0x7f   :  { %v123_v9 = vmax.f32 %v53_v22, %v190_v4  ;;  %v122_v10 = vmax.f32 %v239_v15, %v189_v5  ;;  %v119_v13 = vmax.f32 %v49_v29, %v180_v7  ;;  %v118_v14 = vmax.f32 %v250_v23, %v179_v8  ;;  %v144_v15 = vld [vmem:[%s381_s1 + $0x4] sm:$0x7] }
  0x81   :  { %v133_v16 = vpack.c.bf16 %v123_v9, %v123_v9  ;;  %v132_v17 = vpack.c.bf16 %v122_v10, %v122_v10  ;;  %v129_v19 = vpack.c.bf16 %v119_v13, %v119_v13  ;;  %v128_v20 = vpack.c.bf16 %v118_v14, %v118_v14 }
  0x83   :  { %v157_v21 = vsel %vm296_vm2, %v133_v16, %v156_v12  ;;  %v154_v22 = vsel %vm296_vm2, %v132_v17, %v153_v11  ;;  %v145_v23 = vsel %vm296_vm2, %v129_v19, %v144_v15  ;;  %v142_v24 = vsel %vm296_vm2, %v128_v20, %v141_v18 }
  0x84   :  { %158 = vst [vmem:[%s381_s1 + $0x14] sm:$0x7] %v157_v21  ;;  %v193_v25 = vpop.permute.xlu1 %192  ;;  %v183_v28 = vpop.permute.xlu0 %182 }
  0x85   :  { %155 = vst [vmem:[%s381_s1 + $0x10] sm:$0x7] %v154_v22  ;;  %v195_v26 = vunpack.i.h.bf16 %v193_v25  ;;  %v194_v27 = vunpack.i.l.bf16 %v193_v25  ;;  %v185_v29 = vunpack.i.h.bf16 %v183_v28  ;;  %v184_v30 = vunpack.i.l.bf16 %v183_v28 }
  0x86   :  { %146 = vst [vmem:[%s381_s1 + $0x4] sm:$0x7] %v145_v23 }
  0x87   :  { %143 = vst [vmem:[%s381_s1] sm:$0x7] %v142_v24  ;;  %v125_v31 = vmax.f32 %v269_v36, %v195_v26  ;;  %v124_v32 = vmax.f32 %v264_v33, %v194_v27  ;;  %v121_v37 = vmax.f32 %v283_v45, %v185_v29  ;;  %v120_v38 = vmax.f32 %v277_v41, %v184_v30  ;;  %v147_v36 = vld [vmem:[%s381_s1 + $0x8] sm:$0x7]  ;;  %v150_v33 = vld [vmem:[%s381_s1 + $0xc] sm:$0x7] }
  0x89   :  { %v135_v39 = vpack.c.bf16 %v125_v31, %v125_v31  ;;  %v134_v40 = vpack.c.bf16 %v124_v32, %v124_v32  ;;  %v131_v42 = vpack.c.bf16 %v121_v37, %v121_v37  ;;  %v130_v43 = vpack.c.bf16 %v120_v38, %v120_v38 }
  0x8b   :  { %v163_v44 = vsel %vm296_vm2, %v135_v39, %v162_v35  ;;  %v160_v45 = vsel %vm296_vm2, %v134_v40, %v159_v34  ;;  %v151_v41 = vsel %vm296_vm2, %v131_v42, %v150_v33  ;;  %v148_v46 = vsel %vm296_vm2, %v130_v43, %v147_v36 }
  0x8c   :  { %164 = vst [vmem:[%s381_s1 + $0x1c] sm:$0x7] %v163_v44 }
  0x8d   :  { %161 = vst [vmem:[%s381_s1 + $0x18] sm:$0x7] %v160_v45 }
  0x8e   :  { %152 = vst [vmem:[%s381_s1 + $0xc] sm:$0x7] %v151_v41 }
  0x8f   :  { %149 = vst [vmem:[%s381_s1 + $0x8] sm:$0x7] %v148_v46 }

// kernel: cnn1_forward.7
= control target key start
LH: loop header
LB: loop body
LE: loop exit
PB: predicated region body
PF: predicated region fallthrough
CT: control target
= control target key end

     0   :  { %vm963_vm0 = vcmask 261120   ;;  %vm1564_vm1 = vcmask 257024   ;;  %s3308_s1 = inlined_call_operand.vmem [shape: bf16[800,32], index: 1, kind: input, shape index: {}]   ;;  %s3309_s2 = inlined_call_operand.vmem [shape: f32[1,32], index: 2, kind: input, shape index: {}]   ;;  %s3310_s0 = inlined_call_operand.vmem [shape: bf16[200,800], index: 0, kind: input, shape index: {}]   ;;  %s3311_s3 = inlined_call_operand.vmem [shape: bf16[200,32], index: 3, kind: output, shape index: {}]  }
   0x1   :  { %v2234_v0 = vld [vmem:[%s3308_s1 + $0x38] sm:$0xff]  ;;  %v2233_v3 = vld [vmem:[%s3308_s1 + $0x30] sm:$0xff]  ;;  %v2232_v6 = vld [vmem:[%s3308_s1 + $0x28] sm:$0xff] }
   0x2   :  { %v2328_v1 = vld [vmem:[%s3308_s1 + $0x78] sm:$0xff]  ;;  %1003 = vmatpush.bf16.msra.mxu0 %v2234_v0  ;;  %2277 = vmatpush.bf16.msra.mxu3 %v2234_v0  ;;  %v2343_v4 = vld [vmem:[%s3308_s1 + $0x70] sm:$0xff]  ;;  %v2358_v7 = vld [vmem:[%s3308_s1 + $0x68] sm:$0xff] }
   0x3   :  { %v2333_v2 = vld [vmem:[%s3308_s1 + $0xb8] sm:$0xff]  ;;  %1076 = vmatpush.bf16.msra.mxu1 %v2328_v1  ;;  %v2348_v5 = vld [vmem:[%s3308_s1 + $0xb0] sm:$0xff]  ;;  %v2363_v8 = vld [vmem:[%s3308_s1 + $0xa8] sm:$0xff] }
   0x4   :  { %1149 = vmatpush.bf16.msra.mxu2 %v2333_v2  ;;  %v2231_v9 = vld [vmem:[%s3308_s1 + $0x20] sm:$0xff]  ;;  %v2230_v12 = vld [vmem:[%s3308_s1 + $0x18] sm:$0xff]  ;;  %v2229_v15 = vld [vmem:[%s3308_s1 + $0x10] sm:$0xff] }
   0x5   :  { %v2373_v10 = vld [vmem:[%s3308_s1 + $0x60] sm:$0xff]  ;;  %v2388_v13 = vld [vmem:[%s3308_s1 + $0x58] sm:$0xff]  ;;  %v2403_v16 = vld [vmem:[%s3308_s1 + $0x50] sm:$0xff] }
   0x6   :  { %1004 = vmatpush.bf16.msra.mxu0 %v2233_v3  ;;  %2278 = vmatpush.bf16.msra.mxu3 %v2233_v3  ;;  %v2378_v11 = vld [vmem:[%s3308_s1 + $0xa0] sm:$0xff]  ;;  %v2393_v14 = vld [vmem:[%s3308_s1 + $0x98] sm:$0xff]  ;;  %v2408_v17 = vld [vmem:[%s3308_s1 + $0x90] sm:$0xff] }
   0x7   :  { %1077 = vmatpush.bf16.msra.mxu1 %v2343_v4  ;;  %v2228_v18 = vld [vmem:[%s3308_s1 + $0x8] sm:$0xff]  ;;  %v2227_v21 = vld [vmem:[%s3308_s1] sm:$0xff]  ;;  %v2146_v25 = vld [vmem:[%s3310_s0 + $0x18] sm:$0xf0] }
   0x8   :  { %1150 = vmatpush.bf16.msra.mxu2 %v2348_v5  ;;  %v2418_v19 = vld [vmem:[%s3308_s1 + $0x48] sm:$0xff]  ;;  %v2431_v22 = vld [vmem:[%s3308_s1 + $0x40] sm:$0xff]  ;;  %v1876_v26 = vld [vmem:[%s3310_s0 + $0x230] sm:$0xf] }
   0x9   :  { %v2423_v20 = vld [vmem:[%s3308_s1 + $0x88] sm:$0xff]  ;;  %v2436_v23 = vld [vmem:[%s3308_s1 + $0x80] sm:$0xff]  ;;  %v2266_v33 = vld [vmem:[%s3308_s1 + $0x138] sm:$0xff] }
   0xa   :  { %1005 = vmatpush.bf16.msra.mxu0 %v2232_v6  ;;  %2279 = vmatpush.bf16.msra.mxu3 %v2232_v6  ;;  %v1596_v24 = vld [vmem:[%s3310_s0] sm:$0xf]  ;;  %v2216_v27 = vld [vmem:[%s3310_s0 + $0x248] sm:$0xf0]  ;;  %v2143_v28 = vld [vmem:[%s3310_s0 + $0x4] sm:$0xf] }
   0xb   :  { %1078 = vmatpush.bf16.msra.mxu1 %v2358_v7  ;;  %v1598_v29 = vld [vmem:[%s3310_s0 + $0x1c] sm:$0xf0]  ;;  %v1604_v30 = vld [vmem:[%s3310_s0 + $0x8] sm:$0xf]  ;;  %v2147_v31 = vld [vmem:[%s3310_s0 + $0x20] sm:$0xf0]  ;;  %v1597_v34 = vor.u32 %v2146_v25, %v1596_v24  ;;  %v1877_v35 = vor.u32 %v2216_v27, %v1876_v26 }
   0xc   :  { %1151 = vmatpush.bf16.msra.mxu2 %v2363_v8  ;;  %v2276_v32 = vld [vmem:[%s3308_s1 + $0x188] sm:$0xff]  ;;  %v1601_v36 = vor.u32 %v2143_v28, %v1598_v29  ;;  %v1605_v37 = vor.u32 %v2147_v31, %v1604_v30  ;;  %v2274_v38 = vld [vmem:[%s3308_s1 + $0x178] sm:$0xff]  ;;  %v2265_v39 = vld [vmem:[%s3308_s1 + $0x130] sm:$0xff] }
   0xd   :  { %v2273_v40 = vld [vmem:[%s3308_s1 + $0x170] sm:$0xff]  ;;  %v2264_v41 = vld [vmem:[%s3308_s1 + $0x128] sm:$0xff]  ;;  %v1624_v43 = vld [vmem:[%s3310_s0 + $0x38] sm:$0xf] }
   0xe   :  { %1006 = vmatpush.bf16.msra.mxu0 %v2231_v9  ;;  %2280 = vmatpush.bf16.msra.mxu3 %v2231_v9  ;;  %v2272_v42 = vld [vmem:[%s3308_s1 + $0x168] sm:$0xff]  ;;  %v2153_v44 = vld [vmem:[%s3310_s0 + $0x50] sm:$0xf0]  ;;  %v2223_v46 = vld [vmem:[%s3310_s0 + $0x280] sm:$0xf0] }
   0xf   :  { %1079 = vmatpush.bf16.msra.mxu1 %v2373_v10  ;;  %v1904_v45 = vld [vmem:[%s3310_s0 + $0x268] sm:$0xf]  ;;  %v2150_v47 = vld [vmem:[%s3310_s0 + $0x3c] sm:$0xf]  ;;  %v1626_v48 = vld [vmem:[%s3310_s0 + $0x54] sm:$0xf0]  ;;  %v1625_v51 = vor.u32 %v2153_v44, %v1624_v43 }
  0x10   :  { %1152 = vmatpush.bf16.msra.mxu2 %v2378_v11  ;;  %v1632_v49 = vld [vmem:[%s3310_s0 + $0x40] sm:$0xf]  ;;  %v2154_v50 = vld [vmem:[%s3310_s0 + $0x58] sm:$0xf0]  ;;  %v1905_v52 = vor.u32 %v2223_v46, %v1904_v45  ;;  %v1629_v53 = vor.u32 %v2150_v47, %v1626_v48  ;;  %v1652_v58 = vld [vmem:[%s3310_s0 + $0x70] sm:$0xf] }
  0x11   :  { %v1633_v54 = vor.u32 %v2154_v50, %v1632_v49  ;;  %v2263_v55 = vld [vmem:[%s3308_s1 + $0x120] sm:$0xff]  ;;  %v2160_v59 = vld [vmem:[%s3310_s0 + $0x88] sm:$0xf0]  ;;  %v2157_v60 = vld [vmem:[%s3310_s0 + $0x74] sm:$0xf] }
  0x12   :  { %1007 = vmatpush.bf16.msra.mxu0 %v2230_v12  ;;  %2281 = vmatpush.bf16.msra.mxu3 %v2230_v12  ;;  %v2522_v56 = vld [vmem:[%s3310_s0 + $0x2a0] sm:$0xff]  ;;  %v1654_v61 = vld [vmem:[%s3310_s0 + $0x8c] sm:$0xf0]  ;;  %v1660_v62 = vld [vmem:[%s3310_s0 + $0x78] sm:$0xf]  ;;  %v1653_v0 = vor.u32 %v2160_v59, %v1652_v58 }
  0x13   :  { %1080 = vmatpush.bf16.msra.mxu1 %v2388_v13  ;;  %v487_v57 = vunpack.c.l.b16 %v2522_v56  ;;  %v2161_v63 = vld [vmem:[%s3310_s0 + $0x90] sm:$0xf0]  ;;  %v1657_v3 = vor.u32 %v2157_v60, %v1654_v61  ;;  %v2271_v6 = vld [vmem:[%s3308_s1 + $0x160] sm:$0xff]  ;;  %v2164_v9 = vld [vmem:[%s3310_s0 + $0xac] sm:$0xf] }
  0x14   :  { %1153 = vmatpush.bf16.msra.mxu2 %v2393_v14  ;;  %v1688_v12 = vld [vmem:[%s3310_s0 + $0xb0] sm:$0xf]  ;;  %v2174_v24 = vld [vmem:[%s3310_s0 + $0xf8] sm:$0xf0]  ;;  %v2171_v25 = vld [vmem:[%s3310_s0 + $0xe4] sm:$0xf] }
  0x15   :  { %v2220_v26 = vld [vmem:[%s3310_s0 + $0x26c] sm:$0xf]  ;;  %v1710_v27 = vld [vmem:[%s3310_s0 + $0xfc] sm:$0xf0]  ;;  %v2175_v28 = vld [vmem:[%s3310_s0 + $0x100] sm:$0xf0] }
  0x16   :  { %1008 = vmatpush.bf16.msra.mxu0 %v2229_v15  ;;  %2282 = vmatpush.bf16.msra.mxu3 %v2229_v15  ;;  %v1713_v31 = vor.u32 %v2171_v25, %v1710_v27  ;;  %v2257_v46 = vld [vmem:[%s3308_s1 + $0xf0] sm:$0xff]  ;;  %v2260_v47 = vld [vmem:[%s3308_s1 + $0x108] sm:$0xff]  ;;  %v2255_v59 = vld [vmem:[%s3308_s1 + $0xe0] sm:$0xff] }
  0x17   :  { %1081 = vmatpush.bf16.msra.mxu1 %v2403_v16  ;;  %v2256_v48 = vld [vmem:[%s3308_s1 + $0xe8] sm:$0xff]  ;;  %v1764_v49 = vld [vmem:[%s3310_s0 + $0x150] sm:$0xf]  ;;  %v2199_v25 = vld [vmem:[%s3310_s0 + $0x1c4] sm:$0xf] }
  0x18   :  { %1154 = vmatpush.bf16.msra.mxu2 %v2408_v17  ;;  %v2188_v50 = vld [vmem:[%s3310_s0 + $0x168] sm:$0xf0]  ;;  %v2203_v27 = vld [vmem:[%s3310_s0 + $0x1e0] sm:$0xf0] }
  0x1a   :  { %1009 = vmatpush.bf16.msra.mxu0 %v2228_v18  ;;  %2283 = vmatpush.bf16.msra.mxu3 %v2228_v18 }
  0x1b   :  { %1082 = vmatpush.bf16.msra.mxu1 %v2418_v19 }
  0x1c   :  { %1155 = vmatpush.bf16.msra.mxu2 %v2423_v20 }
  0x1e   :  { %1010 = vmatpush.bf16.msra.mxu0 %v2227_v21  ;;  %2284 = vmatpush.bf16.msra.mxu3 %v2227_v21  ;;  %v2275_v21 = vld [vmem:[%s3308_s1 + $0x180] sm:$0xff] }
  0x1f   :  { %1083 = vmatpush.bf16.msra.mxu1 %v2431_v22 }
  0x20   :  { %1156 = vmatpush.bf16.msra.mxu2 %v2436_v23 }
  0x21   :  { %1011 = vmatmul.bf16.vlgmr.msra.gmra.mxu0 %v1597_v34  ;;  %1061 = vmatmul.bf16.vlgmr.msra.gmra.mxu3 %v1877_v35  ;;  %v2269_v34 = vld [vmem:[%s3308_s1 + $0x150] sm:$0xff]  ;;  %v2258_v35 = vld [vmem:[%s3308_s1 + $0xf8] sm:$0xff] }
  0x22   :  { %1295 = vmatpush.bf16.msrb.mxu0 %v2266_v33  ;;  %1084 = vmatmul.bf16.vlgmr.msra.gmra.mxu1 %v1601_v36  ;;  %v2261_v33 = vld [vmem:[%s3308_s1 + $0x110] sm:$0xff]  ;;  %v1736_v36 = vld [vmem:[%s3310_s0 + $0x118] sm:$0xf] }
  0x23   :  { %1157 = vmatmul.bf16.vlgmr.msra.gmra.mxu2 %v1605_v37  ;;  %1368 = vmatpush.bf16.msrb.mxu1 %v2274_v38  ;;  %v2181_v37 = vld [vmem:[%s3310_s0 + $0x130] sm:$0xf0]  ;;  %v2178_v38 = vld [vmem:[%s3310_s0 + $0x11c] sm:$0xf] }
  0x24   :  { %1447 = vmatpush.bf16.msrb.mxu2 %v2276_v32  ;;  %2285 = vmatpush.bf16.msrb.mxu3 %v2328_v1  ;;  %v578_v1 = vpack.c.b16 %v487_v57, %v487_v57  ;;  %v1765_v57 = vor.u32 %v2188_v50, %v1764_v49 }
  0x26   :  { %1296 = vmatpush.bf16.msrb.mxu0 %v2265_v39  ;;  %v1738_v39 = vld [vmem:[%s3310_s0 + $0x134] sm:$0xf0] }
  0x27   :  { %1369 = vmatpush.bf16.msrb.mxu1 %v2273_v40  ;;  %v1744_v40 = vld [vmem:[%s3310_s0 + $0x120] sm:$0xf]  ;;  %v1741_v44 = vor.u32 %v2178_v38, %v1738_v39 }
  0x28   :  { %2286 = vmatpush.bf16.msrb.mxu3 %v2343_v4  ;;  %v1661_v4 = vor.u32 %v2161_v63, %v1660_v62  ;;  %1448 = vmatpush.bf16.msrb.mxu2 %v2275_v21  ;;  %v2268_v62 = vld [vmem:[%s3308_s1 + $0x148] sm:$0xff]  ;;  %v2254_v63 = vld [vmem:[%s3308_s1 + $0xd8] sm:$0xff] }
  0x29   :  { %v2726_v21 = vld [vmem:[%s3310_s0 + $0x2a8] sm:$0xff] }
  0x2a   :  { %1297 = vmatpush.bf16.msrb.mxu0 %v2264_v41  ;;  %v2182_v41 = vld [vmem:[%s3310_s0 + $0x138] sm:$0xf0] }
  0x2b   :  { %1370 = vmatpush.bf16.msrb.mxu1 %v2272_v42  ;;  %v1737_v42 = vor.u32 %v2181_v37, %v1736_v36  ;;  %v1745_v45 = vor.u32 %v2182_v41, %v1744_v40  ;;  %v1848_v41 = vld [vmem:[%s3310_s0 + $0x1f8] sm:$0xf] }
  0x2c   :  { %2287 = vmatpush.bf16.msrb.mxu3 %v2358_v7  ;;  %v1680_v7 = vld [vmem:[%s3310_s0 + $0xa8] sm:$0xf] }
  0x2e   :  { %1298 = vmatpush.bf16.msrb.mxu0 %v2263_v55  ;;  %v1772_v55 = vld [vmem:[%s3310_s0 + $0x158] sm:$0xf] }
  0x2f   :  { %1371 = vmatpush.bf16.msrb.mxu1 %v2271_v6  ;;  %v2192_v6 = vld [vmem:[%s3310_s0 + $0x18c] sm:$0xf] }
  0x30   :  { %2288 = vmatpush.bf16.msrb.mxu3 %v2373_v10  ;;  %v2213_v10 = vld [vmem:[%s3310_s0 + $0x234] sm:$0xf] }
  0x31   :  { %1016 = vmatmul.bf16.gmra.mxu0 %v1625_v51  ;;  %1066 = vmatmul.bf16.gmra.mxu3 %v1905_v52  ;;  %v2185_v51 = vld [vmem:[%s3310_s0 + $0x154] sm:$0xf]  ;;  %v1884_v52 = vld [vmem:[%s3310_s0 + $0x238] sm:$0xf] }
  0x32   :  { %1089 = vmatmul.bf16.gmra.mxu1 %v1629_v53  ;;  %v2217_v53 = vld [vmem:[%s3310_s0 + $0x250] sm:$0xf0] }
  0x33   :  { %1162 = vmatmul.bf16.gmra.mxu2 %v1633_v54  ;;  %v1766_v54 = vld [vmem:[%s3310_s0 + $0x16c] sm:$0xf0]  ;;  %v1885_v58 = vor.u32 %v2217_v53, %v1884_v52 }
  0x34   :  { %2289 = vmatpush.bf16.msrb.mxu3 %v2388_v13  ;;  %v2168_v13 = vld [vmem:[%s3310_s0 + $0xc8] sm:$0xf0]  ;;  %v1769_v60 = vor.u32 %v2185_v51, %v1766_v54 }
  0x38   :  { %2290 = vmatpush.bf16.msrb.mxu3 %v2403_v16 }
  0x3c   :  { %2291 = vmatpush.bf16.msrb.mxu3 %v2418_v19  ;;  %v1689_v19 = vor.u32 %v2168_v13, %v1688_v12  ;;  %v2251_v13 = vld [vmem:[%s3308_s1 + $0xc0] sm:$0xff] }
  0x40   :  { %2292 = vmatpush.bf16.msrb.mxu3 %v2431_v22  ;;  %v2262_v22 = vld [vmem:[%s3308_s1 + $0x118] sm:$0xff] }
  0x41   :  { %1021 = vmatmul.bf16.gmra.mxu0 %v1653_v0  ;;  %1071 = vmatmul.bf16.gmra.mxu3 %v578_v1  ;;  %v2253_v0 = vld [vmem:[%s3308_s1 + $0xd0] sm:$0xff]  ;;  %v1792_v1 = vld [vmem:[%s3310_s0 + $0x188] sm:$0xf] }
  0x42   :  { %1094 = vmatmul.bf16.gmra.mxu1 %v1657_v3  ;;  %1299 = vmatpush.bf16.msrb.mxu0 %v2262_v22  ;;  %v2195_v3 = vld [vmem:[%s3310_s0 + $0x1a0] sm:$0xf0]  ;;  %v2731_v22 = vld [vmem:[%s3309_s2] ss:$0 sm:$0xff] }
  0x43   :  { %1167 = vmatmul.bf16.gmra.mxu2 %v1661_v4  ;;  %v2252_v4 = vld [vmem:[%s3308_s1 + $0xc8] sm:$0xff] }
  0x44   :  { %2293 = vmatpush.bf16.msra.mxu3 %v2333_v2  ;;  %v2167_v2 = vld [vmem:[%s3310_s0 + $0xc0] sm:$0xf0] }
  0x45   :  { %v1681_v15 = vor.u32 %v2167_v2, %v1680_v7  ;;  %v1912_v7 = vld [vmem:[%s3310_s0 + $0x270] sm:$0xf]  ;;  %v2224_v2 = vld [vmem:[%s3310_s0 + $0x288] sm:$0xf0] }
  0x46   :  { %1300 = vmatpush.bf16.msrb.mxu0 %v2261_v33  ;;  %v1913_v12 = vor.u32 %v2224_v2, %v1912_v7  ;;  %v1612_v7 = vld [vmem:[%s3310_s0 + $0x10] sm:$0xf]  ;;  %v2148_v2 = vld [vmem:[%s3310_s0 + $0x28] sm:$0xf0] }
  0x48   :  { %2294 = vmatpush.bf16.msra.mxu3 %v2348_v5  ;;  %v1878_v5 = vld [vmem:[%s3310_s0 + $0x24c] sm:$0xf0] }
  0x49   :  { %v1881_v16 = vor.u32 %v2213_v10, %v1878_v5  ;;  %v1800_v10 = vld [vmem:[%s3310_s0 + $0x190] sm:$0xf]  ;;  %v2196_v5 = vld [vmem:[%s3310_s0 + $0x1a8] sm:$0xf0] }
  0x4a   :  { %1301 = vmatpush.bf16.msrb.mxu0 %v2260_v47  ;;  %v1856_v47 = vld [vmem:[%s3310_s0 + $0x200] sm:$0xf] }
  0x4c   :  { %2295 = vmatpush.bf16.msra.mxu3 %v2363_v8  ;;  %v1682_v8 = vld [vmem:[%s3310_s0 + $0xc4] sm:$0xf0] }
  0x4d   :  { %v1685_v18 = vor.u32 %v2164_v9, %v1682_v8  ;;  %v1794_v9 = vld [vmem:[%s3310_s0 + $0x1a4] sm:$0xf0]  ;;  %v1793_v8 = vor.u32 %v2195_v3, %v1792_v1 }
  0x50   :  { %2296 = vmatpush.bf16.msra.mxu3 %v2378_v11  ;;  %v2270_v11 = vld [vmem:[%s3308_s1 + $0x158] sm:$0xff] }
  0x51   :  { %1026 = vmatmul.bf16.gmra.mxu0 %v1681_v15  ;;  %1134 = vmatmul.bf16.vlgmr.msrb.gmra.mxu3 %v1881_v16  ;;  %v1797_v15 = vor.u32 %v2192_v6, %v1794_v9  ;;  %v1801_v16 = vor.u32 %v2196_v5, %v1800_v10  ;;  %v1634_v6 = vld [vmem:[%s3310_s0 + $0x5c] sm:$0xf0]  ;;  %v2145_v9 = vld [vmem:[%s3310_s0 + $0x14] sm:$0xf]  ;;  %v1614_v10 = vld [vmem:[%s3310_s0 + $0x2c] sm:$0xf0] }
  0x52   :  { %1099 = vmatmul.bf16.gmra.mxu1 %v1685_v18  ;;  %v2259_v18 = vld [vmem:[%s3308_s1 + $0x100] sm:$0xff]  ;;  %v1620_v5 = vld [vmem:[%s3310_s0 + $0x18] sm:$0xf] }
  0x53   :  { %1172 = vmatmul.bf16.gmra.mxu2 %v1689_v19  ;;  %1372 = vmatpush.bf16.msrb.mxu1 %v2270_v11  ;;  %v2267_v19 = vld [vmem:[%s3308_s1 + $0x140] sm:$0xff]  ;;  %v489_v11 = vunpack.c.l.b16 %v2726_v21 }
  0x54   :  { %2297 = vmatpush.bf16.msra.mxu3 %v2393_v14  ;;  %v1708_v14 = vld [vmem:[%s3310_s0 + $0xe0] sm:$0xf]  ;;  %1302 = vmatpush.bf16.msrb.mxu0 %v2259_v18 }
  0x55   :  { %v1709_v29 = vor.u32 %v2174_v24, %v1708_v14  ;;  %v1820_v14 = vld [vmem:[%s3310_s0 + $0x1c0] sm:$0xf]  ;;  %v2202_v24 = vld [vmem:[%s3310_s0 + $0x1d8] sm:$0xf0] }
  0x57   :  { %1373 = vmatpush.bf16.msrb.mxu1 %v2269_v34 }
  0x58   :  { %2298 = vmatpush.bf16.msra.mxu3 %v2408_v17  ;;  %v1906_v17 = vld [vmem:[%s3310_s0 + $0x284] sm:$0xf0] }
  0x59   :  { %v1909_v30 = vor.u32 %v2220_v26, %v1906_v17  ;;  %v1822_v26 = vld [vmem:[%s3310_s0 + $0x1dc] sm:$0xf0]  ;;  %v1828_v17 = vld [vmem:[%s3310_s0 + $0x1c8] sm:$0xf] }
  0x5b   :  { %1374 = vmatpush.bf16.msrb.mxu1 %v2268_v62 }
  0x5c   :  { %2299 = vmatpush.bf16.msra.mxu3 %v2423_v20  ;;  %v1716_v20 = vld [vmem:[%s3310_s0 + $0xe8] sm:$0xf] }
  0x5d   :  { %v1717_v32 = vor.u32 %v2175_v28, %v1716_v20  ;;  %v1821_v20 = vor.u32 %v2202_v24, %v1820_v14  ;;  %v580_v28 = vpack.c.b16 %v489_v11, %v489_v11  ;;  %v1617_v11 = vor.u32 %v2145_v9, %v1614_v10  ;;  %v1676_v9 = vld [vmem:[%s3310_s0 + $0x88] sm:$0xf]  ;;  %v2163_v10 = vld [vmem:[%s3310_s0 + $0xa0] sm:$0xf0] }
  0x5f   :  { %1375 = vmatpush.bf16.msrb.mxu1 %v2267_v19 }
  0x60   :  { %2300 = vmatpush.bf16.msra.mxu3 %v2436_v23  ;;  %v488_v23 = vunpack.c.h.b16 %v2522_v56  ;;  %v2189_v56 = vld [vmem:[%s3310_s0 + $0x170] sm:$0xf0] }
  0x61   :  { %1031 = vmatmul.bf16.gmra.mxu0 %v1709_v29  ;;  %1139 = vmatmul.bf16.gmra.mxu3 %v1909_v30  ;;  %v1773_v61 = vor.u32 %v2189_v56, %v1772_v55  ;;  %v1825_v30 = vor.u32 %v2199_v25, %v1822_v26 }
  0x62   :  { %1104 = vmatmul.bf16.gmra.mxu1 %v1713_v31  ;;  %v579_v43 = vpack.c.b16 %v488_v23, %v488_v23  ;;  %v1829_v31 = vor.u32 %v2203_v27, %v1828_v17 }
  0x63   :  { %1177 = vmatmul.bf16.gmra.mxu2 %v1717_v32 }
  0x64   :  { %1222 = vmatpush.bf16.msrb.mxu3 %v2258_v35 }
  0x68   :  { %1223 = vmatpush.bf16.msrb.mxu3 %v2257_v46  ;;  %v1850_v46 = vld [vmem:[%s3310_s0 + $0x214] sm:$0xf0] }
  0x6c   :  { %1224 = vmatpush.bf16.msrb.mxu3 %v2256_v48  ;;  %v2210_v48 = vld [vmem:[%s3310_s0 + $0x218] sm:$0xf0] }
  0x6d   :  { %v1857_v56 = vor.u32 %v2210_v48, %v1856_v47 }
  0x70   :  { %1225 = vmatpush.bf16.msrb.mxu3 %v2255_v59 }
  0x71   :  { %1036 = vmatmul.bf16.gmra.mxu0 %v1737_v42  ;;  %1144 = vmatmul.bf16.gmra.mxu3 %v579_v43  ;;  %v2209_v42 = vld [vmem:[%s3310_s0 + $0x210] sm:$0xf0]  ;;  %v2206_v43 = vld [vmem:[%s3310_s0 + $0x1fc] sm:$0xf] }
  0x72   :  { %1109 = vmatmul.bf16.gmra.mxu1 %v1741_v44  ;;  %v2144_v44 = vld [vmem:[%s3310_s0 + $0xc] sm:$0xf]  ;;  %v1849_v51 = vor.u32 %v2209_v42, %v1848_v41  ;;  %v1853_v55 = vor.u32 %v2206_v43, %v1850_v46 }
  0x73   :  { %1182 = vmatmul.bf16.gmra.mxu2 %v1745_v45  ;;  %v1606_v45 = vld [vmem:[%s3310_s0 + $0x24] sm:$0xf0] }
  0x74   :  { %1226 = vmatpush.bf16.msrb.mxu3 %v2254_v63  ;;  %v1609_v52 = vor.u32 %v2144_v44, %v1606_v45 }
  0x78   :  { %1227 = vmatpush.bf16.msrb.mxu3 %v2253_v0 }
  0x7c   :  { %1228 = vmatpush.bf16.msrb.mxu3 %v2252_v4  ;;  %v2151_v4 = vld [vmem:[%s3310_s0 + $0x44] sm:$0xf] }
  0x80   :  { %1229 = vmatpush.bf16.msrb.mxu3 %v2251_v13 }
  0x81   :  { %1041 = vmatmul.bf16.gmra.mxu0 %v1765_v57  ;;  %1207 = vmatmul.bf16.vlgmr.msra.gmra.mxu3 %v1885_v58 }
  0x82   :  { %1114 = vmatmul.bf16.gmra.mxu1 %v1769_v60 }
  0x83   :  { %1187 = vmatmul.bf16.gmra.mxu2 %v1773_v61 }
  0x91   :  { %1046 = vmatmul.bf16.gmra.mxu0 %v1793_v8  ;;  %1212 = vmatmul.bf16.gmra.mxu3 %v1913_v12  ;;  %v2149_v8 = vld [vmem:[%s3310_s0 + $0x30] sm:$0xf0] }
  0x92   :  { %1119 = vmatmul.bf16.gmra.mxu1 %v1797_v15  ;;  %v1637_v15 = vor.u32 %v2151_v4, %v1634_v6  ;;  %v1621_v14 = vor.u32 %v2149_v8, %v1620_v5  ;;  %v2162_v4 = vld [vmem:[%s3310_s0 + $0x98] sm:$0xf0]  ;;  %v2159_v6 = vld [vmem:[%s3310_s0 + $0x84] sm:$0xf] }
  0x93   :  { %1192 = vmatmul.bf16.gmra.mxu2 %v1801_v16  ;;  %v1613_v16 = vor.u32 %v2148_v2, %v1612_v7  ;;  %v1670_v2 = vld [vmem:[%s3310_s0 + $0x9c] sm:$0xf0] }
  0x9e   :  { %v1012_v29 = vpop.f32.mrf.mxu0 }
  0x9f   :  { %v1013_v32 = vadd.f32 %v2731_v22, %v1012_v29  ;;  %v1085_v33 = vpop.f32.mrf.mxu1 }
  0xa1   :  { %v1086_v34 = vadd.f32 %v1085_v33, %v1013_v32  ;;  %1051 = vmatmul.bf16.gmra.mxu0 %v1821_v20  ;;  %1217 = vmatmul.bf16.gmra.mxu3 %v580_v28  ;;  %v2158_v32 = vld [vmem:[%s3310_s0 + $0x7c] sm:$0xf]  ;;  %v1662_v33 = vld [vmem:[%s3310_s0 + $0x94] sm:$0xf0] }
  0xa2   :  { %1124 = vmatmul.bf16.gmra.mxu1 %v1825_v30  ;;  %v1665_v43 = vor.u32 %v2158_v32, %v1662_v33 }
  0xa3   :  { %1197 = vmatmul.bf16.gmra.mxu2 %v1829_v31 }
  0xa4   :  { %v2753_v35 = vpop.f32.mrf.mxu3 }
  0xa6   :  { %v1158_v23 = vpop.f32.mrf.mxu2  ;;  %v1014_v37 = vpop.f32.mrf.mxu0 }
  0xa7   :  { %v2755_v36 = vadd.f32 %v1158_v23, %v1086_v34  ;;  %v1015_v38 = vadd.f32 %v2731_v22, %v1014_v37  ;;  %v1087_v39 = vpop.f32.mrf.mxu1  ;;  %v1640_v34 = vld [vmem:[%s3310_s0 + $0x48] sm:$0xf]  ;;  %v2155_v23 = vld [vmem:[%s3310_s0 + $0x60] sm:$0xf0]  ;;  %v2152_v37 = vld [vmem:[%s3310_s0 + $0x4c] sm:$0xf] }
  0xa8   :  { %v1641_v44 = vor.u32 %v2155_v23, %v1640_v34 }
  0xa9   :  { %v1088_v40 = vadd.f32 %v1087_v39, %v1015_v38  ;;  %v1642_v38 = vld [vmem:[%s3310_s0 + $0x64] sm:$0xf0]  ;;  %v1648_v39 = vld [vmem:[%s3310_s0 + $0x50] sm:$0xf] }
  0xaa   :  { %v1645_v47 = vor.u32 %v2152_v37, %v1642_v38  ;;  %v2172_v37 = vld [vmem:[%s3310_s0 + $0xec] sm:$0xf]  ;;  %v1718_v38 = vld [vmem:[%s3310_s0 + $0x104] sm:$0xf0] }
  0xac   :  { %v2782_v49 = vpop.f32.mrf.mxu3 }
  0xad   :  { %v1065_v7 = vadd.f32 %v2731_v22, %v2782_v49 }
  0xae   :  { %v1160_v50 = vpop.f32.mrf.mxu2  ;;  %v1017_v54 = vpop.f32.mrf.mxu0 }
  0xaf   :  { %v2784_v53 = vadd.f32 %v1160_v50, %v1088_v40  ;;  %v1018_v57 = vadd.f32 %v2731_v22, %v1017_v54  ;;  %v1090_v58 = vpop.f32.mrf.mxu1  ;;  %v2156_v40 = vld [vmem:[%s3310_s0 + $0x68] sm:$0xf0]  ;;  %v1063_v54 = vadd.f32 %v2731_v22, %v2753_v35  ;;  %v1668_v35 = vld [vmem:[%s3310_s0 + $0x80] sm:$0xf] }
  0xb0   :  { %v1649_v48 = vor.u32 %v2156_v40, %v1648_v39  ;;  %v2169_v39 = vld [vmem:[%s3310_s0 + $0xd0] sm:$0xf0]  ;;  %v2166_v40 = vld [vmem:[%s3310_s0 + $0xbc] sm:$0xf] }
  0xb1   :  { %v1091_v59 = vadd.f32 %v1090_v58, %v1018_v57  ;;  %1056 = vmatmul.bf16.gmra.mxu0 %v1849_v51  ;;  %1230 = vmatmul.bf16.vlgmr.msrb.gmra.mxu3 %v1609_v52 }
  0xb2   :  { %1129 = vmatmul.bf16.gmra.mxu1 %v1853_v55 }
  0xb3   :  { %1202 = vmatmul.bf16.gmra.mxu2 %v1857_v56 }
  0xb4   :  { %v2787_v60 = vpop.f32.mrf.mxu3 }
  0xb6   :  { %v1163_v61 = vpop.f32.mrf.mxu2  ;;  %v1019_v63 = vpop.f32.mrf.mxu0 }
  0xb7   :  { %v2789_v62 = vadd.f32 %v1163_v61, %v1091_v59  ;;  %v1020_v0 = vadd.f32 %v2731_v22, %v1019_v63  ;;  %v1092_v1 = vpop.f32.mrf.mxu1 }
  0xb9   :  { %v1093_v3 = vadd.f32 %v1092_v1, %v1020_v0  ;;  %v2165_v1 = vld [vmem:[%s3310_s0 + $0xb4] sm:$0xf] }
  0xbc   :  { %v2816_v12 = vpop.f32.mrf.mxu3 }
  0xbe   :  { %v1165_v13 = vpop.f32.mrf.mxu2  ;;  %v1022_v19 = vpop.f32.mrf.mxu0 }
  0xbf   :  { %v2818_v18 = vadd.f32 %v1165_v13, %v1093_v3  ;;  %v1023_v24 = vadd.f32 %v2731_v22, %v1022_v19  ;;  %v1095_v25 = vpop.f32.mrf.mxu1  ;;  %v1690_v3 = vld [vmem:[%s3310_s0 + $0xcc] sm:$0xf0] }
  0xc1   :  { %v1096_v26 = vadd.f32 %v1095_v25, %v1023_v24  ;;  %1235 = vmatmul.bf16.gmra.mxu3 %v1637_v15  ;;  %1303 = vmatmul.bf16.vlgmr.msrb.gmra.mxu0 %v1613_v16  ;;  %v1693_v15 = vor.u32 %v2165_v1, %v1690_v3  ;;  %v1669_v16 = vor.u32 %v2162_v4, %v1668_v35 }
  0xc2   :  { %1376 = vmatmul.bf16.vlgmr.msrb.gmra.mxu1 %v1617_v11  ;;  %v1673_v11 = vor.u32 %v2159_v6, %v1670_v2 }
  0xc3   :  { %2130 = vmatmul.msk.bf16.vlgmr.msrb.gmra.mxu2 %vm963_vm0, %v1621_v14  ;;  %v1677_v14 = vor.u32 %v2163_v10, %v1676_v9  ;;  %v2179_v9 = vld [vmem:[%s3310_s0 + $0x124] sm:$0xf]  ;;  %v1746_v10 = vld [vmem:[%s3310_s0 + $0x13c] sm:$0xf0] }
  0xc4   :  { %v2822_v17 = vpop.f32.mrf.mxu3 }
  0xc6   :  { %v1168_v27 = vpop.f32.mrf.mxu2  ;;  %v1024_v28 = vpop.f32.mrf.mxu0 }
  0xc7   :  { %v2824_v20 = vadd.f32 %v1168_v27, %v1096_v26  ;;  %v1025_v29 = vadd.f32 %v2731_v22, %v1024_v28  ;;  %v1097_v30 = vpop.f32.mrf.mxu1  ;;  %v1068_v27 = vadd.f32 %v2731_v22, %v2787_v60  ;;  %v1696_v60 = vld [vmem:[%s3310_s0 + $0xb8] sm:$0xf] }
  0xc9   :  { %v1098_v31 = vadd.f32 %v1097_v30, %v1025_v29 }
  0xcc   :  { %v1074_v41 = vpop.f32.mrf.mxu3 }
  0xcd   :  { %v1070_v41 = vadd.f32 %v2731_v22, %v2816_v12 }
  0xce   :  { %v1170_v42 = vpop.f32.mrf.mxu2  ;;  %v1027_v46 = vpop.f32.mrf.mxu0 }
  0xcf   :  { %v2851_v45 = vadd.f32 %v1170_v42, %v1098_v31  ;;  %v1028_v50 = vadd.f32 %v2731_v22, %v1027_v46  ;;  %v1100_v51 = vpop.f32.mrf.mxu1  ;;  %v1698_v42 = vld [vmem:[%s3310_s0 + $0xd4] sm:$0xf0] }
  0xd1   :  { %v1101_v52 = vadd.f32 %v1100_v51, %v1028_v50  ;;  %1240 = vmatmul.bf16.gmra.mxu3 %v1665_v43  ;;  %1308 = vmatmul.bf16.gmra.mxu0 %v1641_v44  ;;  %v1704_v43 = vld [vmem:[%s3310_s0 + $0xc0] sm:$0xf]  ;;  %v2170_v44 = vld [vmem:[%s3310_s0 + $0xd8] sm:$0xf0]  ;;  %v1721_v50 = vor.u32 %v2172_v37, %v1718_v38  ;;  %v1697_v51 = vor.u32 %v2169_v39, %v1696_v60 }
  0xd2   :  { %1381 = vmatmul.bf16.gmra.mxu1 %v1645_v47 }
  0xd3   :  { %2131 = vmatmul.msk.bf16.gmra.mxu2 %vm963_vm0, %v1649_v48 }
  0xd4   :  { %v1135_v55 = vpop.f32.mrf.mxu3 }
  0xd5   :  { %v2857_v56 = vadd.f32 %v1135_v55, %v1063_v54  ;;  %v1701_v54 = vor.u32 %v2166_v40, %v1698_v42  ;;  %v1705_v55 = vor.u32 %v2170_v44, %v1704_v43  ;;  %v2186_v43 = vld [vmem:[%s3310_s0 + $0x15c] sm:$0xf]  ;;  %v1774_v44 = vld [vmem:[%s3310_s0 + $0x174] sm:$0xf0] }
  0xd6   :  { %v1173_v57 = vpop.f32.mrf.mxu2  ;;  %v1029_v59 = vpop.f32.mrf.mxu0 }
  0xd7   :  { %v2859_v58 = vadd.f32 %v1173_v57, %v1101_v52  ;;  %v1030_v61 = vadd.f32 %v2731_v22, %v1029_v59  ;;  %v1102_v63 = vpop.f32.mrf.mxu1 }
  0xd9   :  { %v1103_v0 = vadd.f32 %v1102_v63, %v1030_v61  ;;  %v1073_v63 = vadd.f32 %v2731_v22, %v2822_v17  ;;  %v1724_v17 = vld [vmem:[%s3310_s0 + $0xf0] sm:$0xf] }
  0xdc   :  { %v1137_v5 = vpop.f32.mrf.mxu3 }
  0xdd   :  { %v2888_v8 = vadd.f32 %v1137_v5, %v1065_v7  ;;  %v2176_v5 = vld [vmem:[%s3310_s0 + $0x108] sm:$0xf0] }
  0xde   :  { %v1175_v13 = vpop.f32.mrf.mxu2  ;;  %v1032_v49 = vpop.f32.mrf.mxu0 }
  0xdf   :  { %v2890_v19 = vadd.f32 %v1175_v13, %v1103_v0  ;;  %v1033_v24 = vadd.f32 %v2731_v22, %v1032_v49  ;;  %v1105_v25 = vpop.f32.mrf.mxu1  ;;  %v2173_v13 = vld [vmem:[%s3310_s0 + $0xf4] sm:$0xf] }
  0xe0   :  { %v2177_v49 = vld [vmem:[%s3310_s0 + $0x110] sm:$0xf0] }
  0xe1   :  { %v1106_v26 = vadd.f32 %v1105_v25, %v1033_v24  ;;  %1245 = vmatmul.bf16.gmra.mxu3 %v1693_v15  ;;  %1313 = vmatmul.bf16.gmra.mxu0 %v1669_v16  ;;  %v1726_v15 = vld [vmem:[%s3310_s0 + $0x10c] sm:$0xf0]  ;;  %v1732_v16 = vld [vmem:[%s3310_s0 + $0xf8] sm:$0xf]  ;;  %v1749_v24 = vor.u32 %v2179_v9, %v1746_v10  ;;  %v1725_v25 = vor.u32 %v2176_v5, %v1724_v17 }
  0xe2   :  { %1386 = vmatmul.bf16.gmra.mxu1 %v1673_v11 }
  0xe3   :  { %2132 = vmatmul.msk.bf16.gmra.mxu2 %vm963_vm0, %v1677_v14 }
  0xe4   :  { %v1140_v28 = vpop.f32.mrf.mxu3 }
  0xe5   :  { %v2896_v29 = vadd.f32 %v1140_v28, %v1068_v27  ;;  %v1729_v28 = vor.u32 %v2173_v13, %v1726_v15 }
  0xe6   :  { %v1178_v30 = vpop.f32.mrf.mxu2  ;;  %v1034_v32 = vpop.f32.mrf.mxu0 }
  0xe7   :  { %v2898_v31 = vadd.f32 %v1178_v30, %v1106_v26  ;;  %v1035_v33 = vadd.f32 %v2731_v22, %v1034_v32  ;;  %v1107_v34 = vpop.f32.mrf.mxu1  ;;  %v1733_v30 = vor.u32 %v2177_v49, %v1732_v16  ;;  %v2193_v49 = vld [vmem:[%s3310_s0 + $0x194] sm:$0xf] }
  0xe9   :  { %v1108_v23 = vadd.f32 %v1107_v34, %v1035_v33 }
  0xec   :  { %v1142_v46 = vpop.f32.mrf.mxu3 }
  0xed   :  { %v2927_v47 = vadd.f32 %v1142_v46, %v1070_v41  ;;  %v2183_v46 = vld [vmem:[%s3310_s0 + $0x140] sm:$0xf0] }
  0xee   :  { %v1180_v48 = vpop.f32.mrf.mxu2  ;;  %v1037_v12 = vpop.f32.mrf.mxu0 }
  0xef   :  { %v2929_v52 = vadd.f32 %v1180_v48, %v1108_v23  ;;  %v1038_v57 = vadd.f32 %v2731_v22, %v1037_v12  ;;  %v1110_v59 = vpop.f32.mrf.mxu1  ;;  %v2180_v48 = vld [vmem:[%s3310_s0 + $0x12c] sm:$0xf] }
  0xf0   :  { %v2184_v12 = vld [vmem:[%s3310_s0 + $0x148] sm:$0xf0] }
  0xf1   :  { %v1111_v61 = vadd.f32 %v1110_v59, %v1038_v57  ;;  %1250 = vmatmul.bf16.gmra.mxu3 %v1721_v50  ;;  %1318 = vmatmul.bf16.gmra.mxu0 %v1697_v51  ;;  %v1754_v50 = vld [vmem:[%s3310_s0 + $0x144] sm:$0xf0]  ;;  %v1760_v51 = vld [vmem:[%s3310_s0 + $0x130] sm:$0xf]  ;;  %v1777_v59 = vor.u32 %v2186_v43, %v1774_v44 }
  0xf2   :  { %1391 = vmatmul.bf16.gmra.mxu1 %v1701_v54 }
  0xf3   :  { %2133 = vmatmul.msk.bf16.gmra.mxu2 %vm963_vm0, %v1705_v55 }
  0xf4   :  { %v1145_v0 = vpop.f32.mrf.mxu3 }
  0xf5   :  { %v2935_v1 = vadd.f32 %v1145_v0, %v1073_v63 }
  0xf6   :  { %v1183_v3 = vpop.f32.mrf.mxu2  ;;  %v1039_v4 = vpop.f32.mrf.mxu0 }
  0xf7   :  { %v2937_v35 = vadd.f32 %v1183_v3, %v1111_v61  ;;  %v1040_v6 = vadd.f32 %v2731_v22, %v1039_v4  ;;  %v1112_v7 = vpop.f32.mrf.mxu1  ;;  %v1757_v3 = vor.u32 %v2180_v48, %v1754_v50  ;;  %v1761_v4 = vor.u32 %v2184_v12, %v1760_v51 }
  0xf9   :  { %v1113_v2 = vadd.f32 %v1112_v7, %v1040_v6 }
  0xfc   :  { %v1147_v11 = vpop.f32.mrf.mxu3 }
  0xfd   :  { %v1802_v11 = vld [vmem:[%s3310_s0 + $0x1ac] sm:$0xf0] }
  0xfe   :  { %v1185_v14 = vpop.f32.mrf.mxu2  ;;  %v1042_v27 = vpop.f32.mrf.mxu0 }
  0xff   :  { %v2964_v26 = vadd.f32 %v1185_v14, %v1113_v2  ;;  %v1043_v32 = vadd.f32 %v2731_v22, %v1042_v27  ;;  %v1115_v33 = vpop.f32.mrf.mxu1  ;;  %v2190_v14 = vld [vmem:[%s3310_s0 + $0x178] sm:$0xf0]  ;;  %v1788_v27 = vld [vmem:[%s3310_s0 + $0x168] sm:$0xf] }
 0x101   :  { %v1116_v34 = vadd.f32 %v1115_v33, %v1043_v32  ;;  %1255 = vmatmul.bf16.gmra.mxu3 %v1749_v24  ;;  %1323 = vmatmul.bf16.gmra.mxu0 %v1725_v25  ;;  %v2187_v24 = vld [vmem:[%s3310_s0 + $0x164] sm:$0xf]  ;;  %v1782_v25 = vld [vmem:[%s3310_s0 + $0x17c] sm:$0xf0] }
 0x102   :  { %1396 = vmatmul.bf16.gmra.mxu1 %v1729_v28  ;;  %v2191_v28 = vld [vmem:[%s3310_s0 + $0x180] sm:$0xf0] }
 0x103   :  { %2134 = vmatmul.msk.bf16.gmra.mxu2 %vm963_vm0, %v1733_v30 }
 0x104   :  { %v1208_v23 = vpop.f32.mrf.mxu3 }
 0x105   :  { %v2969_v38 = vadd.f32 %v1208_v23, %v2857_v56  ;;  %v1752_v56 = vld [vmem:[%s3310_s0 + $0x128] sm:$0xf] }
 0x106   :  { %v1188_v37 = vpop.f32.mrf.mxu2  ;;  %v1044_v39 = vpop.f32.mrf.mxu0  ;;  %v1753_v61 = vor.u32 %v2183_v46, %v1752_v56 }
 0x107   :  { %v2971_v60 = vadd.f32 %v1188_v37, %v1116_v34  ;;  %v1045_v40 = vadd.f32 %v2731_v22, %v1044_v39  ;;  %v1117_v41 = vpop.f32.mrf.mxu1  ;;  %v1805_v34 = vor.u32 %v2193_v49, %v1802_v11 }
 0x109   :  { %v1118_v42 = vadd.f32 %v1117_v41, %v1045_v40  ;;  %v1785_v40 = vor.u32 %v2187_v24, %v1782_v25  ;;  %v1789_v41 = vor.u32 %v2191_v28, %v1788_v27 }
 0x10c   :  { %v1210_v54 = vpop.f32.mrf.mxu3 }
 0x10d   :  { %v2999_v57 = vadd.f32 %v1210_v54, %v2888_v8 }
 0x10e   :  { %v1190_v55 = vpop.f32.mrf.mxu2  ;;  %v1047_v0 = vpop.f32.mrf.mxu0 }
 0x10f   :  { %v3001_v63 = vadd.f32 %v1190_v55, %v1118_v42  ;;  %v1048_v6 = vadd.f32 %v2731_v22, %v1047_v0  ;;  %v1120_v7 = vpop.f32.mrf.mxu1  ;;  %v2200_v55 = vld [vmem:[%s3310_s0 + $0x1cc] sm:$0xf]  ;;  %v2194_v0 = vld [vmem:[%s3310_s0 + $0x19c] sm:$0xf] }
 0x111   :  { %v1121_v2 = vadd.f32 %v1120_v7, %v1048_v6  ;;  %1260 = vmatmul.bf16.gmra.mxu3 %v1777_v59  ;;  %1328 = vmatmul.bf16.gmra.mxu0 %v1753_v61  ;;  %v1830_v59 = vld [vmem:[%s3310_s0 + $0x1e4] sm:$0xf0]  ;;  %v2197_v61 = vld [vmem:[%s3310_s0 + $0x1b0] sm:$0xf0]  ;;  %v2198_v6 = vld [vmem:[%s3310_s0 + $0x1b8] sm:$0xf0] }
 0x112   :  { %1401 = vmatmul.bf16.gmra.mxu1 %v1757_v3  ;;  %v1810_v3 = vld [vmem:[%s3310_s0 + $0x1b4] sm:$0xf0] }
 0x113   :  { %2135 = vmatmul.msk.bf16.gmra.mxu2 %vm963_vm0, %v1761_v4  ;;  %v1816_v4 = vld [vmem:[%s3310_s0 + $0x1a0] sm:$0xf] }
 0x114   :  { %v1213_v9 = vpop.f32.mrf.mxu3 }
 0x115   :  { %v3006_v8 = vadd.f32 %v1213_v9, %v2896_v29  ;;  %v1780_v29 = vld [vmem:[%s3310_s0 + $0x160] sm:$0xf]  ;;  %v1833_v9 = vor.u32 %v2200_v55, %v1830_v59 }
 0x116   :  { %v1193_v10 = vpop.f32.mrf.mxu2  ;;  %v1049_v5 = vpop.f32.mrf.mxu0  ;;  %v1781_v23 = vor.u32 %v2190_v14, %v1780_v29 }
 0x117   :  { %v3008_v17 = vadd.f32 %v1193_v10, %v1121_v2  ;;  %v1050_v13 = vadd.f32 %v2731_v22, %v1049_v5  ;;  %v1122_v15 = vpop.f32.mrf.mxu1 }
 0x119   :  { %v1123_v16 = vadd.f32 %v1122_v15, %v1050_v13  ;;  %v1813_v15 = vor.u32 %v2194_v0, %v1810_v3 }
 0x11c   :  { %v1215_v30 = vpop.f32.mrf.mxu3 }
 0x11d   :  { %v3036_v33 = vadd.f32 %v1215_v30, %v2927_v47 }
 0x11e   :  { %v1195_v32 = vpop.f32.mrf.mxu2  ;;  %v1052_v39 = vpop.f32.mrf.mxu0 }
 0x11f   :  { %v3038_v37 = vadd.f32 %v1195_v32, %v1123_v16  ;;  %v1053_v42 = vadd.f32 %v2731_v22, %v1052_v39  ;;  %v1125_v43 = vpop.f32.mrf.mxu1  ;;  %v1817_v16 = vor.u32 %v2198_v6, %v1816_v4  ;;  %v1836_v39 = vld [vmem:[%s3310_s0 + $0x1d0] sm:$0xf] }
 0x121   :  { %v1126_v44 = vadd.f32 %v1125_v43, %v1053_v42  ;;  %1265 = vmatmul.bf16.gmra.mxu3 %v1805_v34  ;;  %1333 = vmatmul.bf16.gmra.mxu0 %v1781_v23  ;;  %v2207_v34 = vld [vmem:[%s3310_s0 + $0x204] sm:$0xf]  ;;  %v1858_v23 = vld [vmem:[%s3310_s0 + $0x21c] sm:$0xf0]  ;;  %v1844_v42 = vld [vmem:[%s3310_s0 + $0x1d8] sm:$0xf] }
 0x122   :  { %1406 = vmatmul.bf16.gmra.mxu1 %v1785_v40  ;;  %v2204_v40 = vld [vmem:[%s3310_s0 + $0x1e8] sm:$0xf0]  ;;  %v2205_v43 = vld [vmem:[%s3310_s0 + $0x1f0] sm:$0xf0] }
 0x123   :  { %2136 = vmatmul.msk.bf16.gmra.mxu2 %vm963_vm0, %v1789_v41  ;;  %v1838_v41 = vld [vmem:[%s3310_s0 + $0x1ec] sm:$0xf0]  ;;  %v1845_v59 = vor.u32 %v2205_v43, %v1844_v42 }
 0x124   :  { %v1218_v56 = vpop.f32.mrf.mxu3 }
 0x125   :  { %v3043_v47 = vadd.f32 %v1218_v56, %v2935_v1  ;;  %v1808_v1 = vld [vmem:[%s3310_s0 + $0x198] sm:$0xf] }
 0x126   :  { %v1198_v46 = vpop.f32.mrf.mxu2  ;;  %v1054_v50 = vpop.f32.mrf.mxu0  ;;  %v1809_v10 = vor.u32 %v2197_v61, %v1808_v1 }
 0x127   :  { %v3045_v48 = vadd.f32 %v1198_v46, %v1126_v44  ;;  %v1055_v51 = vadd.f32 %v2731_v22, %v1054_v50  ;;  %v1127_v12 = vpop.f32.mrf.mxu1  ;;  %v1861_v46 = vor.u32 %v2207_v34, %v1858_v23  ;;  %v1837_v50 = vor.u32 %v2204_v40, %v1836_v39 }
 0x129   :  { %v1128_v54 = vadd.f32 %v1127_v12, %v1055_v51 }
 0x12c   :  { %v1220_v7 = vpop.f32.mrf.mxu3 }
 0x12e   :  { %v1200_v2 = vpop.f32.mrf.mxu2  ;;  %v1057_v13 = vpop.f32.mrf.mxu0 }
 0x12f   :  { %v3072_v5 = vadd.f32 %v1200_v2, %v1128_v54  ;;  %v1058_v49 = vadd.f32 %v2731_v22, %v1057_v13  ;;  %v1130_v11 = vpop.f32.mrf.mxu1  ;;  %v2214_v13 = vld [vmem:[%s3310_s0 + $0x23c] sm:$0xf] }
 0x131   :  { %v1131_v29 = vadd.f32 %v1130_v11, %v1058_v49  ;;  %1270 = vmatmul.bf16.gmra.mxu3 %v1833_v9  ;;  %1338 = vmatmul.bf16.gmra.mxu0 %v1809_v10  ;;  %v1864_v49 = vld [vmem:[%s3310_s0 + $0x208] sm:$0xf]  ;;  %v2208_v11 = vld [vmem:[%s3310_s0 + $0x20c] sm:$0xf] }
 0x132   :  { %1411 = vmatmul.bf16.gmra.mxu1 %v1813_v15  ;;  %v1886_v15 = vld [vmem:[%s3310_s0 + $0x254] sm:$0xf0] }
 0x133   :  { %2137 = vmatmul.msk.bf16.gmra.mxu2 %vm963_vm0, %v1817_v16 }
 0x134   :  { %v1231_v14 = vpop.f32.mrf.mxu3 }
 0x135   :  { %v1232_v51 = vadd.f32 %v1231_v14, %v2755_v36  ;;  %v1872_v14 = vld [vmem:[%s3310_s0 + $0x210] sm:$0xf] }
 0x136   :  { %v1203_v24 = vpop.f32.mrf.mxu2  ;;  %v1059_v27 = vpop.f32.mrf.mxu0 }
 0x137   :  { %v3076_v25 = vadd.f32 %v1203_v24, %v1131_v29  ;;  %v1060_v28 = vadd.f32 %v2731_v22, %v1059_v27  ;;  %v1132_v30 = vpop.f32.mrf.mxu1  ;;  %v2201_v22 = vld [vmem:[%s3310_s0 + $0x1d4] sm:$0xf]  ;;  %v1866_v29 = vld [vmem:[%s3310_s0 + $0x224] sm:$0xf0]  ;;  %v2212_v24 = vld [vmem:[%s3310_s0 + $0x228] sm:$0xf0] }
 0x138   :  { %v1841_v55 = vor.u32 %v2201_v22, %v1838_v41  ;;  %v1869_v22 = vor.u32 %v2208_v11, %v1866_v29  ;;  %v1873_v41 = vor.u32 %v2212_v24, %v1872_v14 }
 0x139   :  { %v1133_v32 = vadd.f32 %v1132_v30, %v1060_v28 }
 0x13c   :  { %v1233_v44 = vpop.f32.mrf.mxu3 }
 0x13d   :  { %v1234_v6 = vadd.f32 %v1233_v44, %v2784_v53  ;;  %v2211_v53 = vld [vmem:[%s3310_s0 + $0x220] sm:$0xf0] }
 0x13e   :  { %v1205_v56 = vpop.f32.mrf.mxu2  ;;  %v1304_v54 = vpop.f32.mrf.mxu0  ;;  %v1865_v34 = vor.u32 %v2211_v53, %v1864_v49 }
 0x13f   :  { %v3104_v12 = vadd.f32 %v1205_v56, %v1133_v32  ;;  %v1377_v1 = vpop.f32.mrf.mxu1  ;;  %v1305_v61 = vadd.f32 %v1304_v54, %v1232_v51  ;;  %v1889_v32 = vor.u32 %v2214_v13, %v1886_v15 }
 0x141   :  { %1275 = vmatmul.bf16.gmra.mxu3 %v1861_v46  ;;  %1343 = vmatmul.bf16.gmra.mxu0 %v1837_v50  ;;  %v1378_v0 = vadd.f32 %v1377_v1, %v1305_v61 }
 0x142   :  { %1416 = vmatmul.bf16.gmra.mxu1 %v1841_v55 }
 0x143   :  { %2138 = vmatmul.msk.bf16.gmra.mxu2 %vm963_vm0, %v1845_v59 }
 0x144   :  { %v1236_v3 = vpop.f32.mrf.mxu3 }
 0x145   :  { %v1237_v23 = vadd.f32 %v1236_v3, %v2789_v62  ;;  %v1914_v3 = vld [vmem:[%s3310_s0 + $0x28c] sm:$0xf0] }
 0x146   :  { %v1450_v4 = vpop.f32.mrf.mxu2  ;;  %v1306_v2 = vpop.f32.mrf.mxu0 }
 0x147   :  { %v1451_v7 = vadd.f32 %v1450_v4, %v1378_v0  ;;  %v1379_v36 = vpop.f32.mrf.mxu1  ;;  %v1307_v10 = vadd.f32 %v1306_v2, %v1234_v6  ;;  %v2221_v0 = vld [vmem:[%s3310_s0 + $0x274] sm:$0xf]  ;;  %v1892_v6 = vld [vmem:[%s3310_s0 + $0x240] sm:$0xf] }
 0x148   :  { %v1894_v2 = vld [vmem:[%s3310_s0 + $0x25c] sm:$0xf0] }
 0x149   :  { %v1514_v9 = vmax.f32 %v1451_v7, 0.0  ;;  %v1380_v27 = vadd.f32 %v1379_v36, %v1307_v10  ;;  %v2215_v7 = vld [vmem:[%s3310_s0 + $0x244] sm:$0xf]  ;;  %v1900_v36 = vld [vmem:[%s3310_s0 + $0x248] sm:$0xf] }
 0x14a   :  { %v1897_v14 = vor.u32 %v2215_v7, %v1894_v2 }
 0x14b   :  { %v1539_v16 = vpack.c.bf16 %v1514_v9, %v1514_v9  ;;  %v2219_v9 = vld [vmem:[%s3310_s0 + $0x260] sm:$0xf0] }
 0x14c   :  { %v1238_v28 = vpop.f32.mrf.mxu3  ;;  %v1901_v24 = vor.u32 %v2219_v9, %v1900_v36 }
 0x14d   :  { %1565 = vst.msk [vmem:[%s3311_s3] sm:$0xf] %vm1564_vm1, %v1539_v16  ;;  %v1239_v51 = vadd.f32 %v1238_v28, %v2818_v18  ;;  %v2218_v18 = vld [vmem:[%s3310_s0 + $0x258] sm:$0xf0]  ;;  %v1917_v16 = vor.u32 %v2221_v0, %v1914_v3 }
 0x14e   :  { %v1452_v30 = vpop.f32.mrf.mxu2  ;;  %v1309_v40 = vpop.f32.mrf.mxu0  ;;  %v1893_v49 = vor.u32 %v2218_v18, %v1892_v6 }
 0x14f   :  { %v1453_v39 = vadd.f32 %v1452_v30, %v1380_v27  ;;  %v1382_v42 = vpop.f32.mrf.mxu1  ;;  %v1310_v44 = vadd.f32 %v1309_v40, %v1237_v23 }
 0x151   :  { %v1515_v43 = vmax.f32 %v1453_v39, 0.0  ;;  %1280 = vmatmul.bf16.gmra.mxu3 %v1889_v32  ;;  %1348 = vmatmul.bf16.gmra.mxu0 %v1865_v34  ;;  %v1383_v46 = vadd.f32 %v1382_v42, %v1310_v44  ;;  %v490_v44 = vunpack.c.h.b16 %v2726_v21  ;;  %v1928_v21 = vld [vmem:[%s3310_s0 + $0x280] sm:$0xf] }
 0x152   :  { %1421 = vmatmul.bf16.gmra.mxu1 %v1869_v22 }
 0x153   :  { %v1540_v56 = vpack.c.bf16 %v1515_v43, %v1515_v43  ;;  %2139 = vmatmul.msk.bf16.gmra.mxu2 %vm963_vm0, %v1873_v41 }
 0x154   :  { %v1241_v62 = vpop.f32.mrf.mxu3 }
 0x155   :  { %1566 = vst.msk [vmem:[%s3311_s3 + $0x4] sm:$0xf] %vm1564_vm1, %v1540_v56  ;;  %v1242_v53 = vadd.f32 %v1241_v62, %v2824_v20  ;;  %v2225_v62 = vld [vmem:[%s3310_s0 + $0x290] sm:$0xf0] }
 0x156   :  { %v1455_v50 = vpop.f32.mrf.mxu2  ;;  %v1311_v55 = vpop.f32.mrf.mxu0 }
 0x157   :  { %v1456_v54 = vadd.f32 %v1455_v50, %v1383_v46  ;;  %v1384_v59 = vpop.f32.mrf.mxu1  ;;  %v1312_v61 = vadd.f32 %v1311_v55, %v1239_v51  ;;  %v1920_v46 = vld [vmem:[%s3310_s0 + $0x278] sm:$0xf]  ;;  %v2226_v51 = vld [vmem:[%s3310_s0 + $0x298] sm:$0xf0] }
 0x158   :  { %v1922_v50 = vld [vmem:[%s3310_s0 + $0x294] sm:$0xf0]  ;;  %v1929_v18 = vor.u32 %v2226_v51, %v1928_v21 }
 0x159   :  { %v1516_v1 = vmax.f32 %v1456_v54, 0.0  ;;  %v1385_v10 = vadd.f32 %v1384_v59, %v1312_v61  ;;  %v1921_v61 = vor.u32 %v2225_v62, %v1920_v46 }
 0x15b   :  { %v1541_v4 = vpack.c.bf16 %v1516_v1, %v1516_v1  ;;  %v581_v1 = vpack.c.b16 %v490_v44, %v490_v44 }
 0x15c   :  { %v1243_v13 = vpop.f32.mrf.mxu3 }
 0x15d   :  { %1567 = vst.msk [vmem:[%s3311_s3 + $0x8] sm:$0xf] %vm1564_vm1, %v1541_v4  ;;  %v1244_v39 = vadd.f32 %v1243_v13, %v2851_v45  ;;  %v2222_v45 = vld [vmem:[%s3310_s0 + $0x27c] sm:$0xf] }
 0x15e   :  { %v1457_v15 = vpop.f32.mrf.mxu2  ;;  %v1314_v29 = vpop.f32.mrf.mxu0  ;;  %v1925_v6 = vor.u32 %v2222_v45, %v1922_v50 }
 0x15f   :  { %v1458_v11 = vadd.f32 %v1457_v15, %v1385_v10  ;;  %v1387_v27 = vpop.f32.mrf.mxu1  ;;  %v1315_v30 = vadd.f32 %v1314_v29, %v1242_v53  ;;  %v113_v53 = vld [vmem:[%s3310_s0 + $0x2b0] sm:$0xff]  ;;  %v114_v29 = vld [vmem:[%s3310_s0 + $0x2b8] sm:$0xf] }
 0x161   :  { %v1517_v28 = vmax.f32 %v1458_v11, 0.0  ;;  %1285 = vmatmul.bf16.gmra.mxu3 %v1917_v16  ;;  %1353 = vmatmul.bf16.gmra.mxu0 %v1893_v49  ;;  %v1388_v34 = vadd.f32 %v1387_v27, %v1315_v30  ;;  %v491_v27 = vunpack.c.l.b16 %v113_v53  ;;  %v492_v30 = vunpack.c.h.b16 %v113_v53 }
 0x162   :  { %1426 = vmatmul.bf16.gmra.mxu1 %v1897_v14 }
 0x163   :  { %v1542_v32 = vpack.c.bf16 %v1517_v28, %v1517_v28  ;;  %2140 = vmatmul.msk.bf16.gmra.mxu2 %vm963_vm0, %v1901_v24 }
 0x164   :  { %v1246_v20 = vpop.f32.mrf.mxu3 }
 0x165   :  { %1568 = vst.msk [vmem:[%s3311_s3 + $0xc] sm:$0xf] %vm1564_vm1, %v1542_v32  ;;  %v1247_v0 = vadd.f32 %v1246_v20, %v2859_v58  ;;  %v493_v32 = vunpack.c.l.b16 %v114_v29 }
 0x166   :  { %v1460_v23 = vpop.f32.mrf.mxu2  ;;  %v1316_v22 = vpop.f32.mrf.mxu0 }
 0x167   :  { %v1461_v40 = vadd.f32 %v1460_v23, %v1388_v34  ;;  %v1389_v41 = vpop.f32.mrf.mxu1  ;;  %v1317_v43 = vadd.f32 %v1316_v22, %v1244_v39  ;;  %v582_v23 = vpack.c.b16 %v491_v27, %v491_v27 }
 0x169   :  { %v1518_v42 = vmax.f32 %v1461_v40, 0.0  ;;  %v1390_v54 = vadd.f32 %v1389_v41, %v1317_v43  ;;  %v583_v41 = vpack.c.b16 %v492_v30, %v492_v30 }
 0x16b   :  { %v1543_v56 = vpack.c.bf16 %v1518_v42, %v1518_v42  ;;  %v584_v42 = vpack.c.b16 %v493_v32, %v493_v32 }
 0x16c   :  { %v1248_v55 = vpop.f32.mrf.mxu3 }
 0x16d   :  { %1569 = vst.msk [vmem:[%s3311_s3 + $0x10] sm:$0xf] %vm1564_vm1, %v1543_v56  ;;  %v1249_v15 = vadd.f32 %v1248_v55, %v2890_v19 }
 0x16e   :  { %v1462_v59 = vpop.f32.mrf.mxu2  ;;  %v1319_v4 = vpop.f32.mrf.mxu0 }
 0x16f   :  { %v1463_v3 = vadd.f32 %v1462_v59, %v1390_v54  ;;  %v1392_v7 = vpop.f32.mrf.mxu1  ;;  %v1320_v36 = vadd.f32 %v1319_v4, %v1247_v0 }
 0x171   :  { %v1519_v2 = vmax.f32 %v1463_v3, 0.0  ;;  %1290 = vmatmul.bf16.gmra.mxu3 %v581_v1  ;;  %1358 = vmatmul.bf16.gmra.mxu0 %v1921_v61  ;;  %v1393_v10 = vadd.f32 %v1392_v7, %v1320_v36 }
 0x172   :  { %1431 = vmatmul.bf16.gmra.mxu1 %v1925_v6 }
 0x173   :  { %v1544_v9 = vpack.c.bf16 %v1519_v2, %v1519_v2  ;;  %2141 = vmatmul.msk.bf16.gmra.mxu2 %vm963_vm0, %v1929_v18 }
 0x174   :  { %v1251_v58 = vpop.f32.mrf.mxu3 }
 0x175   :  { %1570 = vst.msk [vmem:[%s3311_s3 + $0x14] sm:$0xf] %vm1564_vm1, %v1544_v9  ;;  %v1252_v39 = vadd.f32 %v1251_v58, %v2898_v31 }
 0x176   :  { %v1465_v13 = vpop.f32.mrf.mxu2  ;;  %v1321_v49 = vpop.f32.mrf.mxu0 }
 0x177   :  { %v1466_v16 = vadd.f32 %v1465_v13, %v1393_v10  ;;  %v1394_v11 = vpop.f32.mrf.mxu1  ;;  %v1322_v24 = vadd.f32 %v1321_v49, %v1249_v15 }
 0x179   :  { %v1520_v14 = vmax.f32 %v1466_v16, 0.0  ;;  %v1395_v19 = vadd.f32 %v1394_v11, %v1322_v24 }
 0x17b   :  { %v1545_v28 = vpack.c.bf16 %v1520_v14, %v1520_v14 }
 0x17c   :  { %v1253_v34 = vpop.f32.mrf.mxu3 }
 0x17d   :  { %1571 = vst.msk [vmem:[%s3311_s3 + $0x18] sm:$0xf] %vm1564_vm1, %v1545_v28  ;;  %v1254_v50 = vadd.f32 %v1253_v34, %v2929_v52 }
 0x17e   :  { %v1467_v20 = vpop.f32.mrf.mxu2  ;;  %v1324_v22 = vpop.f32.mrf.mxu0 }
 0x17f   :  { %v1468_v40 = vadd.f32 %v1467_v20, %v1395_v19  ;;  %v1397_v43 = vpop.f32.mrf.mxu1  ;;  %v1325_v56 = vadd.f32 %v1324_v22, %v1252_v39 }
 0x181   :  { %v1521_v44 = vmax.f32 %v1468_v40, 0.0  ;;  %1363 = vmatmul.bf16.gmra.mxu0 %v582_v23  ;;  %v1398_v62 = vadd.f32 %v1397_v43, %v1325_v56 }
 0x182   :  { %1436 = vmatmul.bf16.gmra.mxu1 %v583_v41 }
 0x183   :  { %v1546_v46 = vpack.c.bf16 %v1521_v44, %v1521_v44  ;;  %2142 = vmatmul.msk.bf16.gmra.mxu2 %vm963_vm0, %v584_v42 }
 0x184   :  { %v1256_v45 = vpop.f32.mrf.mxu3 }
 0x185   :  { %1572 = vst.msk [vmem:[%s3311_s3 + $0x1c] sm:$0xf] %vm1564_vm1, %v1546_v46  ;;  %v1257_v4 = vadd.f32 %v1256_v45, %v2937_v35 }
 0x186   :  { %v1470_v31 = vpop.f32.mrf.mxu2  ;;  %v1326_v51 = vpop.f32.mrf.mxu0 }
 0x187   :  { %v1471_v21 = vadd.f32 %v1470_v31, %v1398_v62  ;;  %v1399_v54 = vpop.f32.mrf.mxu1  ;;  %v1327_v59 = vadd.f32 %v1326_v51, %v1254_v50 }
 0x189   :  { %v1522_v55 = vmax.f32 %v1471_v21, 0.0  ;;  %v1400_v61 = vadd.f32 %v1399_v54, %v1327_v59 }
 0x18b   :  { %v1547_v1 = vpack.c.bf16 %v1522_v55, %v1522_v55 }
 0x18c   :  { %v1258_v0 = vpop.f32.mrf.mxu3 }
 0x18d   :  { %1573 = vst.msk [vmem:[%s3311_s3 + $0x20] sm:$0xf] %vm1564_vm1, %v1547_v1  ;;  %v1259_v13 = vadd.f32 %v1258_v0, %v2964_v26 }
 0x18e   :  { %v1472_v3 = vpop.f32.mrf.mxu2  ;;  %v1329_v18 = vpop.f32.mrf.mxu0 }
 0x18f   :  { %v1473_v6 = vadd.f32 %v1472_v3, %v1400_v61  ;;  %v1402_v7 = vpop.f32.mrf.mxu1  ;;  %v1330_v2 = vadd.f32 %v1329_v18, %v1257_v4 }
 0x191   :  { %v1523_v52 = vmax.f32 %v1473_v6, 0.0  ;;  %v1403_v9 = vadd.f32 %v1402_v7, %v1330_v2 }
 0x193   :  { %v1548_v36 = vpack.c.bf16 %v1523_v52, %v1523_v52 }
 0x194   :  { %v1261_v10 = vpop.f32.mrf.mxu3 }
 0x195   :  { %1574 = vst.msk [vmem:[%s3311_s3 + $0x24] sm:$0xf] %vm1564_vm1, %v1548_v36  ;;  %v1262_v27 = vadd.f32 %v1261_v10, %v2971_v60 }
 0x196   :  { %v1475_v58 = vpop.f32.mrf.mxu2  ;;  %v1331_v16 = vpop.f32.mrf.mxu0 }
 0x197   :  { %v1476_v15 = vadd.f32 %v1475_v58, %v1403_v9  ;;  %v1404_v49 = vpop.f32.mrf.mxu1  ;;  %v1332_v53 = vadd.f32 %v1331_v16, %v1259_v13 }
 0x199   :  { %v1524_v35 = vmax.f32 %v1476_v15, 0.0  ;;  %v1405_v29 = vadd.f32 %v1404_v49, %v1332_v53 }
 0x19b   :  { %v1549_v11 = vpack.c.bf16 %v1524_v35, %v1524_v35 }
 0x19c   :  { %v1263_v14 = vpop.f32.mrf.mxu3 }
 0x19d   :  { %1575 = vst.msk [vmem:[%s3311_s3 + $0x28] sm:$0xf] %vm1564_vm1, %v1549_v11  ;;  %v1264_v40 = vadd.f32 %v1263_v14, %v3001_v63 }
 0x19e   :  { %v1477_v24 = vpop.f32.mrf.mxu2  ;;  %v1334_v30 = vpop.f32.mrf.mxu0 }
 0x19f   :  { %v1478_v28 = vadd.f32 %v1477_v24, %v1405_v29  ;;  %v1407_v32 = vpop.f32.mrf.mxu1  ;;  %v1335_v19 = vadd.f32 %v1334_v30, %v1262_v27 }
 0x1a1   :  { %v1525_v26 = vmax.f32 %v1478_v28, 0.0  ;;  %v1408_v20 = vadd.f32 %v1407_v32, %v1335_v19 }
 0x1a3   :  { %v1550_v34 = vpack.c.bf16 %v1525_v26, %v1525_v26 }
 0x1a4   :  { %v1266_v23 = vpop.f32.mrf.mxu3 }
 0x1a5   :  { %1576 = vst.msk [vmem:[%s3311_s3 + $0x2c] sm:$0xf] %vm1564_vm1, %v1550_v34  ;;  %v1267_v45 = vadd.f32 %v1266_v23, %v3008_v17 }
 0x1a6   :  { %v1480_v39 = vpop.f32.mrf.mxu2  ;;  %v1336_v41 = vpop.f32.mrf.mxu0 }
 0x1a7   :  { %v1481_v22 = vadd.f32 %v1480_v39, %v1408_v20  ;;  %v1409_v42 = vpop.f32.mrf.mxu1  ;;  %v1337_v43 = vadd.f32 %v1336_v41, %v1264_v40 }
 0x1a9   :  { %v1526_v60 = vmax.f32 %v1481_v22, 0.0  ;;  %v1410_v56 = vadd.f32 %v1409_v42, %v1337_v43 }
 0x1ab   :  { %v1551_v44 = vpack.c.bf16 %v1526_v60, %v1526_v60 }
 0x1ac   :  { %v1268_v46 = vpop.f32.mrf.mxu3 }
 0x1ad   :  { %1577 = vst.msk [vmem:[%s3311_s3 + $0x30] sm:$0xf] %vm1564_vm1, %v1551_v44  ;;  %v1269_v61 = vadd.f32 %v1268_v46, %v3038_v37 }
 0x1ae   :  { %v1482_v62 = vpop.f32.mrf.mxu2  ;;  %v1339_v50 = vpop.f32.mrf.mxu0 }
 0x1af   :  { %v1483_v31 = vadd.f32 %v1482_v62, %v1410_v56  ;;  %v1412_v21 = vpop.f32.mrf.mxu1  ;;  %v1340_v51 = vadd.f32 %v1339_v50, %v1267_v45 }
 0x1b1   :  { %v1527_v63 = vmax.f32 %v1483_v31, 0.0  ;;  %v1413_v55 = vadd.f32 %v1412_v21, %v1340_v51 }
 0x1b3   :  { %v1552_v54 = vpack.c.bf16 %v1527_v63, %v1527_v63 }
 0x1b4   :  { %v1271_v59 = vpop.f32.mrf.mxu3 }
 0x1b5   :  { %1578 = vst.msk [vmem:[%s3311_s3 + $0x34] sm:$0xf] %vm1564_vm1, %v1552_v54  ;;  %v1272_v36 = vadd.f32 %v1271_v59, %v3045_v48 }
 0x1b6   :  { %v1485_v1 = vpop.f32.mrf.mxu2  ;;  %v1341_v3 = vpop.f32.mrf.mxu0 }
 0x1b7   :  { %v1486_v0 = vadd.f32 %v1485_v1, %v1413_v55  ;;  %v1414_v4 = vpop.f32.mrf.mxu1  ;;  %v1342_v6 = vadd.f32 %v1341_v3, %v1269_v61 }
 0x1b9   :  { %v1528_v17 = vmax.f32 %v1486_v0, 0.0  ;;  %v1415_v7 = vadd.f32 %v1414_v4, %v1342_v6 }
 0x1bb   :  { %v1553_v18 = vpack.c.bf16 %v1528_v17, %v1528_v17 }
 0x1bc   :  { %v1273_v52 = vpop.f32.mrf.mxu3 }
 0x1bd   :  { %1579 = vst.msk [vmem:[%s3311_s3 + $0x38] sm:$0xf] %vm1564_vm1, %v1553_v18  ;;  %v1274_v53 = vadd.f32 %v1273_v52, %v3072_v5 }
 0x1be   :  { %v1487_v2 = vpop.f32.mrf.mxu2  ;;  %v1344_v10 = vpop.f32.mrf.mxu0 }
 0x1bf   :  { %v1488_v9 = vadd.f32 %v1487_v2, %v1415_v7  ;;  %v1417_v58 = vpop.f32.mrf.mxu1  ;;  %v1345_v13 = vadd.f32 %v1344_v10, %v1272_v36 }
 0x1c1   :  { %v1529_v37 = vmax.f32 %v1488_v9, 0.0  ;;  %v1418_v16 = vadd.f32 %v1417_v58, %v1345_v13 }
 0x1c3   :  { %v1554_v15 = vpack.c.bf16 %v1529_v37, %v1529_v37 }
 0x1c4   :  { %v1276_v49 = vpop.f32.mrf.mxu3 }
 0x1c5   :  { %1580 = vst.msk [vmem:[%s3311_s3 + $0x3c] sm:$0xf] %vm1564_vm1, %v1554_v15  ;;  %v1277_v26 = vadd.f32 %v1276_v49, %v3076_v25 }
 0x1c6   :  { %v1490_v35 = vpop.f32.mrf.mxu2  ;;  %v1346_v29 = vpop.f32.mrf.mxu0 }
 0x1c7   :  { %v1491_v11 = vadd.f32 %v1490_v35, %v1418_v16  ;;  %v1419_v14 = vpop.f32.mrf.mxu1  ;;  %v1347_v24 = vadd.f32 %v1346_v29, %v1274_v53 }
 0x1c9   :  { %v1530_v48 = vmax.f32 %v1491_v11, 0.0  ;;  %v1420_v28 = vadd.f32 %v1419_v14, %v1347_v24 }
 0x1cb   :  { %v1555_v27 = vpack.c.bf16 %v1530_v48, %v1530_v48 }
 0x1cc   :  { %v1278_v30 = vpop.f32.mrf.mxu3 }
 0x1cd   :  { %1581 = vst.msk [vmem:[%s3311_s3 + $0x40] sm:$0xf] %vm1564_vm1, %v1555_v27  ;;  %v1279_v42 = vadd.f32 %v1278_v30, %v3104_v12 }
 0x1ce   :  { %v1492_v32 = vpop.f32.mrf.mxu2  ;;  %v1349_v34 = vpop.f32.mrf.mxu0 }
 0x1cf   :  { %v1493_v19 = vadd.f32 %v1492_v32, %v1420_v28  ;;  %v1422_v20 = vpop.f32.mrf.mxu1  ;;  %v1350_v23 = vadd.f32 %v1349_v34, %v1277_v26 }
 0x1d1   :  { %v1531_v5 = vmax.f32 %v1493_v19, 0.0  ;;  %v1423_v40 = vadd.f32 %v1422_v20, %v1350_v23 }
 0x1d3   :  { %v1556_v39 = vpack.c.bf16 %v1531_v5, %v1531_v5 }
 0x1d4   :  { %v1281_v22 = vpop.f32.mrf.mxu3 }
 0x1d5   :  { %1582 = vst.msk [vmem:[%s3311_s3 + $0x44] sm:$0xf] %vm1564_vm1, %v1556_v39  ;;  %v1282_v50 = vadd.f32 %v1281_v22, %v2969_v38 }
 0x1d6   :  { %v1495_v41 = vpop.f32.mrf.mxu2  ;;  %v1351_v43 = vpop.f32.mrf.mxu0 }
 0x1d7   :  { %v1496_v60 = vadd.f32 %v1495_v41, %v1423_v40  ;;  %v1424_v44 = vpop.f32.mrf.mxu1  ;;  %v1352_v56 = vadd.f32 %v1351_v43, %v1279_v42 }
 0x1d9   :  { %v1532_v25 = vmax.f32 %v1496_v60, 0.0  ;;  %v1425_v62 = vadd.f32 %v1424_v44, %v1352_v56 }
 0x1db   :  { %v1557_v46 = vpack.c.bf16 %v1532_v25, %v1532_v25 }
 0x1dc   :  { %v1283_v45 = vpop.f32.mrf.mxu3 }
 0x1dd   :  { %1583 = vst.msk [vmem:[%s3311_s3 + $0x48] sm:$0xf] %vm1564_vm1, %v1557_v46  ;;  %v1284_v0 = vadd.f32 %v1283_v45, %v2999_v57 }
 0x1de   :  { %v1497_v31 = vpop.f32.mrf.mxu2  ;;  %v1354_v63 = vpop.f32.mrf.mxu0 }
 0x1df   :  { %v1498_v21 = vadd.f32 %v1497_v31, %v1425_v62  ;;  %v1427_v51 = vpop.f32.mrf.mxu1  ;;  %v1355_v54 = vadd.f32 %v1354_v63, %v1282_v50 }
 0x1e1   :  { %v1533_v12 = vmax.f32 %v1498_v21, 0.0  ;;  %v1428_v59 = vadd.f32 %v1427_v51, %v1355_v54 }
 0x1e3   :  { %v1558_v55 = vpack.c.bf16 %v1533_v12, %v1533_v12 }
 0x1e4   :  { %v1286_v1 = vpop.f32.mrf.mxu3 }
 0x1e5   :  { %1584 = vst.msk [vmem:[%s3311_s3 + $0x4c] sm:$0xf] %vm1564_vm1, %v1558_v55  ;;  %v1287_v36 = vadd.f32 %v1286_v1, %v3006_v8 }
 0x1e6   :  { %v1500_v61 = vpop.f32.mrf.mxu2  ;;  %v1356_v4 = vpop.f32.mrf.mxu0 }
 0x1e7   :  { %v1501_v3 = vadd.f32 %v1500_v61, %v1428_v59  ;;  %v1429_v17 = vpop.f32.mrf.mxu1  ;;  %v1357_v6 = vadd.f32 %v1356_v4, %v1284_v0 }
 0x1e9   :  { %v1534_v38 = vmax.f32 %v1501_v3, 0.0  ;;  %v1430_v7 = vadd.f32 %v1429_v17, %v1357_v6 }
 0x1eb   :  { %v1559_v18 = vpack.c.bf16 %v1534_v38, %v1534_v38 }
 0x1ec   :  { %v1288_v52 = vpop.f32.mrf.mxu3 }
 0x1ed   :  { %1585 = vst.msk [vmem:[%s3311_s3 + $0x50] sm:$0xf] %vm1564_vm1, %v1559_v18  ;;  %v1289_v35 = vadd.f32 %v1288_v52, %v3036_v33 }
 0x1ee   :  { %v1502_v2 = vpop.f32.mrf.mxu2  ;;  %v1359_v10 = vpop.f32.mrf.mxu0 }
 0x1ef   :  { %v1503_v9 = vadd.f32 %v1502_v2, %v1430_v7  ;;  %v1432_v58 = vpop.f32.mrf.mxu1  ;;  %v1360_v37 = vadd.f32 %v1359_v10, %v1287_v36 }
 0x1f1   :  { %v1535_v57 = vmax.f32 %v1503_v9, 0.0  ;;  %v1433_v15 = vadd.f32 %v1432_v58, %v1360_v37 }
 0x1f3   :  { %v1560_v13 = vpack.c.bf16 %v1535_v57, %v1535_v57 }
 0x1f4   :  { %v1291_v16 = vpop.f32.mrf.mxu3 }
 0x1f5   :  { %1586 = vst.msk [vmem:[%s3311_s3 + $0x54] sm:$0xf] %vm1564_vm1, %v1560_v13  ;;  %v1292_v30 = vadd.f32 %v1291_v16, %v3043_v47 }
 0x1f6   :  { %v1505_v49 = vpop.f32.mrf.mxu2  ;;  %v1361_v11 = vpop.f32.mrf.mxu0 }
 0x1f7   :  { %v1506_v53 = vadd.f32 %v1505_v49, %v1433_v15  ;;  %v1434_v29 = vpop.f32.mrf.mxu1  ;;  %v1362_v14 = vadd.f32 %v1361_v11, %v1289_v35 }
 0x1f9   :  { %v1536_v8 = vmax.f32 %v1506_v53, 0.0  ;;  %v1435_v24 = vadd.f32 %v1434_v29, %v1362_v14 }
 0x1fb   :  { %v1561_v48 = vpack.c.bf16 %v1536_v8, %v1536_v8 }
 0x1fc   :  { %v1293_v27 = vpop.f32.mrf.mxu3 }
 0x1fd   :  { %1587 = vst.msk [vmem:[%s3311_s3 + $0x58] sm:$0xf] %vm1564_vm1, %v1561_v48 }
 0x1fe   :  { %v1507_v28 = vpop.f32.mrf.mxu2  ;;  %v1364_v26 = vpop.f32.mrf.mxu0 }
 0x1ff   :  { %v1508_v32 = vadd.f32 %v1507_v28, %v1435_v24  ;;  %v1437_v19 = vpop.f32.mrf.mxu1  ;;  %v1365_v34 = vadd.f32 %v1364_v26, %v1292_v30 }
 0x201   :  { %v1537_v33 = vmax.f32 %v1508_v32, 0.0  ;;  %v1438_v5 = vadd.f32 %v1437_v19, %v1365_v34 }
 0x203   :  { %v1562_v20 = vpack.c.bf16 %v1537_v33, %v1537_v33 }
 0x205   :  { %1588 = vst.msk [vmem:[%s3311_s3 + $0x5c] sm:$0xf] %vm1564_vm1, %v1562_v20 }
 0x206   :  { %v1510_v23 = vpop.f32.mrf.mxu2  ;;  %v1366_v40 = vpop.f32.mrf.mxu0 }
 0x207   :  { %v1511_v39 = vadd.f32 %v1510_v23, %v1438_v5  ;;  %v1439_v22 = vpop.f32.mrf.mxu1 }
 0x209   :  { %v1538_v41 = vmax.f32 %v1511_v39, 0.0 }
 0x20b   :  { %v1563_v42 = vpack.c.bf16 %v1538_v41, %v1538_v41 }
 0x20d   :  { %1589 = vst.msk [vmem:[%s3311_s3 + $0x60] sm:$0xf] %vm1564_vm1, %v1563_v42 }
 0x20e   :  { %v1512_v47 = vpop.f32.mrf.mxu2 }

// kernel: cnn1_forward.9
= control target key start
LH: loop header
LB: loop body
LE: loop exit
PB: predicated region body
PF: predicated region fallthrough
CT: control target
= control target key end

     0   :  { %vm644_vm0 = vcmask 261120   ;;  %s2340_s0 = inlined_call_operand.vmem [shape: bf16[2,800], index: 0, kind: input, shape index: {}]   ;;  %s2341_s1 = inlined_call_operand.vmem [shape: bf16[800,256], index: 1, kind: input, shape index: {}]   ;;  %s2342_s2 = inlined_call_operand.vmem [shape: f32[1,256], index: 2, kind: input, shape index: {}]   ;;  %s2343_s3 = inlined_call_operand.vmem [shape: bf16[256,10], index: 3, kind: input, shape index: {}]   ;;  %s2344_s4 = inlined_call_operand.vmem [shape: f32[1,10], index: 4, kind: input, shape index: {}]   ;;  %s2345_s5 = inlined_call_operand.hbm [shape: f32[2,10], index: 5, kind: output, shape index: {}]  }
   0x1   :  { %v1067_v0 = vld [vmem:[%s2341_s1 + $0x70] sm:$0xf]  ;;  %v1490_v1 = vld [vmem:[%s2341_s1 + $0x74] sm:$0xf0]  ;;  %v1059_v11 = vld [vmem:[%s2341_s1 + $0x60] sm:$0xf] }
   0x2   :  { %v1195_v2 = vld [vmem:[%s2341_s1 + $0x170] sm:$0xf]  ;;  %v1068_v3 = vor.u32 %v1490_v1, %v1067_v0  ;;  %v1522_v4 = vld [vmem:[%s2341_s1 + $0x174] sm:$0xf0]  ;;  %v1488_v13 = vld [vmem:[%s2341_s1 + $0x64] sm:$0xf0] }
   0x3   :  { %v1259_v5 = vld [vmem:[%s2341_s1 + $0x1f0] sm:$0xf]  ;;  %v1538_v6 = vld [vmem:[%s2341_s1 + $0x1f4] sm:$0xf0]  ;;  %v1196_v7 = vor.u32 %v1522_v4, %v1195_v2  ;;  %v1187_v14 = vld [vmem:[%s2341_s1 + $0x160] sm:$0xf]  ;;  %v1060_v16 = vor.u32 %v1488_v13, %v1059_v11 }
   0x4   :  { %v1260_v8 = vor.u32 %v1538_v6, %v1259_v5  ;;  %v1131_v9 = vld [vmem:[%s2341_s1 + $0xf0] sm:$0xf]  ;;  %v1506_v10 = vld [vmem:[%s2341_s1 + $0xf4] sm:$0xf0]  ;;  %647 = vmatpush.bf16.msra.mxu0 %v1068_v3  ;;  %v1520_v15 = vld [vmem:[%s2341_s1 + $0x164] sm:$0xf0] }
   0x5   :  { %v1132_v12 = vor.u32 %v1506_v10, %v1131_v9  ;;  %673 = vmatpush.bf16.msra.mxu2 %v1196_v7  ;;  %v1188_v17 = vor.u32 %v1520_v15, %v1187_v14  ;;  %v1251_v18 = vld [vmem:[%s2341_s1 + $0x1e0] sm:$0xf]  ;;  %v1536_v19 = vld [vmem:[%s2341_s1 + $0x1e4] sm:$0xf0]  ;;  %v1051_v23 = vld [vmem:[%s2341_s1 + $0x50] sm:$0xf] }
   0x6   :  { %686 = vmatpush.bf16.msra.mxu3 %v1260_v8  ;;  %v1123_v20 = vld [vmem:[%s2341_s1 + $0xe0] sm:$0xf]  ;;  %v1252_v21 = vor.u32 %v1536_v19, %v1251_v18  ;;  %v1504_v22 = vld [vmem:[%s2341_s1 + $0xe4] sm:$0xf0]  ;;  %v1486_v24 = vld [vmem:[%s2341_s1 + $0x54] sm:$0xf0] }
   0x7   :  { %660 = vmatpush.bf16.msra.mxu1 %v1132_v12  ;;  %v1124_v25 = vor.u32 %v1504_v22, %v1123_v20  ;;  %v1179_v26 = vld [vmem:[%s2341_s1 + $0x150] sm:$0xf]  ;;  %v1518_v27 = vld [vmem:[%s2341_s1 + $0x154] sm:$0xf0]  ;;  %v1052_v29 = vor.u32 %v1486_v24, %v1051_v23  ;;  %v1043_v35 = vld [vmem:[%s2341_s1 + $0x40] sm:$0xf] }
   0x8   :  { %v1243_v28 = vld [vmem:[%s2341_s1 + $0x1d0] sm:$0xf]  ;;  %648 = vmatpush.bf16.msra.mxu0 %v1060_v16  ;;  %v1534_v30 = vld [vmem:[%s2341_s1 + $0x1d4] sm:$0xf0]  ;;  %v1180_v33 = vor.u32 %v1518_v27, %v1179_v26  ;;  %v1484_v36 = vld [vmem:[%s2341_s1 + $0x44] sm:$0xf0] }
   0x9   :  { %v1115_v31 = vld [vmem:[%s2341_s1 + $0xd0] sm:$0xf]  ;;  %v1502_v32 = vld [vmem:[%s2341_s1 + $0xd4] sm:$0xf0]  ;;  %674 = vmatpush.bf16.msra.mxu2 %v1188_v17  ;;  %v1244_v34 = vor.u32 %v1534_v30, %v1243_v28  ;;  %v1171_v37 = vld [vmem:[%s2341_s1 + $0x140] sm:$0xf]  ;;  %v1044_v44 = vor.u32 %v1484_v36, %v1043_v35 }
   0xa   :  { %687 = vmatpush.bf16.msra.mxu3 %v1252_v21  ;;  %v1116_v38 = vor.u32 %v1502_v32, %v1115_v31  ;;  %v1516_v39 = vld [vmem:[%s2341_s1 + $0x144] sm:$0xf0]  ;;  %v1235_v40 = vld [vmem:[%s2341_s1 + $0x1c0] sm:$0xf]  ;;  %v1035_v47 = vld [vmem:[%s2341_s1 + $0x30] sm:$0xf] }
   0xb   :  { %661 = vmatpush.bf16.msra.mxu1 %v1124_v25  ;;  %v1532_v41 = vld [vmem:[%s2341_s1 + $0x1c4] sm:$0xf0]  ;;  %v1107_v42 = vld [vmem:[%s2341_s1 + $0xc0] sm:$0xf]  ;;  %v1172_v45 = vor.u32 %v1516_v39, %v1171_v37  ;;  %v1482_v48 = vld [vmem:[%s2341_s1 + $0x34] sm:$0xf0] }
   0xc   :  { %v1500_v43 = vld [vmem:[%s2341_s1 + $0xc4] sm:$0xf0]  ;;  %649 = vmatpush.bf16.msra.mxu0 %v1052_v29  ;;  %v1236_v46 = vor.u32 %v1532_v41, %v1235_v40  ;;  %v1163_v49 = vld [vmem:[%s2341_s1 + $0x130] sm:$0xf]  ;;  %v1514_v51 = vld [vmem:[%s2341_s1 + $0x134] sm:$0xf0]  ;;  %v1036_v56 = vor.u32 %v1482_v48, %v1035_v47 }
   0xd   :  { %675 = vmatpush.bf16.msra.mxu2 %v1180_v33  ;;  %v1108_v50 = vor.u32 %v1500_v43, %v1107_v42  ;;  %v1227_v52 = vld [vmem:[%s2341_s1 + $0x1b0] sm:$0xf]  ;;  %v1530_v53 = vld [vmem:[%s2341_s1 + $0x1b4] sm:$0xf0]  ;;  %v1164_v57 = vor.u32 %v1514_v51, %v1163_v49  ;;  %v1027_v59 = vld [vmem:[%s2341_s1 + $0x20] sm:$0xf] }
   0xe   :  { %688 = vmatpush.bf16.msra.mxu3 %v1244_v34  ;;  %v1099_v54 = vld [vmem:[%s2341_s1 + $0xb0] sm:$0xf]  ;;  %v1498_v55 = vld [vmem:[%s2341_s1 + $0xb4] sm:$0xf0]  ;;  %v1228_v58 = vor.u32 %v1530_v53, %v1227_v52  ;;  %v1480_v60 = vld [vmem:[%s2341_s1 + $0x24] sm:$0xf0] }
   0xf   :  { %662 = vmatpush.bf16.msra.mxu1 %v1116_v38  ;;  %v1155_v61 = vld [vmem:[%s2341_s1 + $0x120] sm:$0xf]  ;;  %v1100_v62 = vor.u32 %v1498_v55, %v1099_v54  ;;  %v1512_v63 = vld [vmem:[%s2341_s1 + $0x124] sm:$0xf0]  ;;  %v1028_v4 = vor.u32 %v1480_v60, %v1027_v59  ;;  %v1019_v7 = vld [vmem:[%s2341_s1 + $0x10] sm:$0xf] }
  0x10   :  { %650 = vmatpush.bf16.msra.mxu0 %v1044_v44  ;;  %v1219_v0 = vld [vmem:[%s2341_s1 + $0x1a0] sm:$0xf]  ;;  %v1528_v1 = vld [vmem:[%s2341_s1 + $0x1a4] sm:$0xf0]  ;;  %v1156_v5 = vor.u32 %v1512_v63, %v1155_v61  ;;  %v1478_v8 = vld [vmem:[%s2341_s1 + $0x14] sm:$0xf0] }
  0x11   :  { %676 = vmatpush.bf16.msra.mxu2 %v1172_v45  ;;  %v1091_v2 = vld [vmem:[%s2341_s1 + $0xa0] sm:$0xf]  ;;  %v1496_v3 = vld [vmem:[%s2341_s1 + $0xa4] sm:$0xf0]  ;;  %v1220_v6 = vor.u32 %v1528_v1, %v1219_v0  ;;  %v1147_v9 = vld [vmem:[%s2341_s1 + $0x110] sm:$0xf]  ;;  %v1020_v17 = vor.u32 %v1478_v8, %v1019_v7 }
  0x12   :  { %689 = vmatpush.bf16.msra.mxu3 %v1236_v46  ;;  %v1092_v10 = vor.u32 %v1496_v3, %v1091_v2  ;;  %v1510_v11 = vld [vmem:[%s2341_s1 + $0x114] sm:$0xf0]  ;;  %v1211_v12 = vld [vmem:[%s2341_s1 + $0x190] sm:$0xf]  ;;  %v1011_v16 = vld [vmem:[%s2341_s1] sm:$0xf] }
  0x13   :  { %663 = vmatpush.bf16.msra.mxu1 %v1108_v50  ;;  %v1526_v13 = vld [vmem:[%s2341_s1 + $0x194] sm:$0xf0]  ;;  %v1083_v14 = vld [vmem:[%s2341_s1 + $0x90] sm:$0xf]  ;;  %v1476_v18 = vld [vmem:[%s2341_s1 + $0x4] sm:$0xf0]  ;;  %v1148_v21 = vor.u32 %v1510_v11, %v1147_v9 }
  0x14   :  { %651 = vmatpush.bf16.msra.mxu0 %v1036_v56  ;;  %v1494_v15 = vld [vmem:[%s2341_s1 + $0x94] sm:$0xf0]  ;;  %v1139_v19 = vld [vmem:[%s2341_s1 + $0x100] sm:$0xf]  ;;  %v1212_v22 = vor.u32 %v1526_v13, %v1211_v12  ;;  %v1508_v23 = vld [vmem:[%s2341_s1 + $0x104] sm:$0xf0]  ;;  %v1012_v32 = vor.u32 %v1476_v18, %v1011_v16 }
  0x15   :  { %677 = vmatpush.bf16.msra.mxu2 %v1164_v57  ;;  %v22_v20 = vld [vmem:[%s2340_s0] sm:$0x7f]  ;;  %v1084_v25 = vor.u32 %v1494_v15, %v1083_v14  ;;  %v1524_v26 = vld [vmem:[%s2341_s1 + $0x184] sm:$0xf0]  ;;  %v1323_v27 = vld [vmem:[%s2341_s1 + $0x270] sm:$0xf]  ;;  %v1140_v36 = vor.u32 %v1508_v23, %v1139_v19 }
  0x16   :  { %690 = vmatpush.bf16.msra.mxu3 %v1228_v58  ;;  %v1203_v24 = vld [vmem:[%s2341_s1 + $0x180] sm:$0xf]  ;;  %130 = vst [vmem:[#allocation1] ss:$9 sm:$0xff] %v22_v20  ;;  %v1554_v28 = vld [vmem:[%s2341_s1 + $0x274] sm:$0xf0] }
  0x17   :  { %664 = vmatpush.bf16.msra.mxu1 %v1100_v62  ;;  %v1403_v29 = vld [vmem:[%s2341_s1 + $0x310] sm:$0xf]  ;;  %v1574_v30 = vld [vmem:[%s2341_s1 + $0x314] sm:$0xf0]  ;;  %v1489_v31 = vld [vmem:[%s2341_s1 + $0x74] sm:$0xf]  ;;  %v1204_v37 = vor.u32 %v1524_v26, %v1203_v24  ;;  %v1324_v40 = vor.u32 %v1554_v28, %v1323_v27 }
  0x18   :  { %652 = vmatpush.bf16.msra.mxu0 %v1028_v4  ;;  %v1069_v33 = vld [vmem:[%s2341_s1 + $0x78] sm:$0xf0]  ;;  %v1075_v34 = vld [vmem:[%s2341_s1 + $0x80] sm:$0xf]  ;;  %v1492_v35 = vld [vmem:[%s2341_s1 + $0x84] sm:$0xf0]  ;;  %v1404_v41 = vor.u32 %v1574_v30, %v1403_v29 }
  0x19   :  { %678 = vmatpush.bf16.msra.mxu2 %v1156_v5  ;;  %v1387_v38 = vld [vmem:[%s2341_s1 + $0x2f0] sm:$0xf]  ;;  %v1570_v39 = vld [vmem:[%s2341_s1 + $0x2f4] sm:$0xf0]  ;;  %v1315_v42 = vld [vmem:[%s2341_s1 + $0x260] sm:$0xf]  ;;  %v1072_v44 = vor.u32 %v1489_v31, %v1069_v33  ;;  %v1076_v45 = vor.u32 %v1492_v35, %v1075_v34 }
  0x1a   :  { %691 = vmatpush.bf16.msra.mxu3 %v1220_v6  ;;  %v1552_v43 = vld [vmem:[%s2341_s1 + $0x264] sm:$0xf0]  ;;  %v1395_v46 = vld [vmem:[%s2341_s1 + $0x300] sm:$0xf]  ;;  %v1487_v48 = vld [vmem:[%s2341_s1 + $0x64] sm:$0xf]  ;;  %v1388_v49 = vor.u32 %v1570_v39, %v1387_v38 }
  0x1b   :  { %665 = vmatpush.bf16.msra.mxu1 %v1092_v10  ;;  %v1572_v47 = vld [vmem:[%s2341_s1 + $0x304] sm:$0xf0]  ;;  %v1061_v50 = vld [vmem:[%s2341_s1 + $0x68] sm:$0xf0]  ;;  %v1505_v51 = vld [vmem:[%s2341_s1 + $0xf4] sm:$0xf]  ;;  %v1316_v56 = vor.u32 %v1552_v43, %v1315_v42 }
  0x1c   :  { %653 = vmatpush.bf16.msra.mxu0 %v1020_v17  ;;  %v1133_v52 = vld [vmem:[%s2341_s1 + $0xf8] sm:$0xf0]  ;;  %v1379_v54 = vld [vmem:[%s2341_s1 + $0x2e0] sm:$0xf]  ;;  %v1568_v55 = vld [vmem:[%s2341_s1 + $0x2e4] sm:$0xf0]  ;;  %v1396_v57 = vor.u32 %v1572_v47, %v1395_v46  ;;  %v1064_v60 = vor.u32 %v1487_v48, %v1061_v50 }
  0x1d   :  { %679 = vmatpush.bf16.msra.mxu2 %v1148_v21  ;;  %v1893_v53 = vld [vmem:[#allocation1 + $0x12] sm:$0xff]  ;;  %v1901_v58 = vld [vmem:[#allocation1] sm:$0xff]  ;;  %v1136_v61 = vor.u32 %v1505_v51, %v1133_v52  ;;  %v1380_v1 = vor.u32 %v1568_v55, %v1379_v54  ;;  %v1053_v2 = vld [vmem:[%s2341_s1 + $0x58] sm:$0xf0] }
  0x1e   :  { %692 = vmatpush.bf16.msra.mxu3 %v1212_v22  ;;  %v1903_v59 = vld [vmem:[#allocation1 + $0x1b] sm:$0xff]  ;;  %v1307_v62 = vld [vmem:[%s2341_s1 + $0x250] sm:$0xf]  ;;  %v1485_v0 = vld [vmem:[%s2341_s1 + $0x54] sm:$0xf] }
  0x1f   :  { %666 = vmatpush.bf16.msra.mxu1 %v1084_v25  ;;  %v1550_v63 = vld [vmem:[%s2341_s1 + $0x254] sm:$0xf0]  ;;  %v1503_v3 = vld [vmem:[%s2341_s1 + $0xe4] sm:$0xf]  ;;  %v1125_v4 = vld [vmem:[%s2341_s1 + $0xe8] sm:$0xf0]  ;;  %v1056_v9 = vor.u32 %v1485_v0, %v1053_v2 }
  0x20   :  { %654 = vmatpush.bf16.msra.mxu0 %v1012_v32  ;;  %v1371_v5 = vld [vmem:[%s2341_s1 + $0x2d0] sm:$0xf]  ;;  %v1566_v6 = vld [vmem:[%s2341_s1 + $0x2d4] sm:$0xf0]  ;;  %v1308_v7 = vor.u32 %v1550_v63, %v1307_v62  ;;  %v1128_v10 = vor.u32 %v1503_v3, %v1125_v4  ;;  %v1299_v11 = vld [vmem:[%s2341_s1 + $0x240] sm:$0xf] }
  0x21   :  { %680 = vmatpush.bf16.msra.mxu2 %v1140_v36  ;;  %v1932_v8 = vld [vmem:[#allocation1 + $0x9] sm:$0xff]  ;;  %v1483_v13 = vld [vmem:[%s2341_s1 + $0x44] sm:$0xf]  ;;  %v1372_v14 = vor.u32 %v1566_v6, %v1371_v5  ;;  %v1501_v16 = vld [vmem:[%s2341_s1 + $0xd4] sm:$0xf] }
  0x22   :  { %693 = vmatpush.bf16.msra.mxu3 %v1204_v37  ;;  %v1548_v12 = vld [vmem:[%s2341_s1 + $0x244] sm:$0xf0]  ;;  %v1045_v15 = vld [vmem:[%s2341_s1 + $0x48] sm:$0xf0]  ;;  %v1117_v17 = vld [vmem:[%s2341_s1 + $0xd8] sm:$0xf0] }
  0x23   :  { %667 = vmatpush.bf16.msra.mxu1 %v1076_v45  ;;  %655 = vmatmul.bf16.vlgmr.msra.gmra.mxu0 %v1901_v58  ;;  %v1363_v18 = vld [vmem:[%s2341_s1 + $0x2c0] sm:$0xf]  ;;  %v1564_v19 = vld [vmem:[%s2341_s1 + $0x2c4] sm:$0xf0]  ;;  %v1300_v20 = vor.u32 %v1548_v12, %v1299_v11  ;;  %v1048_v21 = vor.u32 %v1483_v13, %v1045_v15  ;;  %v1120_v22 = vor.u32 %v1501_v16, %v1117_v17  ;;  %v1291_v23 = vld [vmem:[%s2341_s1 + $0x230] sm:$0xf] }
  0x24   :  { %699 = vmatpush.bf16.msrb.mxu0 %v1324_v40  ;;  %681 = vmatmul.bf16.vlgmr.msra.gmra.mxu2 %v1893_v53  ;;  %v1546_v24 = vld [vmem:[%s2341_s1 + $0x234] sm:$0xf0]  ;;  %v1481_v25 = vld [vmem:[%s2341_s1 + $0x34] sm:$0xf]  ;;  %v1364_v26 = vor.u32 %v1564_v19, %v1363_v18  ;;  %v1037_v27 = vld [vmem:[%s2341_s1 + $0x38] sm:$0xf0] }
  0x25   :  { %731 = vmatpush.bf16.msrb.mxu2 %v1404_v41  ;;  %694 = vmatmul.bf16.vlgmr.msra.gmra.mxu3 %v1903_v59  ;;  %v1499_v28 = vld [vmem:[%s2341_s1 + $0xc4] sm:$0xf]  ;;  %v1109_v29 = vld [vmem:[%s2341_s1 + $0xc8] sm:$0xf0]  ;;  %v1355_v30 = vld [vmem:[%s2341_s1 + $0x2b0] sm:$0xf]  ;;  %v1292_v32 = vor.u32 %v1546_v24, %v1291_v23  ;;  %v1040_v33 = vor.u32 %v1481_v25, %v1037_v27 }
  0x26   :  { %738 = vmatpush.bf16.msrb.mxu3 %v1072_v44  ;;  %668 = vmatmul.bf16.vlgmr.msra.gmra.mxu1 %v1932_v8  ;;  %v1562_v31 = vld [vmem:[%s2341_s1 + $0x2b4] sm:$0xf0]  ;;  %v1112_v34 = vor.u32 %v1499_v28, %v1109_v29  ;;  %v1283_v35 = vld [vmem:[%s2341_s1 + $0x220] sm:$0xf]  ;;  %v1544_v36 = vld [vmem:[%s2341_s1 + $0x224] sm:$0xf0] }
  0x27   :  { %712 = vmatpush.bf16.msrb.mxu1 %v1388_v49  ;;  %v1479_v37 = vld [vmem:[%s2341_s1 + $0x24] sm:$0xf]  ;;  %v1356_v38 = vor.u32 %v1562_v31, %v1355_v30  ;;  %v1029_v39 = vld [vmem:[%s2341_s1 + $0x28] sm:$0xf0]  ;;  %v1497_v40 = vld [vmem:[%s2341_s1 + $0xb4] sm:$0xf]  ;;  %v1284_v45 = vor.u32 %v1544_v36, %v1283_v35 }
  0x28   :  { %700 = vmatpush.bf16.msrb.mxu0 %v1316_v56  ;;  %v1101_v41 = vld [vmem:[%s2341_s1 + $0xb8] sm:$0xf0]  ;;  %v1347_v42 = vld [vmem:[%s2341_s1 + $0x2a0] sm:$0xf]  ;;  %v1560_v43 = vld [vmem:[%s2341_s1 + $0x2a4] sm:$0xf0]  ;;  %v1032_v46 = vor.u32 %v1479_v37, %v1029_v39 }
  0x29   :  { %732 = vmatpush.bf16.msrb.mxu2 %v1396_v57  ;;  %v2007_v44 = vld [vmem:[#allocation1 + $0x36] sm:$0xff]  ;;  %v1104_v47 = vor.u32 %v1497_v40, %v1101_v41  ;;  %v1275_v48 = vld [vmem:[%s2341_s1 + $0x210] sm:$0xf]  ;;  %v1348_v51 = vor.u32 %v1560_v43, %v1347_v42  ;;  %v1495_v54 = vld [vmem:[%s2341_s1 + $0xa4] sm:$0xf] }
  0x2a   :  { %739 = vmatpush.bf16.msrb.mxu3 %v1064_v60  ;;  %v1542_v49 = vld [vmem:[%s2341_s1 + $0x214] sm:$0xf0]  ;;  %v1477_v50 = vld [vmem:[%s2341_s1 + $0x14] sm:$0xf]  ;;  %v1021_v52 = vld [vmem:[%s2341_s1 + $0x18] sm:$0xf0] }
  0x2b   :  { %713 = vmatpush.bf16.msrb.mxu1 %v1380_v1  ;;  %v1093_v55 = vld [vmem:[%s2341_s1 + $0xa8] sm:$0xf0]  ;;  %v1339_v56 = vld [vmem:[%s2341_s1 + $0x290] sm:$0xf]  ;;  %v1558_v57 = vld [vmem:[%s2341_s1 + $0x294] sm:$0xf0]  ;;  %v1276_v60 = vor.u32 %v1542_v49, %v1275_v48  ;;  %v1024_v62 = vor.u32 %v1477_v50, %v1021_v52 }
  0x2c   :  { %701 = vmatpush.bf16.msrb.mxu0 %v1308_v7  ;;  %v1096_v63 = vor.u32 %v1495_v54, %v1093_v55  ;;  %v1540_v0 = vld [vmem:[%s2341_s1 + $0x204] sm:$0xf0]  ;;  %v1475_v1 = vld [vmem:[%s2341_s1 + $0x4] sm:$0xf]  ;;  %v1013_v2 = vld [vmem:[%s2341_s1 + $0x8] sm:$0xf0]  ;;  %v1340_v3 = vor.u32 %v1558_v57, %v1339_v56 }
  0x2d   :  { %751 = vmatpush.bf16.msra.mxu2 %v1136_v61  ;;  %v1267_v61 = vld [vmem:[%s2341_s1 + $0x200] sm:$0xf]  ;;  %v1493_v4 = vld [vmem:[%s2341_s1 + $0x94] sm:$0xf]  ;;  %v1085_v5 = vld [vmem:[%s2341_s1 + $0x98] sm:$0xf0] }
  0x2e   :  { %740 = vmatpush.bf16.msrb.mxu3 %v1056_v9  ;;  %v1521_v6 = vld [vmem:[%s2341_s1 + $0x174] sm:$0xf]  ;;  %v1197_v7 = vld [vmem:[%s2341_s1 + $0x178] sm:$0xf0]  ;;  %v1268_v11 = vor.u32 %v1540_v0, %v1267_v61  ;;  %v1331_v12 = vld [vmem:[%s2341_s1 + $0x280] sm:$0xf]  ;;  %v1088_v15 = vor.u32 %v1493_v4, %v1085_v5 }
  0x2f   :  { %714 = vmatpush.bf16.msrb.mxu1 %v1372_v14  ;;  %v1553_v9 = vld [vmem:[%s2341_s1 + $0x274] sm:$0xf]  ;;  %v1556_v13 = vld [vmem:[%s2341_s1 + $0x284] sm:$0xf0]  ;;  %v1016_v14 = vor.u32 %v1475_v1, %v1013_v2  ;;  %v1261_v17 = vld [vmem:[%s2341_s1 + $0x1f8] sm:$0xf0]  ;;  %v1200_v18 = vor.u32 %v1521_v6, %v1197_v7 }
  0x30   :  { %702 = vmatpush.bf16.msrb.mxu0 %v1300_v20  ;;  %v1537_v16 = vld [vmem:[%s2341_s1 + $0x1f4] sm:$0xf]  ;;  %v2077_v20 = vld [vmem:[#allocation1 + $0x24] sm:$0xff]  ;;  %v1332_v23 = vor.u32 %v1556_v13, %v1331_v12  ;;  %v1189_v25 = vld [vmem:[%s2341_s1 + $0x168] sm:$0xf0] }
  0x31   :  { %752 = vmatpush.bf16.msra.mxu2 %v1128_v10  ;;  %v1325_v10 = vld [vmem:[%s2341_s1 + $0x278] sm:$0xf0]  ;;  %v1519_v24 = vld [vmem:[%s2341_s1 + $0x164] sm:$0xf]  ;;  %v1264_v27 = vor.u32 %v1537_v16, %v1261_v17  ;;  %v1317_v28 = vld [vmem:[%s2341_s1 + $0x268] sm:$0xf0] }
  0x32   :  { %741 = vmatpush.bf16.msrb.mxu3 %v1048_v21  ;;  %v1328_v19 = vor.u32 %v1553_v9, %v1325_v10  ;;  %v1491_v21 = vld [vmem:[%s2341_s1 + $0x84] sm:$0xf]  ;;  %v1569_v29 = vld [vmem:[%s2341_s1 + $0x2f4] sm:$0xf]  ;;  %v1389_v30 = vld [vmem:[%s2341_s1 + $0x2f8] sm:$0xf0]  ;;  %v1192_v35 = vor.u32 %v1519_v24, %v1189_v25 }
  0x33   :  { %715 = vmatpush.bf16.msrb.mxu1 %v1364_v26  ;;  %v1551_v26 = vld [vmem:[%s2341_s1 + $0x264] sm:$0xf]  ;;  %v1392_v37 = vor.u32 %v1569_v29, %v1389_v30  ;;  %v1181_v39 = vld [vmem:[%s2341_s1 + $0x158] sm:$0xf0]  ;;  %v1549_v40 = vld [vmem:[%s2341_s1 + $0x254] sm:$0xf] }
  0x34   :  { %703 = vmatpush.bf16.msrb.mxu0 %v1292_v32  ;;  %1409 = vmatmul.msk.bf16.vlgmr.msrb.gmra.mxu2 %vm644_vm0, %v2007_v44  ;;  %v1535_v32 = vld [vmem:[%s2341_s1 + $0x1e4] sm:$0xf]  ;;  %v1320_v36 = vor.u32 %v1551_v26, %v1317_v28  ;;  %v1309_v42 = vld [vmem:[%s2341_s1 + $0x258] sm:$0xf0]  ;;  %v1301_v54 = vld [vmem:[%s2341_s1 + $0x248] sm:$0xf0] }
  0x35   :  { %753 = vmatpush.bf16.msra.mxu2 %v1120_v22  ;;  %v1077_v22 = vld [vmem:[%s2341_s1 + $0x88] sm:$0xf0]  ;;  %v1567_v43 = vld [vmem:[%s2341_s1 + $0x2e4] sm:$0xf]  ;;  %v1565_v56 = vld [vmem:[%s2341_s1 + $0x2d4] sm:$0xf] }
  0x36   :  { %742 = vmatpush.bf16.msrb.mxu3 %v1040_v33  ;;  %v1080_v31 = vor.u32 %v1491_v21, %v1077_v22  ;;  %v1253_v33 = vld [vmem:[%s2341_s1 + $0x1e8] sm:$0xf0]  ;;  %v1515_v49 = vld [vmem:[%s2341_s1 + $0x144] sm:$0xf]  ;;  %v1373_v57 = vld [vmem:[%s2341_s1 + $0x2d8] sm:$0xf0] }
  0x37   :  { %716 = vmatpush.bf16.msrb.mxu1 %v1356_v38  ;;  %v1517_v38 = vld [vmem:[%s2341_s1 + $0x154] sm:$0xf]  ;;  %v1256_v41 = vor.u32 %v1535_v32, %v1253_v33  ;;  %v1547_v52 = vld [vmem:[%s2341_s1 + $0x244] sm:$0xf]  ;;  %v1237_v61 = vld [vmem:[%s2341_s1 + $0x1c8] sm:$0xf0] }
  0x38   :  { %704 = vmatpush.bf16.msrb.mxu0 %v1284_v45  ;;  %v1381_v45 = vld [vmem:[%s2341_s1 + $0x2e8] sm:$0xf0]  ;;  %v1184_v48 = vor.u32 %v1517_v38, %v1181_v39 }
  0x39   :  { %754 = vmatpush.bf16.msra.mxu2 %v1112_v34  ;;  %v2109_v34 = vld [vmem:[#allocation1 + $0x2d] sm:$0xff]  ;;  %v1384_v50 = vor.u32 %v1567_v43, %v1381_v45 }
  0x3a   :  { %743 = vmatpush.bf16.msrb.mxu3 %v1032_v46  ;;  %v1533_v46 = vld [vmem:[%s2341_s1 + $0x1d4] sm:$0xf] }
  0x3b   :  { %717 = vmatpush.bf16.msrb.mxu1 %v1348_v51  ;;  %v1173_v51 = vld [vmem:[%s2341_s1 + $0x148] sm:$0xf0] }
  0x3c   :  { %705 = vmatpush.bf16.msrb.mxu0 %v1276_v60  ;;  %v1531_v60 = vld [vmem:[%s2341_s1 + $0x1c4] sm:$0xf] }
  0x3d   :  { %755 = vmatpush.bf16.msra.mxu2 %v1104_v47  ;;  %v1245_v47 = vld [vmem:[%s2341_s1 + $0x1d8] sm:$0xf0] }
  0x3e   :  { %744 = vmatpush.bf16.msrb.mxu3 %v1024_v62  ;;  %v1248_v55 = vor.u32 %v1533_v46, %v1245_v47 }
  0x3f   :  { %718 = vmatpush.bf16.msrb.mxu1 %v1340_v3 }
  0x40   :  { %706 = vmatpush.bf16.msrb.mxu0 %v1268_v11 }
  0x41   :  { %756 = vmatpush.bf16.msra.mxu2 %v1096_v63 }
  0x42   :  { %745 = vmatpush.bf16.msrb.mxu3 %v1016_v14 }
  0x43   :  { %719 = vmatpush.bf16.msrb.mxu1 %v1332_v23  ;;  %707 = vmatmul.bf16.vlgmr.msrb.gmra.mxu0 %v2077_v20 }
  0x44   :  { %764 = vmatpush.bf16.msra.mxu0 %v1200_v18 }
  0x45   :  { %757 = vmatpush.bf16.msra.mxu2 %v1088_v15  ;;  %746 = vmatmul.bf16.vlgmr.msrb.gmra.mxu3 %v1901_v58  ;;  %v1312_v58 = vor.u32 %v1549_v40, %v1309_v42 }
  0x46   :  { %790 = vmatpush.bf16.msra.mxu3 %v1328_v19  ;;  %720 = vmatmul.bf16.vlgmr.msrb.gmra.mxu1 %v2109_v34 }
  0x47   :  { %777 = vmatpush.bf16.msra.mxu1 %v1264_v27 }
  0x48   :  { %765 = vmatpush.bf16.msra.mxu0 %v1192_v35 }
  0x49   :  { %758 = vmatpush.bf16.msra.mxu2 %v1080_v31 }
  0x4a   :  { %791 = vmatpush.bf16.msra.mxu3 %v1320_v36 }
  0x4b   :  { %778 = vmatpush.bf16.msra.mxu1 %v1256_v41 }
  0x4c   :  { %759 = vmatmul.bf16.vlgmr.msra.gmra.mxu2 %v1932_v8 }
  0x4d   :  { %803 = vmatpush.bf16.msrb.mxu2 %v1392_v37 }
  0x4e   :  { %10 = vsyncpa [#allocation3], 0  ;;  %766 = vmatpush.bf16.msra.mxu0 %v1184_v48  ;;  %v1176_v62 = vor.u32 %v1515_v49, %v1173_v51  ;;  %792 = vmatpush.bf16.msra.mxu3 %v1312_v58  ;;  %v1304_v63 = vor.u32 %v1547_v52, %v1301_v54  ;;  %v1376_v0 = vor.u32 %v1565_v56, %v1373_v57  ;;  %v1513_v1 = vld [vmem:[%s2341_s1 + $0x134] sm:$0xf]  ;;  %v1165_v8 = vld [vmem:[%s2341_s1 + $0x138] sm:$0xf0] }
  0x4f   :  { %v1545_v2 = vld [vmem:[%s2341_s1 + $0x234] sm:$0xf]  ;;  %779 = vmatpush.bf16.msra.mxu1 %v1248_v55  ;;  %v1240_v3 = vor.u32 %v1531_v60, %v1237_v61  ;;  %v1293_v4 = vld [vmem:[%s2341_s1 + $0x238] sm:$0xf0]  ;;  %v1563_v5 = vld [vmem:[%s2341_s1 + $0x2c4] sm:$0xf]  ;;  %v1168_v10 = vor.u32 %v1513_v1, %v1165_v8 }
  0x50   :  { %v1365_v6 = vld [vmem:[%s2341_s1 + $0x2c8] sm:$0xf0]  ;;  %v1529_v7 = vld [vmem:[%s2341_s1 + $0x1b4] sm:$0xf]  ;;  %v1229_v9 = vld [vmem:[%s2341_s1 + $0x1b8] sm:$0xf0]  ;;  %v1296_v11 = vor.u32 %v1545_v2, %v1293_v4 }
  0x51   :  { %804 = vmatpush.bf16.msrb.mxu2 %v1384_v50  ;;  %v1368_v12 = vor.u32 %v1563_v5, %v1365_v6  ;;  %v1511_v13 = vld [vmem:[%s2341_s1 + $0x124] sm:$0xf]  ;;  %v1157_v14 = vld [vmem:[%s2341_s1 + $0x128] sm:$0xf0]  ;;  %v1232_v16 = vor.u32 %v1529_v7, %v1229_v9  ;;  %v1561_v18 = vld [vmem:[%s2341_s1 + $0x2b4] sm:$0xf] }
  0x52   :  { %767 = vmatpush.bf16.msra.mxu0 %v1176_v62  ;;  %793 = vmatpush.bf16.msra.mxu3 %v1304_v63  ;;  %v1543_v15 = vld [vmem:[%s2341_s1 + $0x224] sm:$0xf]  ;;  %v1285_v17 = vld [vmem:[%s2341_s1 + $0x228] sm:$0xf0]  ;;  %v1357_v19 = vld [vmem:[%s2341_s1 + $0x2b8] sm:$0xf0]  ;;  %v1160_v23 = vor.u32 %v1511_v13, %v1157_v14 }
  0x53   :  { %780 = vmatpush.bf16.msra.mxu1 %v1240_v3  ;;  %v1527_v21 = vld [vmem:[%s2341_s1 + $0x1a4] sm:$0xf]  ;;  %v1221_v22 = vld [vmem:[%s2341_s1 + $0x1a8] sm:$0xf0]  ;;  %v1288_v24 = vor.u32 %v1543_v15, %v1285_v17  ;;  %v1360_v25 = vor.u32 %v1561_v18, %v1357_v19  ;;  %v1509_v26 = vld [vmem:[%s2341_s1 + $0x114] sm:$0xf] }
  0x54   :  { %v1149_v27 = vld [vmem:[%s2341_s1 + $0x118] sm:$0xf0]  ;;  %v1541_v28 = vld [vmem:[%s2341_s1 + $0x214] sm:$0xf]  ;;  %v1224_v29 = vor.u32 %v1527_v21, %v1221_v22  ;;  %v1559_v31 = vld [vmem:[%s2341_s1 + $0x2a4] sm:$0xf] }
  0x55   :  { %805 = vmatpush.bf16.msrb.mxu2 %v1376_v0  ;;  %v1277_v30 = vld [vmem:[%s2341_s1 + $0x218] sm:$0xf0]  ;;  %v1349_v32 = vld [vmem:[%s2341_s1 + $0x2a8] sm:$0xf0]  ;;  %v1525_v33 = vld [vmem:[%s2341_s1 + $0x194] sm:$0xf]  ;;  %v1152_v36 = vor.u32 %v1509_v26, %v1149_v27 }
  0x56   :  { %768 = vmatpush.bf16.msra.mxu0 %v1168_v10  ;;  %794 = vmatpush.bf16.msra.mxu3 %v1296_v11  ;;  %v1213_v35 = vld [vmem:[%s2341_s1 + $0x198] sm:$0xf0]  ;;  %v1507_v37 = vld [vmem:[%s2341_s1 + $0x104] sm:$0xf]  ;;  %v1280_v38 = vor.u32 %v1541_v28, %v1277_v30  ;;  %v1352_v39 = vor.u32 %v1559_v31, %v1349_v32  ;;  %v1141_v40 = vld [vmem:[%s2341_s1 + $0x108] sm:$0xf0] }
  0x57   :  { %781 = vmatpush.bf16.msra.mxu1 %v1232_v16  ;;  %v1539_v41 = vld [vmem:[%s2341_s1 + $0x204] sm:$0xf]  ;;  %v1269_v42 = vld [vmem:[%s2341_s1 + $0x208] sm:$0xf0]  ;;  %v1216_v43 = vor.u32 %v1525_v33, %v1213_v35  ;;  %v1557_v45 = vld [vmem:[%s2341_s1 + $0x294] sm:$0xf]  ;;  %v1144_v50 = vor.u32 %v1507_v37, %v1141_v40 }
  0x58   :  { %v1341_v46 = vld [vmem:[%s2341_s1 + $0x298] sm:$0xf0]  ;;  %v1523_v47 = vld [vmem:[%s2341_s1 + $0x184] sm:$0xf]  ;;  %v1205_v48 = vld [vmem:[%s2341_s1 + $0x188] sm:$0xf0]  ;;  %v1272_v51 = vor.u32 %v1539_v41, %v1269_v42 }
  0x59   :  { %806 = vmatpush.bf16.msrb.mxu2 %v1368_v12  ;;  %v1573_v49 = vld [vmem:[%s2341_s1 + $0x314] sm:$0xf]  ;;  %v1405_v58 = vld [vmem:[%s2341_s1 + $0x318] sm:$0xf0]  ;;  %v1344_v52 = vor.u32 %v1557_v45, %v1341_v46  ;;  %v1208_v54 = vor.u32 %v1523_v47, %v1205_v48  ;;  %v1555_v56 = vld [vmem:[%s2341_s1 + $0x284] sm:$0xf] }
  0x5a   :  { %769 = vmatpush.bf16.msra.mxu0 %v1160_v23  ;;  %795 = vmatpush.bf16.msra.mxu3 %v1288_v24  ;;  %v1408_v55 = vor.u32 %v1573_v49, %v1405_v58  ;;  %v1333_v57 = vld [vmem:[%s2341_s1 + $0x288] sm:$0xf0]  ;;  %v1571_v60 = vld [vmem:[%s2341_s1 + $0x304] sm:$0xf]  ;;  %v1582_v0 = vld [vmem:[%s2343_s3 + $0x38] sm:$0xff]  ;;  %s1619_s15 = smov [#allocation2]  }
  0x5b   :  { %782 = vmatpush.bf16.msra.mxu1 %v1224_v29  ;;  %v1397_v61 = vld [vmem:[%s2341_s1 + $0x308] sm:$0xf0]  ;;  %v1336_v62 = vor.u32 %v1555_v56, %v1333_v57  ;;  %v1575_v3 = vld [vmem:[%s2343_s3] sm:$0xff]  ;;  %v1590_v9 = vld [vmem:[%s2343_s3 + $0x78] sm:$0xff]  ;;  %s998_s16 = sshll.u32 %s1619_s15, 4  ;;  %s1000_s0 = sshll.u32 %s2345_s5, 4  ;;  %s999_s16 = int_to_ptr.vmem [resolvable:$true] %s998_s16  ;;  %s1001_s0 = int_to_ptr.hbm [resolvable:$true] %s1000_s0 }
  0x5c   :  { %v1400_v63 = vor.u32 %v1571_v60, %v1397_v61  ;;  %v1576_v8 = vld [vmem:[%s2343_s3 + $0x8] sm:$0xff]  ;;  %v123_v6 = vld [vmem:[%s2342_s2] sm:$0x3]  ;;  %v1589_v11 = vld [vmem:[%s2343_s3 + $0x70] sm:$0xff]  ;;  %vm991_vm1 = vcmask 74752  }
  0x5d   :  { %807 = vmatpush.bf16.msrb.mxu2 %v1360_v25  ;;  %v125_v10 = vperm.slane %v123_v6, 0  ;;  %v1588_v19 = vld [vmem:[%s2343_s3 + $0x68] sm:$0xff]  ;;  %v1587_v25 = vld [vmem:[%s2343_s3 + $0x60] sm:$0xff]  ;;  %v1586_v28 = vld [vmem:[%s2343_s3 + $0x58] sm:$0xff]  ;;  %v126_v42 = vperm.slane %v123_v6, 1 }
  0x5e   :  { %770 = vmatpush.bf16.msra.mxu0 %v1152_v36  ;;  %796 = vmatpush.bf16.msra.mxu3 %v1280_v38  ;;  %v1585_v33 = vld [vmem:[%s2343_s3 + $0x50] sm:$0xff]  ;;  %v1584_v38 = vld [vmem:[%s2343_s3 + $0x48] sm:$0xff]  ;;  %v1583_v40 = vld [vmem:[%s2343_s3 + $0x40] sm:$0xff] }
  0x5f   :  { %783 = vmatpush.bf16.msra.mxu1 %v1216_v43 }
  0x61   :  { %808 = vmatpush.bf16.msrb.mxu2 %v1352_v39 }
  0x62   :  { %771 = vmatpush.bf16.msra.mxu0 %v1144_v50  ;;  %797 = vmatpush.bf16.msra.mxu3 %v1272_v51 }
  0x63   :  { %784 = vmatpush.bf16.msra.mxu1 %v1208_v54 }
  0x65   :  { %809 = vmatpush.bf16.msrb.mxu2 %v1344_v52  ;;  %772 = vmatmul.bf16.vlgmr.msra.gmra.mxu0 %v1893_v53  ;;  %v1581_v53 = vld [vmem:[%s2343_s3 + $0x30] sm:$0xff] }
  0x66   :  { %822 = vmatpush.bf16.msrb.mxu0 %v1408_v55  ;;  %798 = vmatmul.bf16.vlgmr.msra.gmra.mxu3 %v2077_v20  ;;  %v1579_v20 = vld [vmem:[%s2343_s3 + $0x20] sm:$0xff] }
  0x67   :  { %785 = vmatmul.bf16.vlgmr.msra.gmra.mxu1 %v1903_v59  ;;  %v1580_v59 = vld [vmem:[%s2343_s3 + $0x28] sm:$0xff]  ;;  %978 = vmatpush.bf16.msrb.mxu3 %v1590_v9 }
  0x68   :  { %965 = vmatpush.bf16.msrb.mxu1 %v1582_v0 }
  0x69   :  { %810 = vmatpush.bf16.msrb.mxu2 %v1336_v62 }
  0x6a   :  { %823 = vmatpush.bf16.msrb.mxu0 %v1400_v63 }
  0x6b   :  { %979 = vmatpush.bf16.msrb.mxu3 %v1589_v11 }
  0x6c   :  { %811 = vmatmul.bf16.vlgmr.msrb.gmra.mxu2 %v2109_v34  ;;  %966 = vmatpush.bf16.msrb.mxu1 %v1581_v53  ;;  %v1577_v34 = vld [vmem:[%s2343_s3 + $0x10] sm:$0xff] }
  0x6f   :  { %980 = vmatpush.bf16.msrb.mxu3 %v1588_v19 }
  0x70   :  { %967 = vmatpush.bf16.msrb.mxu1 %v1580_v59 }
  0x73   :  { %981 = vmatpush.bf16.msrb.mxu3 %v1587_v25 }
  0x74   :  { %968 = vmatpush.bf16.msrb.mxu1 %v1579_v20  ;;  %v1592_v20 = vld [vmem:[%s2344_s4] ss:$0 sm:$0xff] }
  0x75   :  { %1410 = vmatmul.msk.bf16.vlgmr.msrb.gmra.mxu0 %vm644_vm0, %v2007_v44  ;;  %v1578_v44 = vld [vmem:[%s2343_s3 + $0x18] sm:$0xff] }
  0x77   :  { %982 = vmatpush.bf16.msrb.mxu3 %v1586_v28 }
  0x78   :  { %969 = vmatpush.bf16.msrb.mxu1 %v1578_v44 }
  0x7b   :  { %983 = vmatpush.bf16.msrb.mxu3 %v1585_v33 }
  0x7c   :  { %970 = vmatpush.bf16.msrb.mxu1 %v1577_v34 }
  0x7f   :  { %984 = vmatpush.bf16.msrb.mxu3 %v1584_v38 }
  0x80   :  { %971 = vmatpush.bf16.msrb.mxu1 %v1576_v8 }
  0x83   :  { %985 = vmatpush.bf16.msrb.mxu3 %v1583_v40 }
  0x84   :  { %972 = vmatpush.bf16.msrb.mxu1 %v1575_v3 }
  0xa0   :  { %v656_v1 = vpop.f32.mrf.mxu0 }
  0xa1   :  { %v657_v15 = vadd.f32 %v656_v1, %v125_v10 }
  0xa3   :  { %v669_v2 = vpop.f32.mrf.mxu1 }
  0xa4   :  { %v670_v16 = vadd.f32 %v669_v2, %v657_v15 }
  0xa7   :  { %v682_v4 = vpop.f32.mrf.mxu2 }
  0xa8   :  { %v695_v5 = vpop.f32.mrf.mxu3  ;;  %v658_v7 = vpop.f32.mrf.mxu0  ;;  %v683_v18 = vadd.f32 %v682_v4, %v670_v16 }
  0xaa   :  { %v696_v21 = vadd.f32 %v695_v5, %v683_v18 }
  0xab   :  { %v671_v12 = vpop.f32.mrf.mxu1 }
  0xaf   :  { %v684_v13 = vpop.f32.mrf.mxu2 }
  0xb0   :  { %v697_v14 = vpop.f32.mrf.mxu3 }
  0xb7   :  { %v734_v17 = vpop.f32.mrf.mxu2 }
  0xbf   :  { %v736_v24 = vpop.f32.mrf.mxu2 }
  0xc0   :  { %v708_v22 = vpop.f32.mrf.mxu0 }
  0xc1   :  { %v709_v23 = vadd.f32 %v708_v22, %v696_v21 }
  0xc3   :  { %v721_v26 = vpop.f32.mrf.mxu1 }
  0xc4   :  { %v722_v27 = vadd.f32 %v721_v26, %v709_v23 }
  0xc6   :  { %v735_v29 = vadd.f32 %v734_v17, %v722_v27 }
  0xc8   :  { %v747_v30 = vpop.f32.mrf.mxu3  ;;  %v829_v31 = vmax.f32 %v735_v29, 0.0  ;;  %v710_v32 = vpop.f32.mrf.mxu0 }
  0xc9   :  { %v748_v43 = vadd.f32 %v747_v30, %v126_v42 }
  0xca   :  { %v831_v35 = vpack.c.bf16 %v829_v31, %v829_v31 }
  0xcb   :  { %v723_v37 = vpop.f32.mrf.mxu1 }
  0xcc   :  { %973 = vmatmul.bf16.vlgmr.msrb.gmra.mxu1 %v831_v35 }
  0xcf   :  { %v760_v36 = vpop.f32.mrf.mxu2 }
  0xd0   :  { %v749_v39 = vpop.f32.mrf.mxu3  ;;  %v761_v47 = vadd.f32 %v760_v36, %v748_v43 }
  0xd7   :  { %v762_v41 = vpop.f32.mrf.mxu2 }
  0xe2   :  { %v773_v45 = vpop.f32.mrf.mxu0 }
  0xe3   :  { %v774_v48 = vadd.f32 %v773_v45, %v761_v47 }
  0xe4   :  { %v786_v46 = vpop.f32.mrf.mxu1 }
  0xe5   :  { %v787_v51 = vadd.f32 %v786_v46, %v774_v48 }
  0xe9   :  { %v799_v49 = vpop.f32.mrf.mxu3 }
  0xea   :  { %v775_v58 = vpop.f32.mrf.mxu0  ;;  %v800_v54 = vadd.f32 %v799_v49, %v787_v51 }
  0xec   :  { %v788_v50 = vpop.f32.mrf.mxu1 }
  0xef   :  { %v812_v52 = vpop.f32.mrf.mxu2 }
  0xf0   :  { %v813_v55 = vadd.f32 %v812_v52, %v800_v54 }
  0xf1   :  { %v801_v56 = vpop.f32.mrf.mxu3 }
  0xf2   :  { %v825_v57 = vpop.f32.mrf.mxu0 }
  0xf3   :  { %v826_v60 = vadd.f32 %v825_v57, %v813_v55 }
  0xf5   :  { %v830_v61 = vmax.f32 %v826_v60, 0.0 }
  0xf7   :  { %v814_v62 = vpop.f32.mrf.mxu2  ;;  %v832_v63 = vpack.c.bf16 %v830_v61, %v830_v61 }
  0xf9   :  { %986 = vmatmul.bf16.vlgmr.msrb.gmra.mxu3 %v832_v63 }
  0xfa   :  { %v827_v0 = vpop.f32.mrf.mxu0 }
 0x149   :  { %v974_v53 = vpop.f32.mrf.mxu1 }
 0x14a   :  { %v975_v44 = vadd.f32 %v1592_v20, %v974_v53 }
 0x151   :  { %v976_v59 = vpop.f32.mrf.mxu1 }
 0x17c   :  { %v987_v34 = vpop.f32.mrf.mxu3 }
 0x17d   :  { %v988_v1 = vadd.f32 %v987_v34, %v975_v44 }
 0x17f   :  { %992 = vst.msk [vmem:[#allocation2] sm:$0x3] %vm991_vm1, %v988_v1 }
 0x180   :  { %1003 = dma.vmem_to_hbm [thread:$0]  %s999_s16, 32, %s1001_s0, [#allocation3]  }
 0x184   :  { %v989_v8 = vpop.f32.mrf.mxu3 }
 0x185   :  { %1617 = dma.done.wait [#allocation3], 32  }
 0x186   :  { %1618 = vsyncadd [#allocation3], 4294967264 }
 0x187   :  { %1008 = vsyncpa [#allocation3], 1 }

</bundles_post_ra>
